<compile_context>
chip_gen: v5e
topology: v5e:2x2
jax: 0.10.0
libtpu: 0.0.40
codegen_flags: <defaults>
</compile_context>

<pallas_src>
import functools

import jax
import jax.numpy as jnp
import numpy as np
from jax.experimental import pallas as pl
from jax.experimental.pallas import tpu as pltpu

DEFAULT_TILE_B = 64  # images per grid step (sweepable; multiple of 8)

# Row ordering of the 28 conv1 output rows inside a tile: pos = (p1*2+p2)*7+j
# corresponds to spatial row h = 4*j + 2*p2 + p1, so both H max-pools become a
# single max of the top half vs. the bottom half of the row blocks.
_H_ORDER = np.array([4 * j + 2 * p2 + p1
                     for p1 in range(2) for p2 in range(2) for j in range(7)],
                    dtype=np.int32)
# Padded-row indices of the 3 conv bands for every output row: (28, 3).
_HIDX = _H_ORDER[:, None] + np.arange(3, dtype=np.int32)[None, :]


# ---------------------------------------------------------------------------
# Fused forward kernel (one grid step = tb images).
#
# Activation layout ("rows x lanes"):
#   rows  = (spatial position in the (p1,p2,j) order above, image_in_tile),
#           image minor -> every pool step in H is a max of two contiguous,
#           sublane-aligned row halves.
#   lanes = (W-pool parity, spatial col, channel), channel minor.  The weight
#           matrices put even/odd W output columns in separate 256-lane halves
#           so the W pool is a max of two 128-aligned lane halves, and the
#           even-column selection is folded into the next conv's weights.
# ---------------------------------------------------------------------------
def _net1_kernel(x_ref, w1_ref, bd2_ref, bd3_ref, wfc_ref,
                 b2_ref, b3_ref, bfc_ref, out_ref, *, tb):
    f32 = jnp.float32
    bf16 = jnp.bfloat16

    # ---- Conv2d(1, 16, 3, stride=1, padding=1): ONE banded matmul, K=96 ----
    # x_ref: (28*tb, 96) bf16; lanes 0..89 = three shifted padded rows,
    # lane 90 = 1.0 (bias fold).  Output lanes: p*256 + w2i*16 + c1.
    h = jnp.dot(x_ref[...], w1_ref[...], preferred_element_type=f32)  # (28tb,512)

    # ---- MaxPool2d(2) + ReLU  (28x28 -> 14x14) -----------------------------
    h = jnp.maximum(h[:14 * tb, :], h[14 * tb:, :])     # H pairs (p1 halves)
    h = jnp.maximum(h[:, :256], h[:, 256:])             # W pairs (lane halves)
    h = jnp.maximum(h, 0.0)                             # ReLU, (14tb, 256)

    # ---- Conv2d(16, 32, 1): also folds the next pool's W-parity split ------
    h = jnp.dot(h.astype(bf16), bd2_ref[...], preferred_element_type=f32)
    h = h + b2_ref[...]                                 # (14tb, 512)

    # ---- MaxPool2d(2) + ReLU  (14x14 -> 7x7) -------------------------------
    h = jnp.maximum(h[:7 * tb, :], h[7 * tb:, :])       # H pairs (p2 halves)
    h = jnp.maximum(h[:, :256], h[:, 256:])             # W pairs
    h = jnp.maximum(h, 0.0)                             # (7tb, 256)

    # ---- Conv2d(32, 64, 1) + ReLU ------------------------------------------
    h = jnp.dot(h.astype(bf16), bd3_ref[...], preferred_element_type=f32)
    h = jnp.maximum(h + b3_ref[...], 0.0)               # (7tb, 448)

    # ---- Linear(64*7*7, 10) into a lane-dense (tb, 128) block --------------
    # bfc_ref holds -1e30 on the 118 pad lanes so softmax ignores them.
    logits = jnp.zeros((tb, 128), f32) + bfc_ref[...]
    for j in range(7):                                  # j == output H index
        logits = logits + jnp.dot(h[j * tb:(j + 1) * tb, :].astype(bf16),
                                  wfc_ref[j], preferred_element_type=f32)

    # ---- Softmax(dim=-1), numerically stable, exact division ---------------
    m = jnp.max(logits, axis=-1, keepdims=True)
    e = jnp.exp(logits - m)                             # pad lanes -> exactly 0
    s = jnp.sum(e, axis=-1, keepdims=True)
    out_ref[...] = (e / s).astype(out_ref.dtype)


# ---------------------------------------------------------------------------
# Parameters: PyTorch layouts -> structured matrices consumed by the kernel.
# ---------------------------------------------------------------------------
def init_torch_params(key):
    """Deterministic parameters in Net1's PyTorch layouts."""
    ks = jax.random.split(key, 8)
    w1 = jax.random.normal(ks[0], (16, 1, 3, 3), jnp.float32) * 0.1   # Conv2d(1,16,3)
    b1 = jax.random.normal(ks[1], (16,), jnp.float32) * 0.1
    w2 = jax.random.normal(ks[2], (32, 16, 1, 1), jnp.float32) * 0.1  # Conv2d(16,32,1)
    b2 = jax.random.normal(ks[3], (32,), jnp.float32) * 0.1
    w3 = jax.random.normal(ks[4], (64, 32, 1, 1), jnp.float32) * 0.1  # Conv2d(32,64,1)
    b3 = jax.random.normal(ks[5], (64,), jnp.float32) * 0.1
    wfc = jax.random.normal(ks[6], (10, 64 * 7 * 7), jnp.float32) * 0.02  # Linear
    bfc = jax.random.normal(ks[7], (10,), jnp.float32) * 0.02
    return (w1, b1, w2, b2, w3, b3, wfc, bfc)


def prepare_kernel_params(torch_params):
    """Re-pack PyTorch-layout parameters into the matmul-friendly structured
    matrices the fused kernel consumes (numpy, once, off the hot path)."""
    w1, b1, w2, b2, w3, b3, wfc, bfc = (np.asarray(p, np.float32) for p in torch_params)

    # Conv1 (3x3, pad 1) as one banded matmul over the 96-lane LHS built by
    # _prep_input.  LHS lane di*30 + wj = padded pixel (h+di, wj); lane 90 = 1.
    # Output lane p*256 + w2i*16 + c1 is channel c1 at W = 2*w2i + p.
    w1m = np.zeros((96, 2, 256), np.float32)
    for di in range(3):
        for dj in range(3):
            for p in range(2):
                for w2i in range(14):
                    wj = 2 * w2i + p + dj
                    w1m[di * 30 + wj, p, w2i * 16:(w2i + 1) * 16] += w1[:, 0, di, dj]
    for p in range(2):                                   # bias via the ones-lane
        for w2i in range(14):
            w1m[90, p, w2i * 16:(w2i + 1) * 16] = b1
    w1m = w1m.reshape(96, 512)

    # Conv2 (1x1): rows follow pooled stage-1 lanes (w2i*16 + c1), columns are
    # parity-split for the next W pool: w2i = 2*w4 + q.
    w2m = w2.reshape(32, 16).T                           # (c1, c2)
    bd2 = np.zeros((256, 2, 256), np.float32)
    for q in range(2):
        for w4 in range(7):
            w2i = 2 * w4 + q
            bd2[w2i * 16:(w2i + 1) * 16, q, w4 * 32:(w4 + 1) * 32] = w2m
    bd2 = bd2.reshape(256, 512)
    b2l = np.zeros((2, 256), np.float32)
    b2l[:, :224] = np.tile(b2, 7)
    b2l = b2l.reshape(1, 512)

    # Conv3 (1x1) block-diagonal: (w4*32 + c2) -> (w4*64 + c3).
    w3m = w3.reshape(64, 32).T                           # (c2, c3)
    bd3 = np.zeros((256, 448), np.float32)
    for w4 in range(7):
        bd3[w4 * 32:(w4 + 1) * 32, w4 * 64:(w4 + 1) * 64] = w3m
    b3l = np.tile(b3, 7).reshape(1, 448).astype(np.float32)

    # FC: PyTorch flattens NCHW (c*49 + h4*7 + w4); reorder rows to the kernel
    # activation layout (h4, w4*64 + c3) and pad columns to a lane-dense 128.
    wfcr = np.zeros((7, 448, 128), np.float32)
    wfcr[:, :, :10] = wfc.reshape(10, 64, 7, 7).transpose(2, 3, 1, 0).reshape(7, 448, 10)
    bfcp = np.full((1, 128), -1e30, np.float32)          # pad lanes masked out
    bfcp[0, :10] = bfc

    bf = lambda a: jnp.asarray(a, jnp.bfloat16)
    return (bf(w1m), bf(bd2), bf(bd3), bf(wfcr),
            jnp.asarray(b2l), jnp.asarray(b3l), jnp.asarray(bfcp))


# ---------------------------------------------------------------------------
# Wrapper: one fused input repack + the fused pallas_call.
# ---------------------------------------------------------------------------
def _choose_tile_b(n, requested=DEFAULT_TILE_B):
    """Multiple of 8; keep >=2 grid steps when the batch allows (v7x megacore)."""
    half = (n // 2) // 8 * 8
    return max(8, min(requested, half)) if half >= 8 else 8


def _prep_input(x, tb):
    """(N, 1, 28, 28) -> bf16 (nt*28*tb, 96) conv1-band LHS.

    Row order within a tile: (pos, image), pos = (p1*2+p2)*7+j (see _H_ORDER).
    Lanes: di*30 + col = padded pixel (h+di, col); lane 90 = 1.0 (bias fold);
    lanes 91..95 = 0 (pad K to 96)."""
    n = x.shape[0]
    n_pad = -(-n // tb) * tb
    xs = x[:, 0, :, :].astype(jnp.float32)
    if n_pad != n:
        xs = jnp.pad(xs, ((0, n_pad - n), (0, 0), (0, 0)))
    xp = jnp.pad(xs, ((0, 0), (1, 1), (1, 1)))                    # (n_pad, 30, 30)
    xw = xp[:, _HIDX, :].reshape(n_pad, 28, 90)                   # band gather
    lhs = jnp.concatenate(
        [xw,
         jnp.ones((n_pad, 28, 1), xw.dtype),                      # ones -> b1 fold
         jnp.zeros((n_pad, 28, 5), xw.dtype)], axis=-1)           # K pad to 96
    nt = n_pad // tb
    lhs = lhs.reshape(nt, tb, 28, 96).transpose(0, 2, 1, 3)       # (tile,pos,b,96)
    return lhs.reshape(nt * 28 * tb, 96).astype(jnp.bfloat16), n_pad


def net1_forward(x, kparams, tile_b=None):
    w1m, bd2, bd3, wfcr, b2l, b3l, bfcp = kparams
    n = x.shape[0]
    if tile_b is None:
        tile_b = _choose_tile_b(n)
    assert tile_b % 8 == 0
    x2d, n_pad = _prep_input(x, tile_b)
    nt = n_pad // tile_b

    out = pl.pallas_call(
        functools.partial(_net1_kernel, tb=tile_b),
        grid=(nt,),
        in_specs=[
            pl.BlockSpec((28 * tile_b, 96), lambda i: (i, 0)),    # input bands
            pl.BlockSpec((96, 512), lambda i: (0, 0)),            # conv1 (+b1)
            pl.BlockSpec((256, 512), lambda i: (0, 0)),           # conv2 block
            pl.BlockSpec((256, 448), lambda i: (0, 0)),           # conv3 block
            pl.BlockSpec((7, 448, 128), lambda i: (0, 0, 0)),     # fc (lane-dense)
            pl.BlockSpec((1, 512), lambda i: (0, 0)),             # b2
            pl.BlockSpec((1, 448), lambda i: (0, 0)),             # b3
            pl.BlockSpec((1, 128), lambda i: (0, 0)),             # bfc (-1e30 pad)
        ],
        out_specs=pl.BlockSpec((tile_b, 128), lambda i: (i, 0)),
        out_shape=jax.ShapeDtypeStruct((n_pad, 128), jnp.float32),
        compiler_params=pltpu.CompilerParams(
            dimension_semantics=("parallel",),
            vmem_limit_bytes=48 * 1024 * 1024),
    )(x2d, w1m, bd2, bd3, wfcr, b2l, b3l, bfcp)
    return out[:n, :10]


# ---------------------------------------------------------------------------
# Pure-JAX (f32) reference of the PyTorch module, for validation.
# ---------------------------------------------------------------------------
def net1_reference(x, torch_params):
    w1, b1, w2, b2, w3, b3, wfc, bfc = torch_params
    dn = ("NCHW", "OIHW", "NCHW")
    h = jax.lax.conv_general_dilated(x, w1, (1, 1), ((1, 1), (1, 1)),
                                     dimension_numbers=dn) + b1[None, :, None, None]
    h = jax.lax.reduce_window(h, -jnp.inf, jax.lax.max, (1, 1, 2, 2), (1, 1, 2, 2), "VALID")
    h = jnp.maximum(h, 0.0)
    h = jax.lax.conv_general_dilated(h, w2, (1, 1), "VALID",
                                     dimension_numbers=dn) + b2[None, :, None, None]
    h = jax.lax.reduce_window(h, -jnp.inf, jax.lax.max, (1, 1, 2, 2), (1, 1, 2, 2), "VALID")
    h = jnp.maximum(h, 0.0)
    h = jax.lax.conv_general_dilated(h, w3, (1, 1), "VALID",
                                     dimension_numbers=dn) + b3[None, :, None, None]
    h = jnp.maximum(h, 0.0)
    logits = h.reshape(x.shape[0], -1) @ wfc.T + bfc
    return jax.nn.softmax(logits, axis=-1)


if __name__ == "__main__":
    key = jax.random.PRNGKey(0)
    kx, kp = jax.random.split(key)
    # MNIST-shaped input (the 64*7*7 flatten requires 1x28x28).
    x = jax.random.normal(kx, (16, 1, 28, 28), jnp.float32)

    torch_params = init_torch_params(kp)
    kparams = prepare_kernel_params(torch_params)

    fwd = jax.jit(net1_forward)
    out = jax.block_until_ready(fwd(x, kparams))

    assert out.shape == (16, 10), out.shape
    assert bool(jnp.all(jnp.isfinite(out)))
    # exact softmax division -> rows sum to 1
    assert bool(jnp.allclose(jnp.sum(out, axis=-1), 1.0, atol=1e-3))
    # bf16-matmul kernel vs f32 reference (loose tolerance for bf16 operands)
    ref = net1_reference(x, torch_params)
    assert bool(jnp.max(jnp.abs(out - ref)) < 5e-2)
    print("KERNEL_OK")
</pallas_src>

<mosaic_0001>
module attributes {stable_mosaic.version = 11 : i64} {
  func.func @_net1_kernel(%arg0: i32, %arg1: memref<224x96xbf16, #tpu.memory_space<vmem>>, %arg2: memref<96x512xbf16, #tpu.memory_space<vmem>>, %arg3: memref<256x512xbf16, #tpu.memory_space<vmem>>, %arg4: memref<256x448xbf16, #tpu.memory_space<vmem>>, %arg5: memref<7x448x128xbf16, #tpu.memory_space<vmem>>, %arg6: memref<1x512xf32, #tpu.memory_space<vmem>>, %arg7: memref<1x448xf32, #tpu.memory_space<vmem>>, %arg8: memref<1x128xf32, #tpu.memory_space<vmem>>, %arg9: memref<8x128xf32, #tpu.memory_space<vmem>>) attributes {dimension_semantics = [#tpu.dimension_semantics<parallel>], iteration_bounds = array<i64: 2>, scalar_prefetch = 0 : i64, scratch_operands = 0 : i64, tpu.core_type = #tpu.core_type<tc>, window_params = [{transform_indices = @transform_0, window_bounds = array<i64: 224, 96>}, {pipeline_mode = #tpu.pipeline_mode<synchronous>, transform_indices = @transform_1, window_bounds = array<i64: 96, 512>}, {pipeline_mode = #tpu.pipeline_mode<synchronous>, transform_indices = @transform_2, window_bounds = array<i64: 256, 512>}, {pipeline_mode = #tpu.pipeline_mode<synchronous>, transform_indices = @transform_3, window_bounds = array<i64: 256, 448>}, {pipeline_mode = #tpu.pipeline_mode<synchronous>, transform_indices = @transform_4, window_bounds = array<i64: 7, 448, 128>}, {pipeline_mode = #tpu.pipeline_mode<synchronous>, transform_indices = @transform_5, window_bounds = array<i64: 1, 512>}, {pipeline_mode = #tpu.pipeline_mode<synchronous>, transform_indices = @transform_6, window_bounds = array<i64: 1, 448>}, {pipeline_mode = #tpu.pipeline_mode<synchronous>, transform_indices = @transform_7, window_bounds = array<i64: 1, 128>}, {transform_indices = @transform_8, window_bounds = array<i64: 8, 128>}]} {
    %c0 = arith.constant 0 : index
    %c0_0 = arith.constant 0 : index
    %0 = vector.load %arg1[%c0, %c0_0] : memref<224x96xbf16, #tpu.memory_space<vmem>>, vector<224x96xbf16>
    %c0_1 = arith.constant 0 : index
    %c0_2 = arith.constant 0 : index
    %1 = vector.load %arg2[%c0_1, %c0_2] : memref<96x512xbf16, #tpu.memory_space<vmem>>, vector<96x512xbf16>
    %cst = arith.constant dense<0.000000e+00> : vector<224x512xf32>
    %2 = tpu.matmul %0, %1, %cst {dimension_numbers = #tpu.dot_dimension_numbers<[1], [0], [0], [1], [0, 0, 1, 1], [], []>} : vector<224x96xbf16>, vector<96x512xbf16>, vector<224x512xf32> -> vector<224x512xf32>
    %3 = vector.extract_strided_slice %2 {offsets = [0, 0], sizes = [112, 512], strides = [1, 1]} : vector<224x512xf32> to vector<112x512xf32>
    %4 = vector.extract_strided_slice %2 {offsets = [112, 0], sizes = [112, 512], strides = [1, 1]} : vector<224x512xf32> to vector<112x512xf32>
    %5 = arith.maximumf %3, %4 : vector<112x512xf32>
    %6 = vector.extract_strided_slice %5 {offsets = [0, 0], sizes = [112, 256], strides = [1, 1]} : vector<112x512xf32> to vector<112x256xf32>
    %7 = vector.extract_strided_slice %5 {offsets = [0, 256], sizes = [112, 256], strides = [1, 1]} : vector<112x512xf32> to vector<112x256xf32>
    %8 = arith.maximumf %6, %7 : vector<112x256xf32>
    %cst_3 = arith.constant 0.000000e+00 : f32
    %9 = vector.broadcast %cst_3 : f32 to vector<112x256xf32>
    %10 = arith.maximumf %8, %9 : vector<112x256xf32>
    %11 = arith.truncf %10 : vector<112x256xf32> to vector<112x256xbf16>
    %c0_4 = arith.constant 0 : index
    %c0_5 = arith.constant 0 : index
    %12 = vector.load %arg3[%c0_4, %c0_5] : memref<256x512xbf16, #tpu.memory_space<vmem>>, vector<256x512xbf16>
    %cst_6 = arith.constant dense<0.000000e+00> : vector<112x512xf32>
    %13 = tpu.matmul %11, %12, %cst_6 {dimension_numbers = #tpu.dot_dimension_numbers<[1], [0], [0], [1], [0, 0, 1, 1], [], []>} : vector<112x256xbf16>, vector<256x512xbf16>, vector<112x512xf32> -> vector<112x512xf32>
    %c0_7 = arith.constant 0 : index
    %c0_8 = arith.constant 0 : index
    %14 = vector.load %arg6[%c0_7, %c0_8] : memref<1x512xf32, #tpu.memory_space<vmem>>, vector<1x512xf32>
    %15 = vector.broadcast %14 : vector<1x512xf32> to vector<112x512xf32>
    %16 = arith.addf %13, %15 : vector<112x512xf32>
    %17 = vector.extract_strided_slice %16 {offsets = [0, 0], sizes = [56, 512], strides = [1, 1]} : vector<112x512xf32> to vector<56x512xf32>
    %18 = vector.extract_strided_slice %16 {offsets = [56, 0], sizes = [56, 512], strides = [1, 1]} : vector<112x512xf32> to vector<56x512xf32>
    %19 = arith.maximumf %17, %18 : vector<56x512xf32>
    %20 = vector.extract_strided_slice %19 {offsets = [0, 0], sizes = [56, 256], strides = [1, 1]} : vector<56x512xf32> to vector<56x256xf32>
    %21 = vector.extract_strided_slice %19 {offsets = [0, 256], sizes = [56, 256], strides = [1, 1]} : vector<56x512xf32> to vector<56x256xf32>
    %22 = arith.maximumf %20, %21 : vector<56x256xf32>
    %cst_9 = arith.constant 0.000000e+00 : f32
    %23 = vector.broadcast %cst_9 : f32 to vector<56x256xf32>
    %24 = arith.maximumf %22, %23 : vector<56x256xf32>
    %25 = arith.truncf %24 : vector<56x256xf32> to vector<56x256xbf16>
    %c0_10 = arith.constant 0 : index
    %c0_11 = arith.constant 0 : index
    %26 = vector.load %arg4[%c0_10, %c0_11] : memref<256x448xbf16, #tpu.memory_space<vmem>>, vector<256x448xbf16>
    %cst_12 = arith.constant dense<0.000000e+00> : vector<56x448xf32>
    %27 = tpu.matmul %25, %26, %cst_12 {dimension_numbers = #tpu.dot_dimension_numbers<[1], [0], [0], [1], [0, 0, 1, 1], [], []>} : vector<56x256xbf16>, vector<256x448xbf16>, vector<56x448xf32> -> vector<56x448xf32>
    %c0_13 = arith.constant 0 : index
    %c0_14 = arith.constant 0 : index
    %28 = vector.load %arg7[%c0_13, %c0_14] : memref<1x448xf32, #tpu.memory_space<vmem>>, vector<1x448xf32>
    %29 = vector.broadcast %28 : vector<1x448xf32> to vector<56x448xf32>
    %30 = arith.addf %27, %29 : vector<56x448xf32>
    %cst_15 = arith.constant 0.000000e+00 : f32
    %31 = vector.broadcast %cst_15 : f32 to vector<56x448xf32>
    %32 = arith.maximumf %30, %31 : vector<56x448xf32>
    %cst_16 = arith.constant 0.000000e+00 : f32
    %33 = vector.broadcast %cst_16 : f32 to vector<8x128xf32>
    %c0_17 = arith.constant 0 : index
    %c0_18 = arith.constant 0 : index
    %34 = vector.load %arg8[%c0_17, %c0_18] : memref<1x128xf32, #tpu.memory_space<vmem>>, vector<1x128xf32>
    %35 = vector.broadcast %34 : vector<1x128xf32> to vector<8x128xf32>
    %36 = arith.addf %33, %35 : vector<8x128xf32>
    %37 = vector.extract_strided_slice %32 {offsets = [0, 0], sizes = [8, 448], strides = [1, 1]} : vector<56x448xf32> to vector<8x448xf32>
    %38 = arith.truncf %37 : vector<8x448xf32> to vector<8x448xbf16>
    %c0_19 = arith.constant 0 : index
    %c0_20 = arith.constant 0 : index
    %c0_21 = arith.constant 0 : index
    %39 = vector.load %arg5[%c0_19, %c0_20, %c0_21] : memref<7x448x128xbf16, #tpu.memory_space<vmem>>, vector<1x448x128xbf16>
    %40 = vector.shape_cast %39 : vector<1x448x128xbf16> to vector<448x128xbf16>
    %cst_22 = arith.constant dense<0.000000e+00> : vector<8x128xf32>
    %41 = tpu.matmul %38, %40, %cst_22 {dimension_numbers = #tpu.dot_dimension_numbers<[1], [0], [0], [1], [0, 0, 1, 1], [], []>} : vector<8x448xbf16>, vector<448x128xbf16>, vector<8x128xf32> -> vector<8x128xf32>
    %42 = arith.addf %36, %41 : vector<8x128xf32>
    %43 = vector.extract_strided_slice %32 {offsets = [8, 0], sizes = [8, 448], strides = [1, 1]} : vector<56x448xf32> to vector<8x448xf32>
    %44 = arith.truncf %43 : vector<8x448xf32> to vector<8x448xbf16>
    %c1 = arith.constant 1 : index
    %c0_23 = arith.constant 0 : index
    %c0_24 = arith.constant 0 : index
    %45 = vector.load %arg5[%c1, %c0_23, %c0_24] : memref<7x448x128xbf16, #tpu.memory_space<vmem>>, vector<1x448x128xbf16>
    %46 = vector.shape_cast %45 : vector<1x448x128xbf16> to vector<448x128xbf16>
    %cst_25 = arith.constant dense<0.000000e+00> : vector<8x128xf32>
    %47 = tpu.matmul %44, %46, %cst_25 {dimension_numbers = #tpu.dot_dimension_numbers<[1], [0], [0], [1], [0, 0, 1, 1], [], []>} : vector<8x448xbf16>, vector<448x128xbf16>, vector<8x128xf32> -> vector<8x128xf32>
    %48 = arith.addf %42, %47 : vector<8x128xf32>
    %49 = vector.extract_strided_slice %32 {offsets = [16, 0], sizes = [8, 448], strides = [1, 1]} : vector<56x448xf32> to vector<8x448xf32>
    %50 = arith.truncf %49 : vector<8x448xf32> to vector<8x448xbf16>
    %c2 = arith.constant 2 : index
    %c0_26 = arith.constant 0 : index
    %c0_27 = arith.constant 0 : index
    %51 = vector.load %arg5[%c2, %c0_26, %c0_27] : memref<7x448x128xbf16, #tpu.memory_space<vmem>>, vector<1x448x128xbf16>
    %52 = vector.shape_cast %51 : vector<1x448x128xbf16> to vector<448x128xbf16>
    %cst_28 = arith.constant dense<0.000000e+00> : vector<8x128xf32>
    %53 = tpu.matmul %50, %52, %cst_28 {dimension_numbers = #tpu.dot_dimension_numbers<[1], [0], [0], [1], [0, 0, 1, 1], [], []>} : vector<8x448xbf16>, vector<448x128xbf16>, vector<8x128xf32> -> vector<8x128xf32>
    %54 = arith.addf %48, %53 : vector<8x128xf32>
    %55 = vector.extract_strided_slice %32 {offsets = [24, 0], sizes = [8, 448], strides = [1, 1]} : vector<56x448xf32> to vector<8x448xf32>
    %56 = arith.truncf %55 : vector<8x448xf32> to vector<8x448xbf16>
    %c3 = arith.constant 3 : index
    %c0_29 = arith.constant 0 : index
    %c0_30 = arith.constant 0 : index
    %57 = vector.load %arg5[%c3, %c0_29, %c0_30] : memref<7x448x128xbf16, #tpu.memory_space<vmem>>, vector<1x448x128xbf16>
    %58 = vector.shape_cast %57 : vector<1x448x128xbf16> to vector<448x128xbf16>
    %cst_31 = arith.constant dense<0.000000e+00> : vector<8x128xf32>
    %59 = tpu.matmul %56, %58, %cst_31 {dimension_numbers = #tpu.dot_dimension_numbers<[1], [0], [0], [1], [0, 0, 1, 1], [], []>} : vector<8x448xbf16>, vector<448x128xbf16>, vector<8x128xf32> -> vector<8x128xf32>
    %60 = arith.addf %54, %59 : vector<8x128xf32>
    %61 = vector.extract_strided_slice %32 {offsets = [32, 0], sizes = [8, 448], strides = [1, 1]} : vector<56x448xf32> to vector<8x448xf32>
    %62 = arith.truncf %61 : vector<8x448xf32> to vector<8x448xbf16>
    %c4 = arith.constant 4 : index
    %c0_32 = arith.constant 0 : index
    %c0_33 = arith.constant 0 : index
    %63 = vector.load %arg5[%c4, %c0_32, %c0_33] : memref<7x448x128xbf16, #tpu.memory_space<vmem>>, vector<1x448x128xbf16>
    %64 = vector.shape_cast %63 : vector<1x448x128xbf16> to vector<448x128xbf16>
    %cst_34 = arith.constant dense<0.000000e+00> : vector<8x128xf32>
    %65 = tpu.matmul %62, %64, %cst_34 {dimension_numbers = #tpu.dot_dimension_numbers<[1], [0], [0], [1], [0, 0, 1, 1], [], []>} : vector<8x448xbf16>, vector<448x128xbf16>, vector<8x128xf32> -> vector<8x128xf32>
    %66 = arith.addf %60, %65 : vector<8x128xf32>
    %67 = vector.extract_strided_slice %32 {offsets = [40, 0], sizes = [8, 448], strides = [1, 1]} : vector<56x448xf32> to vector<8x448xf32>
    %68 = arith.truncf %67 : vector<8x448xf32> to vector<8x448xbf16>
    %c5 = arith.constant 5 : index
    %c0_35 = arith.constant 0 : index
    %c0_36 = arith.constant 0 : index
    %69 = vector.load %arg5[%c5, %c0_35, %c0_36] : memref<7x448x128xbf16, #tpu.memory_space<vmem>>, vector<1x448x128xbf16>
    %70 = vector.shape_cast %69 : vector<1x448x128xbf16> to vector<448x128xbf16>
    %cst_37 = arith.constant dense<0.000000e+00> : vector<8x128xf32>
    %71 = tpu.matmul %68, %70, %cst_37 {dimension_numbers = #tpu.dot_dimension_numbers<[1], [0], [0], [1], [0, 0, 1, 1], [], []>} : vector<8x448xbf16>, vector<448x128xbf16>, vector<8x128xf32> -> vector<8x128xf32>
    %72 = arith.addf %66, %71 : vector<8x128xf32>
    %73 = vector.extract_strided_slice %32 {offsets = [48, 0], sizes = [8, 448], strides = [1, 1]} : vector<56x448xf32> to vector<8x448xf32>
    %74 = arith.truncf %73 : vector<8x448xf32> to vector<8x448xbf16>
    %c6 = arith.constant 6 : index
    %c0_38 = arith.constant 0 : index
    %c0_39 = arith.constant 0 : index
    %75 = vector.load %arg5[%c6, %c0_38, %c0_39] : memref<7x448x128xbf16, #tpu.memory_space<vmem>>, vector<1x448x128xbf16>
    %76 = vector.shape_cast %75 : vector<1x448x128xbf16> to vector<448x128xbf16>
    %cst_40 = arith.constant dense<0.000000e+00> : vector<8x128xf32>
    %77 = tpu.matmul %74, %76, %cst_40 {dimension_numbers = #tpu.dot_dimension_numbers<[1], [0], [0], [1], [0, 0, 1, 1], [], []>} : vector<8x448xbf16>, vector<448x128xbf16>, vector<8x128xf32> -> vector<8x128xf32>
    %78 = arith.addf %72, %77 : vector<8x128xf32>
    %cst_41 = arith.constant dense<0xFF800000> : vector<8xf32>
    %79 = vector.multi_reduction <maximumf>, %78, %cst_41 [1] : vector<8x128xf32> to vector<8xf32>
    %80 = vector.shape_cast %79 : vector<8xf32> to vector<8x1xf32>
    %81 = vector.broadcast %80 : vector<8x1xf32> to vector<8x128xf32>
    %82 = arith.subf %78, %81 : vector<8x128xf32>
    %83 = math.exp %82 : vector<8x128xf32>
    %cst_42 = arith.constant dense<0.000000e+00> : vector<8xf32>
    %84 = vector.multi_reduction <add>, %83, %cst_42 [1] : vector<8x128xf32> to vector<8xf32>
    %85 = vector.shape_cast %84 : vector<8xf32> to vector<8x1xf32>
    %86 = vector.broadcast %85 : vector<8x1xf32> to vector<8x128xf32>
    %87 = arith.divf %83, %86 : vector<8x128xf32>
    %c0_43 = arith.constant 0 : index
    %c0_44 = arith.constant 0 : index
    %88 = vector.load %arg9[%c0_43, %c0_44] : memref<8x128xf32, #tpu.memory_space<vmem>>, vector<8x128xf32>
    tpu.vector_store %arg9[%c0_43, %c0_44], %87 {strides = array<i32>} : memref<8x128xf32, #tpu.memory_space<vmem>>, vector<8x128xf32>,
    return
  }
  func.func @transform_0(%arg0: i32) -> (i32, i32) {
    %c0_i32 = arith.constant 0 : i32
    %c0_i32_0 = arith.constant 0 : i32
    return %arg0, %c0_i32 : i32, i32
  }
  func.func @transform_1(%arg0: i32) -> (i32, i32) {
    %c0_i32 = arith.constant 0 : i32
    %c0_i32_0 = arith.constant 0 : i32
    %c0_i32_1 = arith.constant 0 : i32
    return %c0_i32, %c0_i32_0 : i32, i32
  }
  func.func @transform_2(%arg0: i32) -> (i32, i32) {
    %c0_i32 = arith.constant 0 : i32
    %c0_i32_0 = arith.constant 0 : i32
    %c0_i32_1 = arith.constant 0 : i32
    return %c0_i32, %c0_i32_0 : i32, i32
  }
  func.func @transform_3(%arg0: i32) -> (i32, i32) {
    %c0_i32 = arith.constant 0 : i32
    %c0_i32_0 = arith.constant 0 : i32
    %c0_i32_1 = arith.constant 0 : i32
    return %c0_i32, %c0_i32_0 : i32, i32
  }
  func.func @transform_4(%arg0: i32) -> (i32, i32, i32) {
    %c0_i32 = arith.constant 0 : i32
    %c0_i32_0 = arith.constant 0 : i32
    %c0_i32_1 = arith.constant 0 : i32
    %c0_i32_2 = arith.constant 0 : i32
    return %c0_i32, %c0_i32_0, %c0_i32_1 : i32, i32, i32
  }
  func.func @transform_5(%arg0: i32) -> (i32, i32) {
    %c0_i32 = arith.constant 0 : i32
    %c0_i32_0 = arith.constant 0 : i32
    %c0_i32_1 = arith.constant 0 : i32
    return %c0_i32, %c0_i32_0 : i32, i32
  }
  func.func @transform_6(%arg0: i32) -> (i32, i32) {
    %c0_i32 = arith.constant 0 : i32
    %c0_i32_0 = arith.constant 0 : i32
    %c0_i32_1 = arith.constant 0 : i32
    return %c0_i32, %c0_i32_0 : i32, i32
  }
  func.func @transform_7(%arg0: i32) -> (i32, i32) {
    %c0_i32 = arith.constant 0 : i32
    %c0_i32_0 = arith.constant 0 : i32
    %c0_i32_1 = arith.constant 0 : i32
    return %c0_i32, %c0_i32_0 : i32, i32
  }
  func.func @transform_8(%arg0: i32) -> (i32, i32) {
    %c0_i32 = arith.constant 0 : i32
    %c0_i32_0 = arith.constant 0 : i32
    return %arg0, %c0_i32 : i32, i32
  }
}

</mosaic_0001>

<bundles_post_ra>
// kernel: net1_forward.1
= control target key start
LH: loop header
LB: loop body
LE: loop exit
PB: predicated region body
PF: predicated region fallthrough
CT: control target
= control target key end

     0   :  { %13 = vsyncpa [#allocation3], 0  ;;  %s9322_s0 = inlined_call_operand.vmem [shape: bf16[448,96], index: 0, kind: input, shape index: {}]   ;;  %s9323_s1 = inlined_call_operand.vmem [shape: bf16[96,512], index: 1, kind: input, shape index: {}]   ;;  %s9324_s2 = inlined_call_operand.vmem [shape: bf16[256,512], index: 2, kind: input, shape index: {}]   ;;  %s9325_s3 = inlined_call_operand.vmem [shape: bf16[256,448], index: 3, kind: input, shape index: {}]   ;;  %s9326_s4 = inlined_call_operand.vmem [shape: bf16[7,448,128], index: 4, kind: input, shape index: {}]   ;;  %s9327_s5 = inlined_call_operand.vmem [shape: f32[1,512], index: 5, kind: input, shape index: {}]   ;;  %s9328_s6 = inlined_call_operand.vmem [shape: f32[1,448], index: 6, kind: input, shape index: {}]   ;;  %s9329_s7 = inlined_call_operand.vmem [shape: f32[1,128], index: 7, kind: input, shape index: {}]   ;;  %s9330_s8 = inlined_call_operand.hbm [shape: f32[16,128], index: 8, kind: output, shape index: {}]  }
   0x1   :  { %15 = vsyncpa [#allocation3 + $0x1], 0  ;;  %s6960_s27 = smov 0   ;;  %s6962_s28 = smov 0  }
   0x2   :  { %s6964_s29 = smov 0   ;;  %s6966_s30 = smov 0  }
   0x3 LB: > { %s6981_s9 = sadd.s32 4294967295, %s6913_s30   ;;  %s4588_s10 = sadd.s32 4294967294, %s6913_s30   ;;  %s6913_s30 = sphi %s6966_s30, %s9386_s30   ;;  %s6909_s29 = sphi %s6964_s29, %s9385_s29   ;;  %s6905_s28 = sphi %s6962_s28, %s9384_s28   ;;  %s6901_s27 = sphi %s6960_s27, %s9383_s27  }
   0x4   : > { %s6985_s11 = sadd.s32 1, %s6913_s30   ;;  %s201_s12 = sadd.s32 1, %s6909_s29 }
   0x5   : > { %s198_s13 = ssub.s32 %s6913_s30, %s6985_s11  ;;  %p211_p0 = scmp.ne.s32.totalorder %s6909_s29, %s6905_s28 }
   0x6   : > { %p199_p1 = scmp.eq.s32.totalorder %s198_s13, 0  ;;  %p212_p2 = scmp.eq.s32.totalorder %s6981_s9, 1 }
   0x7   : > { %p217_p3 = scmp.ne.s32.totalorder %s6905_s28, %s6901_s27  ;;  %p218_p4 = scmp.eq.s32.totalorder %s4588_s10, 1 }
   0x8   : > { %s6996_s14 = scalar_select %p199_p1, %s6909_s29, %s201_s12  }
   0x9   : > { %p6998_p5 = por %p212_p2, %p211_p0  ;;  %p7002_p6 = por %p218_p4, %p217_p3 }
   0xa   : > { %p4591_p7 = scmp.ge.s32.totalorder %s6913_s30, 1  ;;  %p266_p8 = scmp.lt.s32.totalorder %s6913_s30, 3 }
   0xc   : > { %p267_p9 = pnand %p4591_p7, %p266_p8 }
   0xe   : > { %270 = sbr.rel (%p267_p9) target bundleno = 1377 (0x561), region = 52 }
  0x13   : > { %v4732_v0 = vld [vmem:[%s9323_s1 + $0xa0] sm:$0xf]  ;;  %v6481_v1 = vld [vmem:[%s9323_s1 + $0xac] sm:$0xf0]  ;;  %v6479_v2 = vld [vmem:[%s9323_s1 + $0xa4] sm:$0xf] }
  0x14   : > { %v4733_v3 = vor.u32 %v6481_v1, %v4732_v0  ;;  %v4734_v4 = vld [vmem:[%s9323_s1 + $0xb0] sm:$0xf0]  ;;  %v4740_v5 = vld [vmem:[%s9323_s1 + $0xa8] sm:$0xf]  ;;  %v6482_v6 = vld [vmem:[%s9323_s1 + $0xb4] sm:$0xf0] }
  0x15   : > { %v4737_v7 = vor.u32 %v6479_v2, %v4734_v4  ;;  %v4741_v8 = vor.u32 %v6482_v6, %v4740_v5  ;;  %v6480_v9 = vld [vmem:[%s9323_s1 + $0xac] sm:$0xf]  ;;  %v4742_v10 = vld [vmem:[%s9323_s1 + $0xb8] sm:$0xf0]  ;;  %v4716_v11 = vld [vmem:[%s9323_s1 + $0x80] sm:$0xf] }
  0x16   : > { %594 = vmatpush.bf16.msra.mxu0 %v4733_v3  ;;  %v4745_v12 = vor.u32 %v6480_v9, %v4742_v10  ;;  %v6477_v13 = vld [vmem:[%s9323_s1 + $0x8c] sm:$0xf0]  ;;  %v6475_v14 = vld [vmem:[%s9323_s1 + $0x84] sm:$0xf]  ;;  %v4718_v15 = vld [vmem:[%s9323_s1 + $0x90] sm:$0xf0] }
  0x17   : > { %673 = vmatpush.bf16.msra.mxu1 %v4737_v7  ;;  %752 = vmatpush.bf16.msra.mxu2 %v4741_v8  ;;  %v4717_v16 = vor.u32 %v6477_v13, %v4716_v11  ;;  %v4721_v17 = vor.u32 %v6475_v14, %v4718_v15  ;;  %v4724_v18 = vld [vmem:[%s9323_s1 + $0x88] sm:$0xf]  ;;  %v6478_v19 = vld [vmem:[%s9323_s1 + $0x94] sm:$0xf0]  ;;  %v6476_v20 = vld [vmem:[%s9323_s1 + $0x8c] sm:$0xf] }
  0x18   : > { %831 = vmatpush.bf16.msra.mxu3 %v4745_v12  ;;  %v4725_v21 = vor.u32 %v6478_v19, %v4724_v18  ;;  %v4726_v22 = vld [vmem:[%s9323_s1 + $0x98] sm:$0xf0]  ;;  %v4700_v23 = vld [vmem:[%s9323_s1 + $0x60] sm:$0xf]  ;;  %v6473_v24 = vld [vmem:[%s9323_s1 + $0x6c] sm:$0xf0] }
  0x19   : > { %v4729_v25 = vor.u32 %v6476_v20, %v4726_v22  ;;  %v6471_v26 = vld [vmem:[%s9323_s1 + $0x64] sm:$0xf]  ;;  %v4702_v27 = vld [vmem:[%s9323_s1 + $0x70] sm:$0xf0]  ;;  %v4708_v28 = vld [vmem:[%s9323_s1 + $0x68] sm:$0xf]  ;;  %v4701_v29 = vor.u32 %v6473_v24, %v4700_v23 }
  0x1a   : > { %595 = vmatpush.bf16.msra.mxu0 %v4717_v16  ;;  %v6474_v30 = vld [vmem:[%s9323_s1 + $0x74] sm:$0xf0]  ;;  %v6472_v31 = vld [vmem:[%s9323_s1 + $0x6c] sm:$0xf]  ;;  %v4710_v32 = vld [vmem:[%s9323_s1 + $0x78] sm:$0xf0]  ;;  %v4705_v33 = vor.u32 %v6471_v26, %v4702_v27 }
  0x1b   : > { %674 = vmatpush.bf16.msra.mxu1 %v4721_v17  ;;  %753 = vmatpush.bf16.msra.mxu2 %v4725_v21  ;;  %v4709_v34 = vor.u32 %v6474_v30, %v4708_v28  ;;  %v4684_v35 = vld [vmem:[%s9323_s1 + $0x40] sm:$0xf]  ;;  %v6469_v36 = vld [vmem:[%s9323_s1 + $0x4c] sm:$0xf0]  ;;  %v6467_v37 = vld [vmem:[%s9323_s1 + $0x44] sm:$0xf]  ;;  %v4713_v38 = vor.u32 %v6472_v31, %v4710_v32 }
  0x1c   : > { %832 = vmatpush.bf16.msra.mxu3 %v4729_v25  ;;  %v4686_v39 = vld [vmem:[%s9323_s1 + $0x50] sm:$0xf0]  ;;  %v4692_v40 = vld [vmem:[%s9323_s1 + $0x48] sm:$0xf]  ;;  %v6470_v41 = vld [vmem:[%s9323_s1 + $0x54] sm:$0xf0]  ;;  %v4685_v44 = vor.u32 %v6469_v36, %v4684_v35 }
  0x1d   : > { %v6468_v42 = vld [vmem:[%s9323_s1 + $0x4c] sm:$0xf]  ;;  %v4694_v43 = vld [vmem:[%s9323_s1 + $0x58] sm:$0xf0]  ;;  %v4689_v45 = vor.u32 %v6467_v37, %v4686_v39  ;;  %v4693_v46 = vor.u32 %v6470_v41, %v4692_v40  ;;  %v4668_v47 = vld [vmem:[%s9323_s1 + $0x20] sm:$0xf] }
  0x1e   : > { %596 = vmatpush.bf16.msra.mxu0 %v4701_v29  ;;  %v6465_v48 = vld [vmem:[%s9323_s1 + $0x2c] sm:$0xf0]  ;;  %v6463_v49 = vld [vmem:[%s9323_s1 + $0x24] sm:$0xf]  ;;  %v4697_v50 = vor.u32 %v6468_v42, %v4694_v43  ;;  %v4670_v51 = vld [vmem:[%s9323_s1 + $0x30] sm:$0xf0] }
  0x1f   : > { %675 = vmatpush.bf16.msra.mxu1 %v4705_v33  ;;  %754 = vmatpush.bf16.msra.mxu2 %v4709_v34  ;;  %v4676_v52 = vld [vmem:[%s9323_s1 + $0x28] sm:$0xf]  ;;  %v6466_v53 = vld [vmem:[%s9323_s1 + $0x34] sm:$0xf0]  ;;  %v6464_v54 = vld [vmem:[%s9323_s1 + $0x2c] sm:$0xf]  ;;  %v4669_v56 = vor.u32 %v6465_v48, %v4668_v47  ;;  %v4673_v59 = vor.u32 %v6463_v49, %v4670_v51 }
  0x20   : > { %833 = vmatpush.bf16.msra.mxu3 %v4713_v38  ;;  %v4678_v55 = vld [vmem:[%s9323_s1 + $0x38] sm:$0xf0]  ;;  %v4652_v57 = vld [vmem:[%s9323_s1] sm:$0xf]  ;;  %v6461_v58 = vld [vmem:[%s9323_s1 + $0xc] sm:$0xf0]  ;;  %v4677_v60 = vor.u32 %v6466_v53, %v4676_v52 }
  0x21   : > { %v6459_v61 = vld [vmem:[%s9323_s1 + $0x4] sm:$0xf]  ;;  %s300_s25 = smul.u32 28, %s6981_s9  ;;  %v4681_v62 = vor.u32 %v6464_v54, %v4678_v55  ;;  %v4654_v63 = vld [vmem:[%s9323_s1 + $0x10] sm:$0xf0]  ;;  %v4653_v4 = vor.u32 %v6461_v58, %v4652_v57  ;;  %vm549_vm0 = vcmask 785408  }
  0x22   : > { %597 = vmatpush.bf16.msra.mxu0 %v4685_v44  ;;  %v4660_v0 = vld [vmem:[%s9323_s1 + $0x8] sm:$0xf]  ;;  %v6462_v1 = vld [vmem:[%s9323_s1 + $0x14] sm:$0xf0]  ;;  %v6460_v2 = vld [vmem:[%s9323_s1 + $0xc] sm:$0xf]  ;;  %v4657_v5 = vor.u32 %v6459_v61, %v4654_v63 }
  0x23   : > { %676 = vmatpush.bf16.msra.mxu1 %v4689_v45  ;;  %755 = vmatpush.bf16.msra.mxu2 %v4693_v46  ;;  %v4662_v3 = vld [vmem:[%s9323_s1 + $0x18] sm:$0xf0]  ;;  %p301_p10 = scmp.lt.s32.totalorder %s300_s25, 55  ;;  %v4661_v6 = vor.u32 %v6462_v1, %v4660_v0  ;;  %v6511_v11 = vld [vmem:[%s9324_s2 + $0xe4] sm:$0xf]  ;;  %vm2723_vm1 = vcmask 523264  }
  0x24   : > { %834 = vmatpush.bf16.msra.mxu3 %v4697_v50  ;;  %v4665_v7 = vor.u32 %v6460_v2, %v4662_v3  ;;  %v4918_v12 = vld [vmem:[%s9324_s2 + $0xf0] sm:$0xf0]  ;;  %v6543_v13 = vld [vmem:[%s9324_s2 + $0x1e4] sm:$0xf]  ;;  %v4916_v16 = vld [vmem:[%s9324_s2 + $0xe0] sm:$0xf] }
  0x25   : > { %s9388_s25 = smov (!%p301_p10, %s300_s25), 55  ;;  %v4921_v14 = vor.u32 %v6511_v11, %v4918_v12  ;;  %v5046_v15 = vld [vmem:[%s9324_s2 + $0x1f0] sm:$0xf0]  ;;  %v6513_v17 = vld [vmem:[%s9324_s2 + $0xec] sm:$0xf0]  ;;  %s297_s21 = sand.u32 1, %s6905_s28  }
  0x26   : > { %598 = vmatpush.bf16.msra.mxu0 %v4669_v56  ;;  %s4593_s23 = sshll.u32 %s9388_s25, 2  ;;  %v5049_v18 = vor.u32 %v6543_v13, %v5046_v15  ;;  %v4917_v19 = vor.u32 %v6513_v17, %v4916_v16  ;;  %v5044_v20 = vld [vmem:[%s9324_s2 + $0x1e0] sm:$0xf]  ;;  %v6545_v21 = vld [vmem:[%s9324_s2 + $0x1ec] sm:$0xf0]  ;;  %s4592_s22 = sshll.u32 %s297_s21, 3 }
  0x27   : > { %677 = vmatpush.bf16.msra.mxu1 %v4673_v59  ;;  %756 = vmatpush.bf16.msra.mxu2 %v4677_v60  ;;  %s7156_s10 = scalar_lea.vmem %s9322_s0, %s4593_s23  ;;  %v5045_v22 = vor.u32 %v6545_v21, %v5044_v20  ;;  %v6507_v25 = vld [vmem:[%s9324_s2 + $0xc4] sm:$0xf]  ;;  %v4902_v26 = vld [vmem:[%s9324_s2 + $0xd0] sm:$0xf0]  ;;  %v4900_v30 = vld [vmem:[%s9324_s2 + $0xc0] sm:$0xf] }
  0x28   : > { %835 = vmatpush.bf16.msra.mxu3 %v4681_v62  ;;  %v6445_v8 = vld [vmem:[%s7156_s10] sm:$0xff]  ;;  %v6446_v9 = vld [vmem:[%s7156_s10 + $0x8] sm:$0xff]  ;;  %v6447_v10 = vld [vmem:[%s7156_s10 + $0x10] sm:$0xff]  ;;  %v4905_v28 = vor.u32 %v6507_v25, %v4902_v26  ;;  %s6442_s23 = sshll.u32 %s6981_s9, 3  ;;  %s299_s12 = scalar_lea.vmem [#allocation2], %s4592_s22 }
  0x29   : > { %v6448_v23 = vld [vmem:[%s7156_s10 + $0x18] sm:$0xff]  ;;  %v6449_v24 = vld [vmem:[%s7156_s10 + $0x20] sm:$0xff]  ;;  %v5030_v29 = vld [vmem:[%s9324_s2 + $0x1d0] sm:$0xf0]  ;;  %s4524_s25 = scalar_lea.hbm %s9330_s8, %s6442_s23  ;;  %s4526_s13 = sshll.u32 %s299_s12, 4  ;;  %s4527_s13 = int_to_ptr.vmem [resolvable:$true] %s4526_s13 }
  0x2a   : > { %599 = vmatpush.bf16.msra.mxu0 %v4653_v4  ;;  %v6539_v27 = vld [vmem:[%s9324_s2 + $0x1c4] sm:$0xf]  ;;  %v6509_v31 = vld [vmem:[%s9324_s2 + $0xcc] sm:$0xf0]  ;;  %v5028_v34 = vld [vmem:[%s9324_s2 + $0x1c0] sm:$0xf] }
  0x2b   : > { %678 = vmatpush.bf16.msra.mxu1 %v4657_v5  ;;  %757 = vmatpush.bf16.msra.mxu2 %v4661_v6  ;;  %v5033_v32 = vor.u32 %v6539_v27, %v5030_v29  ;;  %v4901_v33 = vor.u32 %v6509_v31, %v4900_v30  ;;  %v6541_v35 = vld [vmem:[%s9324_s2 + $0x1cc] sm:$0xf0]  ;;  %v6450_v37 = vld [vmem:[%s7156_s10 + $0x28] sm:$0xff]  ;;  %v6503_v39 = vld [vmem:[%s9324_s2 + $0xa4] sm:$0xf]  ;;  %s4528_s17 = sshll.u32 %s4524_s25, 4  ;;  %s4529_s17 = int_to_ptr.hbm [resolvable:$true] %s4528_s17 }
  0x2c   : > { %836 = vmatpush.bf16.msra.mxu3 %v4665_v7  ;;  %v5029_v36 = vor.u32 %v6541_v35, %v5028_v34  ;;  %v6451_v38 = vld [vmem:[%s7156_s10 + $0x30] sm:$0xff]  ;;  %v6535_v42 = vld [vmem:[%s9324_s2 + $0x1a4] sm:$0xf]  ;;  %v4884_v45 = vld [vmem:[%s9324_s2 + $0xa0] sm:$0xf]  ;;  %s4514_s9 = scalar_lea.sflag [#allocation3], %s297_s21 }
  0x2d   : > { %4746 = vmatmul.msk.bf16.vlgmr.msra.gmra.mxu0 %vm549_vm0, %v6445_v8  ;;  %v4886_v40 = vld [vmem:[%s9324_s2 + $0xb0] sm:$0xf0]  ;;  %v6505_v46 = vld [vmem:[%s9324_s2 + $0xac] sm:$0xf0]  ;;  %v5012_v48 = vld [vmem:[%s9324_s2 + $0x1a0] sm:$0xf] }
  0x2e   : > { %4760 = vmatmul.msk.bf16.vlgmr.msra.gmra.mxu1 %vm549_vm0, %v6445_v8  ;;  %4774 = vmatmul.msk.bf16.vlgmr.msra.gmra.mxu2 %vm549_vm0, %v6445_v8  ;;  %v4889_v41 = vor.u32 %v6503_v39, %v4886_v40  ;;  %v5014_v43 = vld [vmem:[%s9324_s2 + $0x1b0] sm:$0xf0]  ;;  %v4885_v47 = vor.u32 %v6505_v46, %v4884_v45  ;;  %v6537_v49 = vld [vmem:[%s9324_s2 + $0x1ac] sm:$0xf0]  ;;  %v6452_v51 = vld [vmem:[%s7156_s10 + $0x38] sm:$0xff]  ;;  %s6865_s18 = sshra.s32 %s4529_s17, 4  ;;  %s6866_s18 = int_to_ptr.hbm [resolvable:$true] %s6865_s18 }
  0x2f   : > { %4788 = vmatmul.msk.bf16.vlgmr.msra.gmra.mxu3 %vm549_vm0, %v6445_v8  ;;  %1516 = vmatpush.bf16.msrb.mxu2 %v4921_v14  ;;  %v5017_v44 = vor.u32 %v6535_v42, %v5014_v43  ;;  %v5013_v50 = vor.u32 %v6537_v49, %v5012_v48  ;;  %v6453_v52 = vld [vmem:[%s7156_s10 + $0x40] sm:$0xff]  ;;  %v4870_v55 = vld [vmem:[%s9324_s2 + $0x90] sm:$0xf0]  ;;  %v6501_v62 = vld [vmem:[%s9324_s2 + $0x8c] sm:$0xf0]  ;;  %s6867_s19 = scalar_lea.hbm %s6866_s18, 8  ;;  %p6872_p0 = scmp.lt.s32.totalorder %s6866_s18, %s9330_s8 }
  0x30   : > { %1560 = vmatpush.bf16.msrb.mxu3 %v5049_v18  ;;  %1428 = vmatpush.bf16.msrb.mxu0 %v4917_v19  ;;  %v6499_v54 = vld [vmem:[%s9324_s2 + $0x84] sm:$0xf]  ;;  %v4998_v59 = vld [vmem:[%s9324_s2 + $0x190] sm:$0xf0]  ;;  %v4868_v60 = vld [vmem:[%s9324_s2 + $0x80] sm:$0xf]  ;;  %p6868_p11 = scmp.ne.s32.totalorder %s6866_s18, %s6867_s19 }
  0x31   : > { %1472 = vmatpush.bf16.msrb.mxu1 %v5045_v22  ;;  %v4873_v57 = vor.u32 %v6499_v54, %v4870_v55  ;;  %v6531_v58 = vld [vmem:[%s9324_s2 + $0x184] sm:$0xf]  ;;  %v4869_v63 = vor.u32 %v6501_v62, %v4868_v60  ;;  %v4996_v0 = vld [vmem:[%s9324_s2 + $0x180] sm:$0xf]  ;;  %v6533_v1 = vld [vmem:[%s9324_s2 + $0x18c] sm:$0xf0] }
  0x32   : > { %v5001_v61 = vor.u32 %v6531_v58, %v4998_v59  ;;  %v4997_v2 = vor.u32 %v6533_v1, %v4996_v0  ;;  %v6454_v8 = vld [vmem:[%s7156_s10 + $0x48] sm:$0xff]  ;;  %v6495_v16 = vld [vmem:[%s9324_s2 + $0x64] sm:$0xf]  ;;  %v4854_v17 = vld [vmem:[%s9324_s2 + $0x70] sm:$0xf0]  ;;  %p6869_p12 = pnand %p6868_p11, %p6998_p5  ;;  %s6871_s22 = scalar_lea.hbm %s9330_s8, 16 }
  0x33   : > { %1517 = vmatpush.bf16.msrb.mxu2 %v4905_v28  ;;  %v6527_v18 = vld [vmem:[%s9324_s2 + $0x164] sm:$0xf]  ;;  %v4857_v19 = vor.u32 %v6495_v16, %v4854_v17  ;;  %v4982_v20 = vld [vmem:[%s9324_s2 + $0x170] sm:$0xf0]  ;;  %v4852_v26 = vld [vmem:[%s9324_s2 + $0x60] sm:$0xf]  ;;  %p6873_p1 = scmp.lt.s32.totalorder %s6871_s22, %s6867_s19 }
  0x34   : > { %1561 = vmatpush.bf16.msrb.mxu3 %v5033_v32  ;;  %1429 = vmatpush.bf16.msrb.mxu0 %v4901_v33  ;;  %v4985_v21 = vor.u32 %v6527_v18, %v4982_v20  ;;  %v6497_v27 = vld [vmem:[%s9324_s2 + $0x6c] sm:$0xf0]  ;;  %v4980_v30 = vld [vmem:[%s9324_s2 + $0x160] sm:$0xf]  ;;  %v6491_v45 = vld [vmem:[%s9324_s2 + $0x44] sm:$0xf]  ;;  %p6870_p13 = pneg %p6869_p12 }
  0x35   : > { %1473 = vmatpush.bf16.msrb.mxu1 %v5029_v36  ;;  %v4853_v29 = vor.u32 %v6497_v27, %v4852_v26  ;;  %v6529_v31 = vld [vmem:[%s9324_s2 + $0x16c] sm:$0xf0]  ;;  %v4838_v46 = vld [vmem:[%s9324_s2 + $0x50] sm:$0xf0]  ;;  %v6523_v49 = vld [vmem:[%s9324_s2 + $0x144] sm:$0xf]  ;;  %p6874_p2 = por %p6873_p1, %p6872_p0 }
  0x36   : > { %v4981_v32 = vor.u32 %v6529_v31, %v4980_v30  ;;  %v4841_v48 = vor.u32 %v6491_v45, %v4838_v46  ;;  %v6493_v54 = vld [vmem:[%s9324_s2 + $0x4c] sm:$0xf0]  ;;  %v4964_v55 = vld [vmem:[%s9324_s2 + $0x140] sm:$0xf]  ;;  %v6458_v18 = vld [vmem:[%s7156_s10 + $0x68] sm:$0xff] }
  0x37   : > { %1518 = vmatpush.bf16.msrb.mxu2 %v4889_v41  ;;  %v4822_v26 = vld [vmem:[%s9324_s2 + $0x30] sm:$0xf0]  ;;  %v6519_v27 = vld [vmem:[%s9324_s2 + $0x124] sm:$0xf]  ;;  %p6875_p3 = pnand %p6874_p2, %p6870_p13 }
  0x38   : > { %1562 = vmatpush.bf16.msrb.mxu3 %v5017_v44  ;;  %1430 = vmatpush.bf16.msrb.mxu0 %v4885_v47  ;;  %v4950_v30 = vld [vmem:[%s9324_s2 + $0x130] sm:$0xf0] }
  0x39   : > { %1474 = vmatpush.bf16.msrb.mxu1 %v5013_v50  ;;  %v4966_v50 = vld [vmem:[%s9324_s2 + $0x150] sm:$0xf0]  ;;  %v4953_v31 = vor.u32 %v6519_v27, %v4950_v30  ;;  %v6517_v27 = vld [vmem:[%s9324_s2 + $0x10c] sm:$0xf0] }
  0x3a   : > { %v4806_v30 = vld [vmem:[%s9324_s2 + $0x10] sm:$0xf0] }
  0x3b   : > { %1519 = vmatpush.bf16.msrb.mxu2 %v4873_v57  ;;  %v6525_v57 = vld [vmem:[%s9324_s2 + $0x14c] sm:$0xf0] }
  0x3c   : > { %1431 = vmatpush.bf16.msrb.mxu0 %v4869_v63  ;;  %1563 = vmatpush.bf16.msrb.mxu3 %v5001_v61  ;;  %v4965_v59 = vor.u32 %v6525_v57, %v4964_v55  ;;  %v6457_v61 = vld [vmem:[%s7156_s10 + $0x60] sm:$0xff] }
  0x3d   : > { %4747 = vmatmul.msk.bf16.gmra.mxu0 %vm549_vm0, %v6446_v9  ;;  %1475 = vmatpush.bf16.msrb.mxu1 %v4997_v2 }
  0x3e   : > { %4761 = vmatmul.msk.bf16.gmra.mxu1 %vm549_vm0, %v6446_v9  ;;  %4775 = vmatmul.msk.bf16.gmra.mxu2 %vm549_vm0, %v6446_v9 }
  0x3f   : > { %4789 = vmatmul.msk.bf16.gmra.mxu3 %vm549_vm0, %v6446_v9  ;;  %1520 = vmatpush.bf16.msrb.mxu2 %v4857_v19 }
  0x40   : > { %1564 = vmatpush.bf16.msrb.mxu3 %v4985_v21  ;;  %1432 = vmatpush.bf16.msrb.mxu0 %v4853_v29 }
  0x41   : > { %1476 = vmatpush.bf16.msrb.mxu1 %v4981_v32 }
  0x43   : > { %1521 = vmatpush.bf16.msrb.mxu2 %v4841_v48  ;;  %v4820_v48 = vld [vmem:[%s9324_s2 + $0x20] sm:$0xf] }
  0x45   : > { %1477 = vmatpush.bf16.msrb.mxu1 %v4965_v59 }
  0x4d   : > { %4748 = vmatmul.msk.bf16.gmra.mxu0 %vm549_vm0, %v6447_v10 }
  0x4e   : > { %4762 = vmatmul.msk.bf16.gmra.mxu1 %vm549_vm0, %v6447_v10  ;;  %4776 = vmatmul.msk.bf16.gmra.mxu2 %vm549_vm0, %v6447_v10 }
  0x4f   : > { %4790 = vmatmul.msk.bf16.gmra.mxu3 %vm549_vm0, %v6447_v10 }
  0x5d   : > { %4749 = vmatmul.msk.bf16.gmra.mxu0 %vm549_vm0, %v6448_v23 }
  0x5e   : > { %4763 = vmatmul.msk.bf16.gmra.mxu1 %vm549_vm0, %v6448_v23  ;;  %4777 = vmatmul.msk.bf16.gmra.mxu2 %vm549_vm0, %v6448_v23 }
  0x5f   : > { %4791 = vmatmul.msk.bf16.gmra.mxu3 %vm549_vm0, %v6448_v23  ;;  %v6455_v23 = vld [vmem:[%s7156_s10 + $0x50] sm:$0xff] }
  0x6d   : > { %4750 = vmatmul.msk.bf16.gmra.mxu0 %vm549_vm0, %v6449_v24 }
  0x6e   : > { %4764 = vmatmul.msk.bf16.gmra.mxu1 %vm549_vm0, %v6449_v24  ;;  %4778 = vmatmul.msk.bf16.gmra.mxu2 %vm549_vm0, %v6449_v24 }
  0x6f   : > { %4792 = vmatmul.msk.bf16.gmra.mxu3 %vm549_vm0, %v6449_v24 }
  0x7d   : > { %4751 = vmatmul.msk.bf16.gmra.mxu0 %vm549_vm0, %v6450_v37 }
  0x7e   : > { %4765 = vmatmul.msk.bf16.gmra.mxu1 %vm549_vm0, %v6450_v37  ;;  %4779 = vmatmul.msk.bf16.gmra.mxu2 %vm549_vm0, %v6450_v37 }
  0x7f   : > { %4793 = vmatmul.msk.bf16.gmra.mxu3 %vm549_vm0, %v6450_v37 }
  0x8d   : > { %4752 = vmatmul.msk.bf16.gmra.mxu0 %vm549_vm0, %v6451_v38 }
  0x8e   : > { %4766 = vmatmul.msk.bf16.gmra.mxu1 %vm549_vm0, %v6451_v38  ;;  %4780 = vmatmul.msk.bf16.gmra.mxu2 %vm549_vm0, %v6451_v38 }
  0x8f   : > { %4794 = vmatmul.msk.bf16.gmra.mxu3 %vm549_vm0, %v6451_v38  ;;  %v6456_v38 = vld [vmem:[%s7156_s10 + $0x58] sm:$0xff] }
  0x9d   : > { %4753 = vmatmul.msk.bf16.gmra.mxu0 %vm549_vm0, %v6452_v51 }
  0x9e   : > { %4767 = vmatmul.msk.bf16.gmra.mxu1 %vm549_vm0, %v6452_v51  ;;  %4781 = vmatmul.msk.bf16.gmra.mxu2 %vm549_vm0, %v6452_v51 }
  0x9f   : > { %4795 = vmatmul.msk.bf16.gmra.mxu3 %vm549_vm0, %v6452_v51  ;;  %v4836_v51 = vld [vmem:[%s9324_s2 + $0x40] sm:$0xf] }
  0xa0   : > { %v4837_v58 = vor.u32 %v6493_v54, %v4836_v51 }
  0xa2   : > { %1433 = vmatpush.bf16.msrb.mxu0 %v4837_v58 }
  0xaa   : > { %v7271_v53 = vpop.f32.mrf.mxu0 }
  0xab   : > { %v7279_v56 = vpop.f32.mrf.mxu1 }
  0xad   : > { %4754 = vmatmul.msk.bf16.gmra.mxu0 %vm549_vm0, %v6453_v52 }
  0xae   : > { %4768 = vmatmul.msk.bf16.gmra.mxu1 %vm549_vm0, %v6453_v52  ;;  %4782 = vmatmul.msk.bf16.gmra.mxu2 %vm549_vm0, %v6453_v52 }
  0xaf   : > { %4796 = vmatmul.msk.bf16.gmra.mxu3 %vm549_vm0, %v6453_v52  ;;  %v4969_v52 = vor.u32 %v6523_v49, %v4966_v50  ;;  %v6489_v49 = vld [vmem:[%s9324_s2 + $0x2c] sm:$0xf0]  ;;  %v4948_v50 = vld [vmem:[%s9324_s2 + $0x120] sm:$0xf] }
  0xb0   : > { %v4821_v51 = vor.u32 %v6489_v49, %v4820_v48  ;;  %v6515_v49 = vld [vmem:[%s9324_s2 + $0x104] sm:$0xf] }
  0xb1   : > { %v7303_v3 = vpop.f32.mrf.mxu2  ;;  %1565 = vmatpush.bf16.msrb.mxu3 %v4969_v52  ;;  %v6521_v52 = vld [vmem:[%s9324_s2 + $0x12c] sm:$0xf0] }
  0xb2   : > { %v7305_v4 = vpop.f32.mrf.mxu3  ;;  %v7307_v5 = vpop.f32.mrf.mxu0  ;;  %v4949_v55 = vor.u32 %v6521_v52, %v4948_v50  ;;  %1434 = vmatpush.bf16.msrb.mxu0 %v4821_v51  ;;  %v4934_v50 = vld [vmem:[%s9324_s2 + $0x110] sm:$0xf0] }
  0xb3   : > { %v7309_v6 = vpop.f32.mrf.mxu1  ;;  %v4937_v51 = vor.u32 %v6515_v49, %v4934_v50 }
  0xb4   : > { %1478 = vmatpush.bf16.msrb.mxu1 %v4949_v55 }
  0xb5   : > { %1566 = vmatpush.bf16.msrb.mxu3 %v4953_v31 }
  0xb9   : > { %v7311_v7 = vpop.f32.mrf.mxu2  ;;  %1567 = vmatpush.bf16.msrb.mxu3 %v4937_v51 }
  0xba   : > { %v7314_v9 = vpop.f32.mrf.mxu3  ;;  %v7316_v10 = vpop.f32.mrf.mxu0 }
  0xbb   : > { %v7318_v11 = vpop.f32.mrf.mxu1 }
  0xbd   : > { %4755 = vmatmul.msk.bf16.gmra.mxu0 %vm549_vm0, %v6454_v8 }
  0xbe   : > { %4769 = vmatmul.msk.bf16.gmra.mxu1 %vm549_vm0, %v6454_v8  ;;  %4783 = vmatmul.msk.bf16.gmra.mxu2 %vm549_vm0, %v6454_v8 }
  0xbf   : > { %4797 = vmatmul.msk.bf16.gmra.mxu3 %vm549_vm0, %v6454_v8 }
  0xc1   : > { %v7324_v12 = vpop.f32.mrf.mxu2 }
  0xc2   : > { %v7326_v13 = vpop.f32.mrf.mxu3  ;;  %v7328_v14 = vpop.f32.mrf.mxu0 }
  0xc3   : > { %v7330_v15 = vpop.f32.mrf.mxu1 }
  0xc9   : > { %v7344_v22 = vpop.f32.mrf.mxu2 }
  0xca   : > { %v7347_v24 = vpop.f32.mrf.mxu3  ;;  %v7349_v25 = vpop.f32.mrf.mxu0 }
  0xcb   : > { %v7357_v28 = vpop.f32.mrf.mxu1 }
  0xcd   : > { %4756 = vmatmul.msk.bf16.gmra.mxu0 %vm549_vm0, %v6455_v23 }
  0xce   : > { %4770 = vmatmul.msk.bf16.gmra.mxu1 %vm549_vm0, %v6455_v23  ;;  %4784 = vmatmul.msk.bf16.gmra.mxu2 %vm549_vm0, %v6455_v23 }
  0xcf   : > { %4798 = vmatmul.msk.bf16.gmra.mxu3 %vm549_vm0, %v6455_v23  ;;  %v6487_v23 = vld [vmem:[%s9324_s2 + $0x24] sm:$0xf] }
  0xd0   : > { %v4825_v29 = vor.u32 %v6487_v23, %v4822_v26  ;;  %v4932_v23 = vld [vmem:[%s9324_s2 + $0x100] sm:$0xf] }
  0xd1   : > { %v7369_v33 = vpop.f32.mrf.mxu2  ;;  %v4933_v31 = vor.u32 %v6517_v27, %v4932_v23 }
  0xd2   : > { %v7371_v34 = vpop.f32.mrf.mxu3  ;;  %v7373_v35 = vpop.f32.mrf.mxu0  ;;  %1522 = vmatpush.bf16.msrb.mxu2 %v4825_v29  ;;  %v6483_v29 = vld [vmem:[%s9324_s2 + $0x4] sm:$0xf] }
  0xd3   : > { %v7375_v36 = vpop.f32.mrf.mxu1  ;;  %v4809_v48 = vor.u32 %v6483_v29, %v4806_v30  ;;  %1479 = vmatpush.bf16.msrb.mxu1 %v4933_v31 }
  0xd6   : > { %1523 = vmatpush.bf16.msrb.mxu2 %v4809_v48 }
  0xd9   : > { %v7377_v37 = vpop.f32.mrf.mxu2 }
  0xda   : > { %v7380_v39 = vpop.f32.mrf.mxu3  ;;  %v7382_v40 = vpop.f32.mrf.mxu0 }
  0xdb   : > { %v7384_v41 = vpop.f32.mrf.mxu1 }
  0xdd   : > { %4757 = vmatmul.msk.bf16.gmra.mxu0 %vm549_vm0, %v6456_v38 }
  0xde   : > { %4771 = vmatmul.msk.bf16.gmra.mxu1 %vm549_vm0, %v6456_v38  ;;  %4785 = vmatmul.msk.bf16.gmra.mxu2 %vm549_vm0, %v6456_v38 }
  0xdf   : > { %4799 = vmatmul.msk.bf16.gmra.mxu3 %vm549_vm0, %v6456_v38 }
  0xe1   : > { %v7390_v42 = vpop.f32.mrf.mxu2 }
  0xe2   : > { %v7392_v43 = vpop.f32.mrf.mxu3  ;;  %v7394_v44 = vpop.f32.mrf.mxu0 }
  0xe3   : > { %v7402_v47 = vpop.f32.mrf.mxu1 }
  0xe9   : > { %v7422_v60 = vpop.f32.mrf.mxu2 }
  0xea   : > { %v7425_v62 = vpop.f32.mrf.mxu3  ;;  %v7427_v63 = vpop.f32.mrf.mxu0 }
  0xeb   : > { %v7429_v0 = vpop.f32.mrf.mxu1 }
  0xed   : > { %4758 = vmatmul.msk.bf16.gmra.mxu0 %vm549_vm0, %v6457_v61 }
  0xee   : > { %4772 = vmatmul.msk.bf16.gmra.mxu1 %vm549_vm0, %v6457_v61  ;;  %4786 = vmatmul.msk.bf16.gmra.mxu2 %vm549_vm0, %v6457_v61 }
  0xef   : > { %4800 = vmatmul.msk.bf16.gmra.mxu3 %vm549_vm0, %v6457_v61  ;;  %v4804_v61 = vld [vmem:[%s9324_s2] sm:$0xf] }
  0xf1   : > { %v7435_v1 = vpop.f32.mrf.mxu2 }
  0xf2   : > { %v7437_v2 = vpop.f32.mrf.mxu3  ;;  %v7439_v8 = vpop.f32.mrf.mxu0 }
  0xf3   : > { %v7441_v16 = vpop.f32.mrf.mxu1 }
  0xf9   : > { %v7443_v17 = vpop.f32.mrf.mxu2 }
  0xfa   : > { %v7446_v19 = vpop.f32.mrf.mxu3  ;;  %v7448_v20 = vpop.f32.mrf.mxu0 }
  0xfb   : > { %v7450_v21 = vpop.f32.mrf.mxu1 }
  0xfd   : > { %4759 = vmatmul.msk.bf16.gmra.mxu0 %vm549_vm0, %v6458_v18 }
  0xfe   : > { %4773 = vmatmul.msk.bf16.gmra.mxu1 %vm549_vm0, %v6458_v18  ;;  %4787 = vmatmul.msk.bf16.gmra.mxu2 %vm549_vm0, %v6458_v18 }
  0xff   : > { %4801 = vmatmul.msk.bf16.gmra.mxu3 %vm549_vm0, %v6458_v18  ;;  %v6485_v18 = vld [vmem:[%s9324_s2 + $0xc] sm:$0xf0] }
 0x100   : > { %v4805_v26 = vor.u32 %v6485_v18, %v4804_v61 }
 0x101   : > { %v7468_v32 = vpop.f32.mrf.mxu2 }
 0x102   : > { %v7470_v38 = vpop.f32.mrf.mxu3  ;;  %v7472_v45 = vpop.f32.mrf.mxu0  ;;  %1435 = vmatpush.bf16.msrb.mxu0 %v4805_v26 }
 0x103   : > { %v7474_v46 = vpop.f32.mrf.mxu1 }
 0x104   : > { %9333 = vst [vmem:[#allocation5_spill] sm:$0xff] %v7474_v46 }
 0x109   : > { %v7488_v54 = vpop.f32.mrf.mxu2 }
 0x10a   : > { %9334 = vst [vmem:[#allocation6_spill] sm:$0xff] %v7488_v54  ;;  %v7490_v57 = vpop.f32.mrf.mxu3  ;;  %v7492_v58 = vpop.f32.mrf.mxu0 }
 0x10b   : > { %9335 = vst [vmem:[#allocation7_spill] sm:$0xff] %v7490_v57  ;;  %v7494_v59 = vpop.f32.mrf.mxu1 }
 0x10c   : > { %9336 = vst [vmem:[#allocation8_spill] sm:$0xff] %v7492_v58 }
 0x10d   : > { %9337 = vst [vmem:[#allocation9_spill] sm:$0xff] %v7494_v59 }
 0x111   : > { %v7520_v52 = vpop.f32.mrf.mxu2 }
 0x112   : > { %9338 = vst [vmem:[#allocation10_spill] sm:$0xff] %v7520_v52  ;;  %v7522_v55 = vpop.f32.mrf.mxu3  ;;  %v7524_v61 = vpop.f32.mrf.mxu0 }
 0x113   : > { %9339 = vst [vmem:[#allocation11_spill] sm:$0xff] %v7522_v55  ;;  %v7526_v18 = vpop.f32.mrf.mxu1 }
 0x114   : > { %9340 = vst [vmem:[#allocation12_spill] sm:$0xff] %v7524_v61 }
 0x115   : > { %9341 = vst [vmem:[#allocation13_spill] sm:$0xff] %v7526_v18 }
 0x119   : > { %v7528_v23 = vpop.f32.mrf.mxu2 }
 0x11a   : > { %9342 = vst [vmem:[#allocation14_spill] sm:$0xff] %v7528_v23  ;;  %v7530_v27 = vpop.f32.mrf.mxu3  ;;  %v636_v29 = vpop.f32.mrf.mxu0 }
 0x11b   : > { %9343 = vst [vmem:[#allocation15_spill] sm:$0xff] %v7530_v27  ;;  %v715_v30 = vpop.f32.mrf.mxu1  ;;  %v908_v58 = vmax.f32 %v7271_v53, %v636_v29 }
 0x11c   : > { %v909_v51 = vmax.f32 %v7279_v56, %v715_v30 }
 0x121   : > { %v794_v59 = vpop.f32.mrf.mxu2 }
 0x122   : > { %v873_v26 = vpop.f32.mrf.mxu3  ;;  %v638_v49 = vpop.f32.mrf.mxu0  ;;  %v910_v31 = vmax.f32 %v7303_v3, %v794_v59 }
 0x123   : > { %v717_v50 = vpop.f32.mrf.mxu1  ;;  %v911_v48 = vmax.f32 %v7305_v4, %v873_v26  ;;  %v912_v23 = vmax.f32 %v7307_v5, %v638_v49 }
 0x124   : > { %v964_v18 = vmax.f32 %v908_v58, %v910_v31  ;;  %v913_v46 = vmax.f32 %v7309_v6, %v717_v50 }
 0x125   : > { %v965_v57 = vmax.f32 %v909_v51, %v911_v48 }
 0x126   : > { %v992_v26 = vmax.f32 %v964_v18, 0.0 }
 0x127   : > { %v993_v29 = vmax.f32 %v965_v57, 0.0  ;;  %v6512_v57 = vld [vmem:[%s9324_s2 + $0xec] sm:$0xf] }
 0x129   : > { %v796_v61 = vpop.f32.mrf.mxu2 }
 0x12a   : > { %v914_v27 = vmax.f32 %v7311_v7, %v796_v61  ;;  %v875_v55 = vpop.f32.mrf.mxu3  ;;  %v641_v52 = vpop.f32.mrf.mxu0 }
 0x12b   : > { %v915_v54 = vmax.f32 %v7314_v9, %v875_v55  ;;  %v720_v3 = vpop.f32.mrf.mxu1  ;;  %v4926_v55 = vld [vmem:[%s9324_s2 + $0xf8] sm:$0xf0]  ;;  %v916_v61 = vmax.f32 %v7316_v10, %v641_v52 }
 0x12c   : > { %v966_v59 = vmax.f32 %v912_v23, %v914_v27  ;;  %v4929_v18 = vor.u32 %v6512_v57, %v4926_v55  ;;  %v6544_v23 = vld [vmem:[%s9324_s2 + $0x1ec] sm:$0xf]  ;;  %v6546_v57 = vld [vmem:[%s9324_s2 + $0x1f4] sm:$0xf0] }
 0x12d   : > { %v967_v4 = vmax.f32 %v913_v46, %v915_v54 }
 0x12e   : > { %v994_v53 = vmax.f32 %v966_v59, 0.0  ;;  %1692 = vmatpush.bf16.msra.mxu2 %v4929_v18 }
 0x12f   : > { %v995_v56 = vmax.f32 %v967_v4, 0.0 }
 0x130   : > { %v7540_v30 = vpack.c.bf16 %v994_v53, %v992_v26 }
 0x131   : > { %v7542_v58 = vpack.c.bf16 %v995_v56, %v993_v29  ;;  %v799_v5 = vpop.f32.mrf.mxu2 }
 0x132   : > { %v878_v7 = vpop.f32.mrf.mxu3  ;;  %1436 = vmatmul.bf16.vlgmr.msrb.gmra.mxu0 %v7540_v30  ;;  %1524 = vmatmul.bf16.vlgmr.msrb.gmra.mxu2 %v7540_v30  ;;  %v643_v6 = vpop.f32.mrf.mxu0  ;;  %v918_v46 = vmax.f32 %v7324_v12, %v799_v5  ;;  %v5054_v12 = vld [vmem:[%s9324_s2 + $0x1f8] sm:$0xf0] }
 0x133   : > { %1480 = vmatmul.bf16.vlgmr.msrb.gmra.mxu1 %v7542_v58  ;;  %1568 = vmatmul.bf16.vlgmr.msrb.gmra.mxu3 %v7542_v58  ;;  %v722_v9 = vpop.f32.mrf.mxu1  ;;  %v919_v54 = vmax.f32 %v7326_v13, %v878_v7  ;;  %v917_v13 = vmax.f32 %v7318_v11, %v720_v3  ;;  %v5057_v49 = vor.u32 %v6544_v23, %v5054_v12  ;;  %v6508_v12 = vld [vmem:[%s9324_s2 + $0xcc] sm:$0xf] }
 0x134   : > { %v968_v50 = vmax.f32 %v916_v61, %v918_v46  ;;  %v920_v31 = vmax.f32 %v7328_v14, %v643_v6  ;;  %v921_v59 = vmax.f32 %v7330_v15, %v722_v9  ;;  %v4924_v6 = vld [vmem:[%s9324_s2 + $0xe8] sm:$0xf]  ;;  %v6514_v15 = vld [vmem:[%s9324_s2 + $0xf4] sm:$0xf0] }
 0x135   : > { %v969_v52 = vmax.f32 %v917_v13, %v919_v54  ;;  %1736 = vmatpush.bf16.msra.mxu3 %v5057_v49  ;;  %v4925_v54 = vor.u32 %v6514_v15, %v4924_v6  ;;  %v4910_v13 = vld [vmem:[%s9324_s2 + $0xd8] sm:$0xf0] }
 0x136   : > { %v996_v11 = vmax.f32 %v968_v50, 0.0  ;;  %v4913_v49 = vor.u32 %v6508_v12, %v4910_v13  ;;  %v6540_v50 = vld [vmem:[%s9324_s2 + $0x1cc] sm:$0xf]  ;;  %v4894_v12 = vld [vmem:[%s9324_s2 + $0xb8] sm:$0xf0] }
 0x137   : > { %v997_v56 = vmax.f32 %v969_v52, 0.0  ;;  %1604 = vmatpush.bf16.msra.mxu0 %v4925_v54 }
 0x138   : > { %1693 = vmatpush.bf16.msra.mxu2 %v4913_v49  ;;  %v6536_v49 = vld [vmem:[%s9324_s2 + $0x1ac] sm:$0xf] }
 0x139   : > { %v801_v27 = vpop.f32.mrf.mxu2 }
 0x13a   : > { %v922_v48 = vmax.f32 %v7344_v22, %v801_v27  ;;  %v880_v51 = vpop.f32.mrf.mxu3  ;;  %v646_v10 = vpop.f32.mrf.mxu0 }
 0x13b   : > { %v923_v4 = vmax.f32 %v7347_v24, %v880_v51  ;;  %v725_v26 = vpop.f32.mrf.mxu1  ;;  %v5052_v24 = vld [vmem:[%s9324_s2 + $0x1e8] sm:$0xf]  ;;  %v924_v27 = vmax.f32 %v7349_v25, %v646_v10  ;;  %v6510_v25 = vld [vmem:[%s9324_s2 + $0xd4] sm:$0xf0] }
 0x13c   : > { %v970_v53 = vmax.f32 %v920_v31, %v922_v48  ;;  %v5053_v61 = vor.u32 %v6546_v57, %v5052_v24  ;;  %v925_v31 = vmax.f32 %v7357_v28, %v725_v26 }
 0x13d   : > { %v971_v29 = vmax.f32 %v921_v59, %v923_v4 }
 0x13e   : > { %v998_v3 = vmax.f32 %v970_v53, 0.0  ;;  %1648 = vmatpush.bf16.msra.mxu1 %v5053_v61 }
 0x13f   : > { %v999_v5 = vmax.f32 %v971_v29, 0.0 }
 0x140   : > { %v7568_v7 = vpack.c.bf16 %v998_v3, %v996_v11 }
 0x141   : > { %v7570_v14 = vpack.c.bf16 %v999_v5, %v997_v56  ;;  %v804_v22 = vpop.f32.mrf.mxu2 }
 0x142   : > { %v883_v9 = vpop.f32.mrf.mxu3  ;;  %1441 = vmatmul.bf16.gmra.mxu0 %v7568_v7  ;;  %1529 = vmatmul.bf16.gmra.mxu2 %v7568_v7  ;;  %v648_v46 = vpop.f32.mrf.mxu0  ;;  %v926_v18 = vmax.f32 %v7369_v33, %v804_v22  ;;  %v5038_v33 = vld [vmem:[%s9324_s2 + $0x1d8] sm:$0xf0] }
 0x143   : > { %1485 = vmatmul.bf16.gmra.mxu1 %v7570_v14  ;;  %1573 = vmatmul.bf16.gmra.mxu3 %v7570_v14  ;;  %v727_v55 = vpop.f32.mrf.mxu1  ;;  %v927_v23 = vmax.f32 %v7371_v34, %v883_v9  ;;  %v4908_v34 = vld [vmem:[%s9324_s2 + $0xc8] sm:$0xf]  ;;  %v5041_v51 = vor.u32 %v6540_v50, %v5038_v33  ;;  %v928_v52 = vmax.f32 %v7373_v35, %v648_v46 }
 0x144   : > { %v972_v10 = vmax.f32 %v924_v27, %v926_v18  ;;  %v4909_v29 = vor.u32 %v6510_v25, %v4908_v34  ;;  %v929_v3 = vmax.f32 %v7375_v36, %v727_v55  ;;  %v5036_v36 = vld [vmem:[%s9324_s2 + $0x1c8] sm:$0xf] }
 0x145   : > { %v973_v11 = vmax.f32 %v925_v31, %v927_v23  ;;  %1737 = vmatpush.bf16.msra.mxu3 %v5041_v51  ;;  %v6504_v23 = vld [vmem:[%s9324_s2 + $0xac] sm:$0xf]  ;;  %v6538_v51 = vld [vmem:[%s9324_s2 + $0x1b4] sm:$0xf0] }
 0x146   : > { %1605 = vmatpush.bf16.msra.mxu0 %v4909_v29  ;;  %v1000_v22 = vmax.f32 %v972_v10, 0.0  ;;  %v4897_v27 = vor.u32 %v6504_v23, %v4894_v12  ;;  %v4876_v23 = vld [vmem:[%s9324_s2 + $0x88] sm:$0xf] }
 0x147   : > { %v1001_v15 = vmax.f32 %v973_v11, 0.0 }
 0x148   : > { %1694 = vmatpush.bf16.msra.mxu2 %v4897_v27 }
 0x149   : > { %v806_v48 = vpop.f32.mrf.mxu2 }
 0x14a   : > { %v930_v59 = vmax.f32 %v7377_v37, %v806_v48  ;;  %v885_v4 = vpop.f32.mrf.mxu3  ;;  %v651_v53 = vpop.f32.mrf.mxu0  ;;  %v5020_v48 = vld [vmem:[%s9324_s2 + $0x1a8] sm:$0xf] }
 0x14b   : > { %v931_v28 = vmax.f32 %v7380_v39, %v885_v4  ;;  %v730_v26 = vpop.f32.mrf.mxu1  ;;  %v6542_v39 = vld [vmem:[%s9324_s2 + $0x1d4] sm:$0xf0]  ;;  %v932_v13 = vmax.f32 %v7382_v40, %v651_v53 }
 0x14c   : > { %v974_v56 = vmax.f32 %v928_v52, %v930_v59  ;;  %v5037_v57 = vor.u32 %v6542_v39, %v5036_v36  ;;  %v933_v50 = vmax.f32 %v7384_v41, %v730_v26  ;;  %v6506_v40 = vld [vmem:[%s9324_s2 + $0xb4] sm:$0xf0]  ;;  %v5021_v59 = vor.u32 %v6538_v51, %v5020_v48 }
 0x14d   : > { %v975_v5 = vmax.f32 %v929_v3, %v931_v28 }
 0x14e   : > { %v1002_v6 = vmax.f32 %v974_v56, 0.0  ;;  %1649 = vmatpush.bf16.msra.mxu1 %v5037_v57  ;;  %v6532_v57 = vld [vmem:[%s9324_s2 + $0x18c] sm:$0xf] }
 0x14f   : > { %v1003_v35 = vmax.f32 %v975_v5, 0.0 }
 0x150   : > { %v7614_v24 = vpack.c.bf16 %v1002_v6, %v1000_v22 }
 0x151   : > { %v7616_v37 = vpack.c.bf16 %v1003_v35, %v1001_v15  ;;  %v809_v9 = vpop.f32.mrf.mxu2 }
 0x152   : > { %v888_v46 = vpop.f32.mrf.mxu3  ;;  %1446 = vmatmul.bf16.gmra.mxu0 %v7614_v24  ;;  %1534 = vmatmul.bf16.gmra.mxu2 %v7614_v24  ;;  %v653_v54 = vpop.f32.mrf.mxu0  ;;  %v934_v61 = vmax.f32 %v7390_v42, %v809_v9  ;;  %v5022_v42 = vld [vmem:[%s9324_s2 + $0x1b8] sm:$0xf0] }
 0x153   : > { %1490 = vmatmul.bf16.gmra.mxu1 %v7616_v37  ;;  %1578 = vmatmul.bf16.gmra.mxu3 %v7616_v37  ;;  %v732_v55 = vpop.f32.mrf.mxu1  ;;  %v935_v18 = vmax.f32 %v7392_v43, %v888_v46  ;;  %v4892_v43 = vld [vmem:[%s9324_s2 + $0xa8] sm:$0xf]  ;;  %v936_v33 = vmax.f32 %v7394_v44, %v653_v54  ;;  %v5025_v31 = vor.u32 %v6536_v49, %v5022_v42 }
 0x154   : > { %v976_v25 = vmax.f32 %v932_v13, %v934_v61  ;;  %v4893_v44 = vor.u32 %v6506_v40, %v4892_v43  ;;  %v937_v53 = vmax.f32 %v7402_v47, %v732_v55  ;;  %1650 = vmatpush.bf16.msra.mxu1 %v5021_v59  ;;  %v6500_v47 = vld [vmem:[%s9324_s2 + $0x8c] sm:$0xf]  ;;  %v5006_v55 = vld [vmem:[%s9324_s2 + $0x198] sm:$0xf0] }
 0x155   : > { %v977_v4 = vmax.f32 %v933_v50, %v935_v18  ;;  %1738 = vmatpush.bf16.msra.mxu3 %v5025_v31  ;;  %v5009_v18 = vor.u32 %v6532_v57, %v5006_v55  ;;  %v4846_v57 = vld [vmem:[%s9324_s2 + $0x58] sm:$0xf0]  ;;  %v6524_v55 = vld [vmem:[%s9324_s2 + $0x14c] sm:$0xf] }
 0x156   : > { %1606 = vmatpush.bf16.msra.mxu0 %v4893_v44  ;;  %v1004_v26 = vmax.f32 %v976_v25, 0.0 }
 0x157   : > { %v1005_v5 = vmax.f32 %v977_v4, 0.0  ;;  %v6528_v4 = vld [vmem:[%s9324_s2 + $0x16c] sm:$0xf] }
 0x159   : > { %v811_v34 = vpop.f32.mrf.mxu2  ;;  %1739 = vmatpush.bf16.msra.mxu3 %v5009_v18 }
 0x15a   : > { %v938_v10 = vmax.f32 %v7422_v60, %v811_v34  ;;  %v890_v41 = vpop.f32.mrf.mxu3  ;;  %v656_v52 = vpop.f32.mrf.mxu0 }
 0x15b   : > { %v939_v29 = vmax.f32 %v7425_v62, %v890_v41  ;;  %v735_v11 = vpop.f32.mrf.mxu1  ;;  %v4878_v62 = vld [vmem:[%s9324_s2 + $0x98] sm:$0xf0]  ;;  %v940_v61 = vmax.f32 %v7427_v63, %v656_v52  ;;  %v6534_v63 = vld [vmem:[%s9324_s2 + $0x194] sm:$0xf0] }
 0x15c   : > { %v978_v3 = vmax.f32 %v936_v33, %v938_v10  ;;  %v4881_v36 = vor.u32 %v6500_v47, %v4878_v62  ;;  %v941_v12 = vmax.f32 %v7429_v0, %v735_v11  ;;  %v4990_v11 = vld [vmem:[%s9324_s2 + $0x178] sm:$0xf0] }
 0x15d   : > { %v979_v28 = vmax.f32 %v937_v53, %v939_v29 }
 0x15e   : > { %v1006_v56 = vmax.f32 %v978_v3, 0.0  ;;  %1695 = vmatpush.bf16.msra.mxu2 %v4881_v36  ;;  %v4860_v3 = vld [vmem:[%s9324_s2 + $0x68] sm:$0xf] }
 0x15f   : > { %v1007_v60 = vmax.f32 %v979_v28, 0.0  ;;  %v6498_v28 = vld [vmem:[%s9324_s2 + $0x74] sm:$0xf0]  ;;  %v4972_v36 = vld [vmem:[%s9324_s2 + $0x148] sm:$0xf] }
 0x160   : > { %v7660_v22 = vpack.c.bf16 %v1006_v56, %v1004_v26  ;;  %v4993_v56 = vor.u32 %v6528_v4, %v4990_v11  ;;  %v4861_v62 = vor.u32 %v6498_v28, %v4860_v3  ;;  %v6516_v4 = vld [vmem:[%s9324_s2 + $0x10c] sm:$0xf]  ;;  %v4942_v3 = vld [vmem:[%s9324_s2 + $0x118] sm:$0xf0] }
 0x161   : > { %v7662_v6 = vpack.c.bf16 %v1007_v60, %v1005_v5  ;;  %v814_v15 = vpop.f32.mrf.mxu2  ;;  %v4988_v5 = vld [vmem:[%s9324_s2 + $0x168] sm:$0xf]  ;;  %v6530_v60 = vld [vmem:[%s9324_s2 + $0x174] sm:$0xf0] }
 0x162   : > { %v893_v35 = vpop.f32.mrf.mxu3  ;;  %1451 = vmatmul.bf16.gmra.mxu0 %v7660_v22  ;;  %1539 = vmatmul.bf16.gmra.mxu2 %v7660_v22  ;;  %v658_v9 = vpop.f32.mrf.mxu0  ;;  %v942_v46 = vmax.f32 %v7435_v1, %v814_v15  ;;  %v6502_v1 = vld [vmem:[%s9324_s2 + $0x94] sm:$0xf0]  ;;  %v4844_v15 = vld [vmem:[%s9324_s2 + $0x48] sm:$0xf] }
 0x163   : > { %1495 = vmatmul.bf16.gmra.mxu1 %v7662_v6  ;;  %1583 = vmatmul.bf16.gmra.mxu3 %v7662_v6  ;;  %v737_v39 = vpop.f32.mrf.mxu1  ;;  %v943_v54 = vmax.f32 %v7437_v2, %v893_v35  ;;  %v5004_v2 = vld [vmem:[%s9324_s2 + $0x188] sm:$0xf]  ;;  %v4877_v27 = vor.u32 %v6502_v1, %v4876_v23  ;;  %v944_v42 = vmax.f32 %v7439_v8, %v658_v9  ;;  %v6494_v9 = vld [vmem:[%s9324_s2 + $0x54] sm:$0xf0] }
 0x164   : > { %v980_v49 = vmax.f32 %v940_v61, %v942_v46  ;;  %v5005_v34 = vor.u32 %v6534_v63, %v5004_v2  ;;  %v945_v40 = vmax.f32 %v7441_v16, %v737_v39  ;;  %v6496_v16 = vld [vmem:[%s9324_s2 + $0x6c] sm:$0xf]  ;;  %v4989_v35 = vor.u32 %v6530_v60, %v4988_v5  ;;  %v6526_v39 = vld [vmem:[%s9324_s2 + $0x154] sm:$0xf0]  ;;  %1740 = vmatpush.bf16.msra.mxu3 %v4993_v56  ;;  %v4828_v1 = vld [vmem:[%s9324_s2 + $0x28] sm:$0xf] }
 0x165   : > { %v981_v31 = vmax.f32 %v941_v12, %v943_v54  ;;  %1607 = vmatpush.bf16.msra.mxu0 %v4877_v27  ;;  %v6492_v54 = vld [vmem:[%s9324_s2 + $0x4c] sm:$0xf]  ;;  %v4845_v61 = vor.u32 %v6494_v9, %v4844_v15  ;;  %v4973_v18 = vor.u32 %v6526_v39, %v4972_v36  ;;  %v6490_v27 = vld [vmem:[%s9324_s2 + $0x34] sm:$0xf0]  ;;  %v4956_v63 = vld [vmem:[%s9324_s2 + $0x128] sm:$0xf]  ;;  %v4945_v15 = vor.u32 %v6516_v4, %v4942_v3 }
 0x166   : > { %1651 = vmatpush.bf16.msra.mxu1 %v5005_v34  ;;  %v1008_v10 = vmax.f32 %v980_v49, 0.0  ;;  %v4849_v23 = vor.u32 %v6492_v54, %v4846_v57  ;;  %v4829_v34 = vor.u32 %v6490_v27, %v4828_v1  ;;  %v6486_v56 = vld [vmem:[%s9324_s2 + $0x14] sm:$0xf0]  ;;  %v4940_v5 = vld [vmem:[%s9324_s2 + $0x108] sm:$0xf] }
 0x167   : > { %v1009_v41 = vmax.f32 %v981_v31, 0.0  ;;  %v6520_v31 = vld [vmem:[%s9324_s2 + $0x12c] sm:$0xf]  ;;  %v6518_v60 = vld [vmem:[%s9324_s2 + $0x114] sm:$0xf0] }
 0x168   : > { %v4941_v54 = vor.u32 %v6518_v60, %v4940_v5 }
 0x169   : > { %v816_v13 = vpop.f32.mrf.mxu2  ;;  %1608 = vmatpush.bf16.msra.mxu0 %v4861_v62 }
 0x16a   : > { %v946_v43 = vmax.f32 %v7443_v17, %v816_v13  ;;  %v895_v50 = vpop.f32.mrf.mxu3  ;;  %v7698_v33 = vpop.f32.mrf.mxu0  ;;  %1652 = vmatpush.bf16.msra.mxu1 %v4989_v35 }
 0x16b   : > { %v947_v0 = vmax.f32 %v7446_v19, %v895_v50  ;;  %v7702_v48 = vpop.f32.mrf.mxu1  ;;  %v4862_v19 = vld [vmem:[%s9324_s2 + $0x78] sm:$0xf0]  ;;  %v948_v2 = vmax.f32 %v7448_v20, %v7698_v33  ;;  %v6488_v20 = vld [vmem:[%s9324_s2 + $0x2c] sm:$0xf] }
 0x16c   : > { %v982_v51 = vmax.f32 %v944_v42, %v946_v43  ;;  %v4865_v29 = vor.u32 %v6496_v16, %v4862_v19  ;;  %v949_v49 = vmax.f32 %v7450_v21, %v7702_v48  ;;  %v6522_v42 = vld [vmem:[%s9324_s2 + $0x134] sm:$0xf0]  ;;  %v6484_v16 = vld [vmem:[%s9324_s2 + $0xc] sm:$0xf]  ;;  %v4814_v19 = vld [vmem:[%s9324_s2 + $0x18] sm:$0xf0] }
 0x16d   : > { %v983_v25 = vmax.f32 %v945_v40, %v947_v0  ;;  %v4958_v40 = vld [vmem:[%s9324_s2 + $0x138] sm:$0xf0]  ;;  %1609 = vmatpush.bf16.msra.mxu0 %v4845_v61  ;;  %v4817_v11 = vor.u32 %v6484_v16, %v4814_v19  ;;  %v7849_v16 = vld [vmem:[%s9327_s5] sm:$0xf] }
 0x16e   : > { %v1010_v8 = vmax.f32 %v982_v51, 0.0  ;;  %1696 = vmatpush.bf16.msra.mxu2 %v4865_v29  ;;  %v9344_v0 = vld [vmem:[#allocation6_spill] sm:$0xff]  ;;  %1653 = vmatpush.bf16.msra.mxu1 %v4973_v18  ;;  %v4812_v29 = vld [vmem:[%s9324_s2 + $0x8] sm:$0xf]  ;;  %v7852_v19 = vperm.slane %v7849_v16, 0 }
 0x16f   : > { %v1011_v17 = vmax.f32 %v983_v25, 0.0  ;;  %v4957_v25 = vor.u32 %v6522_v42, %v4956_v63  ;;  %v9347_v18 = vld [vmem:[#allocation10_spill] sm:$0xff]  ;;  %v9350_v63 = vld [vmem:[#allocation9_spill] sm:$0xff] }
 0x170   : > { %v7704_v52 = vpack.c.bf16 %v1010_v8, %v1008_v10  ;;  %v4961_v10 = vor.u32 %v6520_v31, %v4958_v40  ;;  %v9345_v8 = vld [vmem:[#allocation5_spill] sm:$0xff] }
 0x171   : > { %v7706_v44 = vpack.c.bf16 %v1011_v17, %v1009_v41  ;;  %v819_v59 = vpop.f32.mrf.mxu2  ;;  %v9346_v17 = vld [vmem:[#allocation7_spill] sm:$0xff]  ;;  %1610 = vmatpush.bf16.msra.mxu0 %v4829_v34  ;;  %v9353_v31 = vld [vmem:[#allocation13_spill] sm:$0xff] }
 0x172   : > { %v898_v53 = vpop.f32.mrf.mxu3  ;;  %1456 = vmatmul.bf16.gmra.mxu0 %v7704_v52  ;;  %1544 = vmatmul.bf16.gmra.mxu2 %v7704_v52  ;;  %v663_v26 = vpop.f32.mrf.mxu0  ;;  %v950_v46 = vmax.f32 %v7468_v32, %v819_v59  ;;  %v4974_v32 = vld [vmem:[%s9324_s2 + $0x158] sm:$0xf0] }
 0x173   : > { %1500 = vmatmul.bf16.gmra.mxu1 %v7706_v44  ;;  %1588 = vmatmul.bf16.gmra.mxu3 %v7706_v44  ;;  %v742_v47 = vpop.f32.mrf.mxu1  ;;  %v951_v12 = vmax.f32 %v7470_v38, %v898_v53  ;;  %v4977_v13 = vor.u32 %v6524_v55, %v4974_v32  ;;  %v4830_v38 = vld [vmem:[%s9324_s2 + $0x38] sm:$0xf0]  ;;  %v952_v50 = vmax.f32 %v7472_v45, %v663_v26  ;;  %v9348_v32 = vld [vmem:[#allocation11_spill] sm:$0xff] }
 0x174   : > { %1697 = vmatpush.bf16.msra.mxu2 %v4849_v23  ;;  %v984_v43 = vmax.f32 %v948_v2, %v950_v46  ;;  %v4833_v21 = vor.u32 %v6488_v20, %v4830_v38  ;;  %v953_v41 = vmax.f32 %v9345_v8, %v742_v47  ;;  %1654 = vmatpush.bf16.msra.mxu1 %v4957_v25  ;;  %v9351_v38 = vld [vmem:[#allocation12_spill] sm:$0xff] }
 0x175   : > { %1741 = vmatpush.bf16.msra.mxu3 %v4977_v13  ;;  %v985_v45 = vmax.f32 %v949_v49, %v951_v12  ;;  %v4813_v46 = vor.u32 %v6486_v56, %v4812_v29  ;;  %v9349_v12 = vld [vmem:[#allocation8_spill] sm:$0xff] }
 0x176   : > { %v1012_v47 = vmax.f32 %v984_v43, 0.0 }
 0x177   : > { %v1013_v9 = vmax.f32 %v985_v45, 0.0  ;;  %1611 = vmatpush.bf16.msra.mxu0 %v4813_v46 }
 0x178   : > { %1698 = vmatpush.bf16.msra.mxu2 %v4833_v21  ;;  %1655 = vmatpush.bf16.msra.mxu1 %v4941_v54 }
 0x179   : > { %v821_v33 = vpop.f32.mrf.mxu2  ;;  %1742 = vmatpush.bf16.msra.mxu3 %v4961_v10 }
 0x17a   : > { %v954_v48 = vmax.f32 %v9344_v0, %v821_v33  ;;  %v900_v51 = vpop.f32.mrf.mxu3  ;;  %v666_v26 = vpop.f32.mrf.mxu0  ;;  %v9354_v0 = vld [vmem:[#allocation15_spill] sm:$0xff] }
 0x17b   : > { %v955_v59 = vmax.f32 %v9346_v17, %v900_v51  ;;  %v745_v35 = vpop.f32.mrf.mxu1  ;;  %v956_v13 = vmax.f32 %v9349_v12, %v666_v26 }
 0x17c   : > { %v986_v53 = vmax.f32 %v952_v50, %v954_v48  ;;  %1699 = vmatpush.bf16.msra.mxu2 %v4817_v11  ;;  %v957_v49 = vmax.f32 %v9350_v63, %v745_v35  ;;  %v9352_v50 = vld [vmem:[#allocation14_spill] sm:$0xff] }
 0x17d   : > { %v987_v28 = vmax.f32 %v953_v41, %v955_v59  ;;  %1743 = vmatpush.bf16.msra.mxu3 %v4945_v15 }
 0x17e   : > { %v1014_v62 = vmax.f32 %v986_v53, 0.0 }
 0x17f   : > { %v1015_v36 = vmax.f32 %v987_v28, 0.0 }
 0x180   : > { %v7818_v39 = vpack.c.bf16 %v1014_v62, %v1012_v47 }
 0x181   : > { %v7820_v57 = vpack.c.bf16 %v1015_v36, %v1013_v9  ;;  %v824_v55 = vpop.f32.mrf.mxu2 }
 0x182   : > { %v903_v61 = vpop.f32.mrf.mxu3  ;;  %1461 = vmatmul.bf16.gmra.mxu0 %v7818_v39  ;;  %1549 = vmatmul.bf16.gmra.mxu2 %v7818_v39  ;;  %v958_v23 = vmax.f32 %v9347_v18, %v824_v55  ;;  %v668_v2 = vpop.f32.mrf.mxu0 }
 0x183   : > { %1505 = vmatmul.bf16.gmra.mxu1 %v7820_v57  ;;  %1593 = vmatmul.bf16.gmra.mxu3 %v7820_v57  ;;  %v959_v1 = vmax.f32 %v9348_v32, %v903_v61  ;;  %v747_v27 = vpop.f32.mrf.mxu1  ;;  %v960_v43 = vmax.f32 %v9351_v38, %v668_v2 }
 0x184   : > { %v988_v20 = vmax.f32 %v956_v13, %v958_v23  ;;  %v961_v40 = vmax.f32 %v9353_v31, %v747_v27 }
 0x185   : > { %v989_v21 = vmax.f32 %v957_v49, %v959_v1 }
 0x186   : > { %v1016_v10 = vmax.f32 %v988_v20, 0.0 }
 0x187   : > { %v1017_v8 = vmax.f32 %v989_v21, 0.0 }
 0x189   : > { %v826_v42 = vpop.f32.mrf.mxu2 }
 0x18a   : > { %v962_v33 = vmax.f32 %v9352_v50, %v826_v42  ;;  %v905_v34 = vpop.f32.mrf.mxu3 }
 0x18b   : > { %v963_v48 = vmax.f32 %v9354_v0, %v905_v34 }
 0x18c   : > { %v990_v51 = vmax.f32 %v960_v43, %v962_v33 }
 0x18d   : > { %v991_v25 = vmax.f32 %v961_v40, %v963_v48 }
 0x18e   : > { %v1018_v45 = vmax.f32 %v990_v51, 0.0 }
 0x18f   : > { %v1019_v41 = vmax.f32 %v991_v25, 0.0 }
 0x190   : > { %v7834_v17 = vpack.c.bf16 %v1018_v45, %v1016_v10 }
 0x191   : > { %v7836_v59 = vpack.c.bf16 %v1019_v41, %v1017_v8 }
 0x192   : > { %1466 = vmatmul.bf16.gmra.mxu0 %v7834_v17  ;;  %1554 = vmatmul.bf16.gmra.mxu2 %v7834_v17 }
 0x193   : > { %1510 = vmatmul.bf16.gmra.mxu1 %v7836_v59  ;;  %1598 = vmatmul.bf16.gmra.mxu3 %v7836_v59 }
 0x1a2   : > { %1612 = vmatmul.bf16.vlgmr.msra.gmra.mxu0 %v7540_v30  ;;  %1700 = vmatmul.bf16.vlgmr.msra.gmra.mxu2 %v7540_v30  ;;  %v7860_v30 = vperm.slane %v7849_v16, 1 }
 0x1a3   : > { %1656 = vmatmul.bf16.vlgmr.msra.gmra.mxu1 %v7542_v58  ;;  %1744 = vmatmul.bf16.vlgmr.msra.gmra.mxu3 %v7542_v58 }
 0x1af   : > { %v1437_v4 = vpop.f32.mrf.mxu0 }
 0x1b0   : > { %v1438_v53 = vadd.f32 %v1437_v4, %v7852_v19  ;;  %v1481_v29 = vpop.f32.mrf.mxu1 }
 0x1b2   : > { %v7855_v11 = vadd.f32 %v1481_v29, %v1438_v53  ;;  %1617 = vmatmul.bf16.gmra.mxu0 %v7568_v7  ;;  %1705 = vmatmul.bf16.gmra.mxu2 %v7568_v7 }
 0x1b3   : > { %1661 = vmatmul.bf16.gmra.mxu1 %v7570_v14  ;;  %1749 = vmatmul.bf16.gmra.mxu3 %v7570_v14 }
 0x1b5   : > { %v1525_v58 = vpop.f32.mrf.mxu2 }
 0x1b6   : > { %v1526_v3 = vadd.f32 %v1525_v58, %v7860_v30  ;;  %v1569_v28 = vpop.f32.mrf.mxu3 }
 0x1b7   : > { %v1439_v26 = vpop.f32.mrf.mxu0 }
 0x1b8   : > { %v7865_v56 = vadd.f32 %v1569_v28, %v1526_v3  ;;  %v1440_v5 = vadd.f32 %v1439_v26, %v7852_v19  ;;  %v1483_v60 = vpop.f32.mrf.mxu1 }
 0x1ba   : > { %v7868_v15 = vadd.f32 %v1483_v60, %v1440_v5 }
 0x1bd   : > { %v1527_v7 = vpop.f32.mrf.mxu2 }
 0x1be   : > { %v1528_v47 = vadd.f32 %v1527_v7, %v7860_v30  ;;  %v1571_v62 = vpop.f32.mrf.mxu3 }
 0x1bf   : > { %v1442_v35 = vpop.f32.mrf.mxu0 }
 0x1c0   : > { %v7871_v9 = vadd.f32 %v1571_v62, %v1528_v47  ;;  %v1443_v14 = vadd.f32 %v1442_v35, %v7852_v19  ;;  %v1486_v36 = vpop.f32.mrf.mxu1 }
 0x1c2   : > { %v7874_v46 = vadd.f32 %v1486_v36, %v1443_v14  ;;  %1622 = vmatmul.bf16.gmra.mxu0 %v7614_v24  ;;  %1710 = vmatmul.bf16.gmra.mxu2 %v7614_v24 }
 0x1c3   : > { %1666 = vmatmul.bf16.gmra.mxu1 %v7616_v37  ;;  %1754 = vmatmul.bf16.gmra.mxu3 %v7616_v37 }
 0x1c5   : > { %v1530_v54 = vpop.f32.mrf.mxu2 }
 0x1c6   : > { %v1531_v55 = vadd.f32 %v1530_v54, %v7860_v30  ;;  %v1574_v61 = vpop.f32.mrf.mxu3  ;;  %v6575_v54 = vld [vmem:[%s9325_s3 + $0xe4] sm:$0xf] }
 0x1c7   : > { %v1444_v18 = vpop.f32.mrf.mxu0 }
 0x1c8   : > { %v7881_v23 = vadd.f32 %v1574_v61, %v1531_v55  ;;  %v1445_v32 = vadd.f32 %v1444_v18, %v7852_v19  ;;  %v1488_v1 = vpop.f32.mrf.mxu1  ;;  %v5174_v55 = vld [vmem:[%s9325_s3 + $0xf0] sm:$0xf0] }
 0x1c9   : > { %v5177_v61 = vor.u32 %v6575_v54, %v5174_v55 }
 0x1ca   : > { %v7884_v2 = vadd.f32 %v1488_v1, %v1445_v32 }
 0x1cb   : > { %2294 = vmatpush.bf16.msrb.mxu2 %v5177_v61 }
 0x1cd   : > { %v1532_v12 = vpop.f32.mrf.mxu2 }
 0x1ce   : > { %v1533_v13 = vadd.f32 %v1532_v12, %v7860_v30  ;;  %v1576_v24 = vpop.f32.mrf.mxu3 }
 0x1cf   : > { %v1447_v27 = vpop.f32.mrf.mxu0 }
 0x1d0   : > { %v7887_v63 = vadd.f32 %v1576_v24, %v1533_v13  ;;  %v1448_v37 = vadd.f32 %v1447_v27, %v7852_v19  ;;  %v1491_v49 = vpop.f32.mrf.mxu1  ;;  %v6607_v27 = vld [vmem:[%s9325_s3 + $0x1e4] sm:$0xf] }
 0x1d2   : > { %v7890_v42 = vadd.f32 %v1491_v49, %v1448_v37  ;;  %1627 = vmatmul.bf16.gmra.mxu0 %v7660_v22  ;;  %1715 = vmatmul.bf16.gmra.mxu2 %v7660_v22 }
 0x1d3   : > { %1671 = vmatmul.bf16.gmra.mxu1 %v7662_v6  ;;  %1759 = vmatmul.bf16.gmra.mxu3 %v7662_v6 }
 0x1d5   : > { %v1535_v20 = vpop.f32.mrf.mxu2 }
 0x1d6   : > { %v1536_v38 = vadd.f32 %v1535_v20, %v7860_v30  ;;  %v1579_v43 = vpop.f32.mrf.mxu3 }
 0x1d7   : > { %v7897_v50 = vpop.f32.mrf.mxu0 }
 0x1d8   : > { %v7899_v33 = vadd.f32 %v1579_v43, %v1536_v38  ;;  %v7901_v34 = vpop.f32.mrf.mxu1 }
 0x1dd   : > { %v7903_v21 = vpop.f32.mrf.mxu2 }
 0x1de   : > { %v7905_v31 = vpop.f32.mrf.mxu3 }
 0x1df   : > { %9355 = vst [vmem:[#allocation6_spill] sm:$0xff] %v7905_v31  ;;  %v1452_v40 = vpop.f32.mrf.mxu0 }
 0x1e0   : > { %v1453_v22 = vadd.f32 %v1452_v40, %v7852_v19  ;;  %v1496_v0 = vpop.f32.mrf.mxu1 }
 0x1e2   : > { %v7908_v48 = vadd.f32 %v1496_v0, %v1453_v22  ;;  %1632 = vmatmul.bf16.gmra.mxu0 %v7704_v52  ;;  %1720 = vmatmul.bf16.gmra.mxu2 %v7704_v52  ;;  %v5172_v0 = vld [vmem:[%s9325_s3 + $0xe0] sm:$0xf] }
 0x1e3   : > { %1676 = vmatmul.bf16.gmra.mxu1 %v7706_v44  ;;  %1764 = vmatmul.bf16.gmra.mxu3 %v7706_v44  ;;  %v6557_v44 = vld [vmem:[%s9325_s3 + $0x4c] sm:$0xf0] }
 0x1e4   : > { %9356 = vst [vmem:[#allocation5_spill] sm:$0xff] %v7908_v48 }
 0x1e5   : > { %v1540_v6 = vpop.f32.mrf.mxu2 }
 0x1e6   : > { %v1541_v51 = vadd.f32 %v1540_v6, %v7860_v30  ;;  %v1584_v25 = vpop.f32.mrf.mxu3  ;;  %v6577_v6 = vld [vmem:[%s9325_s3 + $0xec] sm:$0xf0] }
 0x1e7   : > { %v7915_v10 = vpop.f32.mrf.mxu0 }
 0x1e8   : > { %v7917_v45 = vadd.f32 %v1584_v25, %v1541_v51  ;;  %v7919_v8 = vpop.f32.mrf.mxu1  ;;  %v5173_v51 = vor.u32 %v6577_v6, %v5172_v0  ;;  %v1455_v31 = vadd.f32 %v7915_v10, %v7852_v19 }
 0x1ea   : > { %9357 = vst [vmem:[#allocation7_spill] sm:$0xff] %v7917_v45  ;;  %2238 = vmatpush.bf16.msrb.mxu0 %v5173_v51  ;;  %v6555_v45 = vld [vmem:[%s9325_s3 + $0x44] sm:$0xf] }
 0x1ed   : > { %v7921_v41 = vpop.f32.mrf.mxu2 }
 0x1ee   : > { %v7923_v4 = vpop.f32.mrf.mxu3 }
 0x1ef   : > { %v1457_v53 = vpop.f32.mrf.mxu0 }
 0x1f0   : > { %v1458_v52 = vadd.f32 %v1457_v53, %v7852_v19  ;;  %v1501_v29 = vpop.f32.mrf.mxu1  ;;  %v5300_v53 = vld [vmem:[%s9325_s3 + $0x1e0] sm:$0xf] }
 0x1f2   : > { %v7926_v58 = vadd.f32 %v1501_v29, %v1458_v52  ;;  %1637 = vmatmul.bf16.gmra.mxu0 %v7818_v39  ;;  %1725 = vmatmul.bf16.gmra.mxu2 %v7818_v39  ;;  %v6609_v52 = vld [vmem:[%s9325_s3 + $0x1ec] sm:$0xf0]  ;;  %v6571_v29 = vld [vmem:[%s9325_s3 + $0xc4] sm:$0xf] }
 0x1f3   : > { %1681 = vmatmul.bf16.gmra.mxu1 %v7820_v57  ;;  %1769 = vmatmul.bf16.gmra.mxu3 %v7820_v57 }
 0x1f5   : > { %v1545_v3 = vpop.f32.mrf.mxu2 }
 0x1f6   : > { %v1546_v28 = vadd.f32 %v1545_v3, %v7860_v30  ;;  %v1589_v26 = vpop.f32.mrf.mxu3  ;;  %v5301_v3 = vor.u32 %v6609_v52, %v5300_v53  ;;  %v5284_v53 = vld [vmem:[%s9325_s3 + $0x1c0] sm:$0xf]  ;;  %v6605_v52 = vld [vmem:[%s9325_s3 + $0x1cc] sm:$0xf0] }
 0x1f7   : > { %v7935_v5 = vpop.f32.mrf.mxu0 }
 0x1f8   : > { %v7937_v60 = vadd.f32 %v1589_v26, %v1546_v28  ;;  %v7939_v7 = vpop.f32.mrf.mxu1  ;;  %v5158_v28 = vld [vmem:[%s9325_s3 + $0xd0] sm:$0xf0]  ;;  %v6603_v26 = vld [vmem:[%s9325_s3 + $0x1c4] sm:$0xf]  ;;  %2266 = vmatpush.bf16.msrb.mxu1 %v5301_v3  ;;  %v5285_v3 = vor.u32 %v6605_v52, %v5284_v53  ;;  %v5268_v53 = vld [vmem:[%s9325_s3 + $0x1a0] sm:$0xf] }
 0x1fc   : > { %2267 = vmatpush.bf16.msrb.mxu1 %v5285_v3  ;;  %v6601_v3 = vld [vmem:[%s9325_s3 + $0x1ac] sm:$0xf0] }
 0x1fd   : > { %v7943_v47 = vpop.f32.mrf.mxu2 }
 0x1fe   : > { %v7945_v62 = vpop.f32.mrf.mxu3 }
 0x1ff   : > { %v1462_v57 = vpop.f32.mrf.mxu0 }
 0x200   : > { %v1463_v35 = vadd.f32 %v1462_v57, %v7852_v19  ;;  %v1506_v14 = vpop.f32.mrf.mxu1  ;;  %v5286_v57 = vld [vmem:[%s9325_s3 + $0x1d0] sm:$0xf0] }
 0x202   : > { %v7948_v36 = vadd.f32 %v1506_v14, %v1463_v35  ;;  %1642 = vmatmul.bf16.gmra.mxu0 %v7834_v17  ;;  %1730 = vmatmul.bf16.gmra.mxu2 %v7834_v17  ;;  %v5161_v35 = vor.u32 %v6571_v29, %v5158_v28  ;;  %v5289_v14 = vor.u32 %v6603_v26, %v5286_v57  ;;  %v8036_v29 = vperm.slane %v7849_v16, 3  ;;  %v6567_v26 = vld [vmem:[%s9325_s3 + $0xa4] sm:$0xf]  ;;  %v5142_v57 = vld [vmem:[%s9325_s3 + $0xb0] sm:$0xf0] }
 0x203   : > { %1686 = vmatmul.bf16.gmra.mxu1 %v7836_v59  ;;  %1774 = vmatmul.bf16.gmra.mxu3 %v7836_v59  ;;  %v5302_v59 = vld [vmem:[%s9325_s3 + $0x1f0] sm:$0xf0] }
 0x204   : > { %v5305_v37 = vor.u32 %v6607_v27, %v5302_v59  ;;  %2295 = vmatpush.bf16.msrb.mxu2 %v5161_v35  ;;  %v5156_v27 = vld [vmem:[%s9325_s3 + $0xc0] sm:$0xf]  ;;  %v6573_v59 = vld [vmem:[%s9325_s3 + $0xcc] sm:$0xf0]  ;;  %v6599_v35 = vld [vmem:[%s9325_s3 + $0x1a4] sm:$0xf] }
 0x205   : > { %v1550_v32 = vpop.f32.mrf.mxu2 }
 0x206   : > { %v1551_v17 = vadd.f32 %v1550_v32, %v7860_v30  ;;  %v1594_v1 = vpop.f32.mrf.mxu3  ;;  %2322 = vmatpush.bf16.msrb.mxu3 %v5305_v37  ;;  %v5157_v37 = vor.u32 %v6573_v59, %v5156_v27 }
 0x207   : > { %v7963_v12 = vpop.f32.mrf.mxu0 }
 0x208   : > { %v7965_v13 = vadd.f32 %v1594_v1, %v1551_v17  ;;  %v7967_v24 = vpop.f32.mrf.mxu1  ;;  %2239 = vmatpush.bf16.msrb.mxu0 %v5157_v37 }
 0x20a   : > { %2323 = vmatpush.bf16.msrb.mxu3 %v5289_v14  ;;  %v5145_v14 = vor.u32 %v6567_v26, %v5142_v57  ;;  %v5269_v26 = vor.u32 %v6601_v3, %v5268_v53  ;;  %v5254_v53 = vld [vmem:[%s9325_s3 + $0x190] sm:$0xf0] }
 0x20c   : > { %2296 = vmatpush.bf16.msrb.mxu2 %v5145_v14  ;;  %2268 = vmatpush.bf16.msrb.mxu1 %v5269_v26 }
 0x20d   : > { %v7977_v20 = vpop.f32.mrf.mxu2 }
 0x20e   : > { %v7979_v38 = vpop.f32.mrf.mxu3 }
 0x20f   : > { %v1467_v43 = vpop.f32.mrf.mxu0 }
 0x210   : > { %v1468_v40 = vadd.f32 %v1467_v43, %v7852_v19  ;;  %v1511_v22 = vpop.f32.mrf.mxu1  ;;  %v8022_v43 = vperm.slane %v7849_v16, 2  ;;  %v5270_v16 = vld [vmem:[%s9325_s3 + $0x1b0] sm:$0xf0] }
 0x212   : > { %v7988_v25 = vadd.f32 %v1511_v22, %v1468_v40 }
 0x214   : > { %9358 = vst [vmem:[#allocation10_spill] sm:$0xff] %v7988_v25 }
 0x215   : > { %v1555_v54 = vpop.f32.mrf.mxu2 }
 0x216   : > { %v1556_v55 = vadd.f32 %v1555_v54, %v7860_v30  ;;  %v1599_v61 = vpop.f32.mrf.mxu3  ;;  %v5273_v54 = vor.u32 %v6599_v35, %v5270_v16 }
 0x217   : > { %v8009_v32 = vpop.f32.mrf.mxu0 }
 0x218   : > { %v8011_v17 = vadd.f32 %v1599_v61, %v1556_v55  ;;  %v8013_v1 = vpop.f32.mrf.mxu1  ;;  %2324 = vmatpush.bf16.msrb.mxu3 %v5273_v54 }
 0x219   : > { %9360 = vst [vmem:[#allocation8_spill] sm:$0xff] %v8013_v1 }
 0x21a   : > { %9359 = vst [vmem:[#allocation11_spill] sm:$0xff] %v8011_v17  ;;  %v5076_v17 = vld [vmem:[%s9325_s3 + $0x20] sm:$0xf] }
 0x21d   : > { %v8024_v40 = vpop.f32.mrf.mxu2 }
 0x21e   : > { %9361 = vst [vmem:[#allocation9_spill] sm:$0xff] %v8024_v40  ;;  %v8026_v22 = vpop.f32.mrf.mxu3  ;;  %v6549_v40 = vld [vmem:[%s9325_s3 + $0xc] sm:$0xf0] }
 0x21f   : > { %9362 = vst [vmem:[#allocation12_spill] sm:$0xff] %v8026_v22  ;;  %v1613_v0 = vpop.f32.mrf.mxu0 }
 0x220   : > { %v1614_v6 = vadd.f32 %v1613_v0, %v8022_v43  ;;  %v1657_v51 = vpop.f32.mrf.mxu1 }
 0x222   : > { %v8038_v28 = vadd.f32 %v1657_v51, %v1614_v6  ;;  %v5140_v6 = vld [vmem:[%s9325_s3 + $0xa0] sm:$0xf]  ;;  %v6569_v51 = vld [vmem:[%s9325_s3 + $0xac] sm:$0xf0] }
 0x223   : > { %v5141_v52 = vor.u32 %v6569_v51, %v5140_v6  ;;  %v6595_v51 = vld [vmem:[%s9325_s3 + $0x184] sm:$0xf] }
 0x225   : > { %v1701_v55 = vpop.f32.mrf.mxu2  ;;  %2240 = vmatpush.bf16.msrb.mxu0 %v5141_v52  ;;  %v5257_v52 = vor.u32 %v6595_v51, %v5254_v53  ;;  %v6559_v51 = vld [vmem:[%s9325_s3 + $0x64] sm:$0xf]  ;;  %v5110_v53 = vld [vmem:[%s9325_s3 + $0x70] sm:$0xf0] }
 0x226   : > { %v1702_v61 = vadd.f32 %v1701_v55, %v8036_v29  ;;  %v1745_v27 = vpop.f32.mrf.mxu3  ;;  %v6563_v55 = vld [vmem:[%s9325_s3 + $0x84] sm:$0xf] }
 0x227   : > { %v8053_v59 = vpop.f32.mrf.mxu0  ;;  %2325 = vmatpush.bf16.msrb.mxu3 %v5257_v52  ;;  %v5108_v52 = vld [vmem:[%s9325_s3 + $0x60] sm:$0xf] }
 0x228   : > { %v8055_v37 = vadd.f32 %v1745_v27, %v1702_v61  ;;  %v8057_v0 = vpop.f32.mrf.mxu1  ;;  %v5126_v61 = vld [vmem:[%s9325_s3 + $0x90] sm:$0xf0] }
 0x229   : > { %v5129_v27 = vor.u32 %v6563_v55, %v5126_v61 }
 0x22b   : > { %2297 = vmatpush.bf16.msrb.mxu2 %v5129_v27 }
 0x22d   : > { %v8071_v57 = vpop.f32.mrf.mxu2 }
 0x22e   : > { %v8073_v35 = vpop.f32.mrf.mxu3 }
 0x22f   : > { %v1618_v14 = vpop.f32.mrf.mxu0 }
 0x230   : > { %v1619_v16 = vadd.f32 %v1618_v14, %v8022_v43  ;;  %v1662_v54 = vpop.f32.mrf.mxu1 }
 0x232   : > { %v8082_v6 = vadd.f32 %v1662_v54, %v1619_v16  ;;  %v5124_v16 = vld [vmem:[%s9325_s3 + $0x80] sm:$0xf]  ;;  %v6565_v54 = vld [vmem:[%s9325_s3 + $0x8c] sm:$0xf0] }
 0x233   : > { %v5125_v27 = vor.u32 %v6565_v54, %v5124_v16  ;;  %v5252_v16 = vld [vmem:[%s9325_s3 + $0x180] sm:$0xf]  ;;  %v6597_v54 = vld [vmem:[%s9325_s3 + $0x18c] sm:$0xf0] }
 0x234   : > { %v5253_v39 = vor.u32 %v6597_v54, %v5252_v16  ;;  %v6591_v54 = vld [vmem:[%s9325_s3 + $0x164] sm:$0xf] }
 0x235   : > { %v1706_v3 = vpop.f32.mrf.mxu2  ;;  %2241 = vmatpush.bf16.msrb.mxu0 %v5125_v27 }
 0x236   : > { %v1707_v26 = vadd.f32 %v1706_v3, %v8036_v29  ;;  %v1750_v14 = vpop.f32.mrf.mxu3  ;;  %v5113_v3 = vor.u32 %v6559_v51, %v5110_v53  ;;  %v5092_v53 = vld [vmem:[%s9325_s3 + $0x40] sm:$0xf]  ;;  %2269 = vmatpush.bf16.msrb.mxu1 %v5253_v39  ;;  %v6593_v39 = vld [vmem:[%s9325_s3 + $0x16c] sm:$0xf0] }
 0x237   : > { %v8091_v49 = vpop.f32.mrf.mxu0  ;;  %v5093_v16 = vor.u32 %v6557_v44, %v5092_v53 }
 0x238   : > { %v8099_v55 = vadd.f32 %v1750_v14, %v1707_v26  ;;  %v8101_v61 = vpop.f32.mrf.mxu1  ;;  %v6561_v26 = vld [vmem:[%s9325_s3 + $0x6c] sm:$0xf0]  ;;  %2298 = vmatpush.bf16.msrb.mxu2 %v5113_v3  ;;  %v5094_v3 = vld [vmem:[%s9325_s3 + $0x50] sm:$0xf0] }
 0x239   : > { %v5109_v27 = vor.u32 %v6561_v26, %v5108_v52  ;;  %v5097_v22 = vor.u32 %v6555_v45, %v5094_v3  ;;  %v6553_v45 = vld [vmem:[%s9325_s3 + $0x2c] sm:$0xf0] }
 0x23b   : > { %2242 = vmatpush.bf16.msrb.mxu0 %v5109_v27  ;;  %v5238_v27 = vld [vmem:[%s9325_s3 + $0x170] sm:$0xf0] }
 0x23c   : > { %v5241_v44 = vor.u32 %v6591_v54, %v5238_v27  ;;  %2299 = vmatpush.bf16.msrb.mxu2 %v5097_v22  ;;  %v5220_v54 = vld [vmem:[%s9325_s3 + $0x140] sm:$0xf]  ;;  %v6589_v27 = vld [vmem:[%s9325_s3 + $0x14c] sm:$0xf0] }
 0x23d   : > { %v8115_v14 = vpop.f32.mrf.mxu2 }
 0x23e   : > { %v8123_v18 = vpop.f32.mrf.mxu3  ;;  %2326 = vmatpush.bf16.msrb.mxu3 %v5241_v44 }
 0x23f   : > { %v1623_v51 = vpop.f32.mrf.mxu0  ;;  %2243 = vmatpush.bf16.msrb.mxu0 %v5093_v16  ;;  %v5078_v16 = vld [vmem:[%s9325_s3 + $0x30] sm:$0xf0] }
 0x240   : > { %v1624_v52 = vadd.f32 %v1623_v51, %v8022_v43  ;;  %v1667_v26 = vpop.f32.mrf.mxu1  ;;  %v5236_v51 = vld [vmem:[%s9325_s3 + $0x160] sm:$0xf] }
 0x241   : > { %v5237_v53 = vor.u32 %v6593_v39, %v5236_v51  ;;  %v6587_v51 = vld [vmem:[%s9325_s3 + $0x144] sm:$0xf]  ;;  %v5221_v39 = vor.u32 %v6589_v27, %v5220_v54 }
 0x242   : > { %v8147_v48 = vadd.f32 %v1667_v26, %v1624_v52  ;;  %v6551_v52 = vld [vmem:[%s9325_s3 + $0x24] sm:$0xf]  ;;  %v5077_v26 = vor.u32 %v6553_v45, %v5076_v17 }
 0x243   : > { %2270 = vmatpush.bf16.msrb.mxu1 %v5237_v53  ;;  %v5081_v3 = vor.u32 %v6551_v52, %v5078_v16  ;;  %v5222_v53 = vld [vmem:[%s9325_s3 + $0x150] sm:$0xf0]  ;;  %v5060_v16 = vld [vmem:[%s9325_s3] sm:$0xf] }
 0x244   : > { %2244 = vmatpush.bf16.msrb.mxu0 %v5077_v26  ;;  %v5225_v52 = vor.u32 %v6587_v51, %v5222_v53  ;;  %v5061_v1 = vor.u32 %v6549_v40, %v5060_v16  ;;  %v5062_v26 = vld [vmem:[%s9325_s3 + $0x10] sm:$0xf0]  ;;  %v5204_v51 = vld [vmem:[%s9325_s3 + $0x120] sm:$0xf]  ;;  %v6585_v53 = vld [vmem:[%s9325_s3 + $0x12c] sm:$0xf0] }
 0x245   : > { %v1711_v22 = vpop.f32.mrf.mxu2  ;;  %2300 = vmatpush.bf16.msrb.mxu2 %v5081_v3  ;;  %v5205_v40 = vor.u32 %v6585_v53, %v5204_v51  ;;  %v5188_v16 = vld [vmem:[%s9325_s3 + $0x100] sm:$0xf] }
 0x246   : > { %v1712_v17 = vadd.f32 %v1711_v22, %v8036_v29  ;;  %v1755_v44 = vpop.f32.mrf.mxu3  ;;  %v6547_v22 = vld [vmem:[%s9325_s3 + $0x4] sm:$0xf]  ;;  %2327 = vmatpush.bf16.msrb.mxu3 %v5225_v52 }
 0x247   : > { %v8177_v45 = vpop.f32.mrf.mxu0  ;;  %2271 = vmatpush.bf16.msrb.mxu1 %v5221_v39  ;;  %v5065_v3 = vor.u32 %v6547_v22, %v5062_v26  ;;  %v6581_v22 = vld [vmem:[%s9325_s3 + $0x10c] sm:$0xf0]  ;;  %v6579_v26 = vld [vmem:[%s9325_s3 + $0x104] sm:$0xf] }
 0x248   : > { %v8188_v54 = vadd.f32 %v1755_v44, %v1712_v17  ;;  %v8190_v27 = vpop.f32.mrf.mxu1  ;;  %v6583_v17 = vld [vmem:[%s9325_s3 + $0x124] sm:$0xf]  ;;  %v5206_v44 = vld [vmem:[%s9325_s3 + $0x130] sm:$0xf0]  ;;  %2245 = vmatpush.bf16.msrb.mxu0 %v5061_v1  ;;  %v5189_v1 = vor.u32 %v6581_v22, %v5188_v16 }
 0x249   : > { %2301 = vmatpush.bf16.msrb.mxu2 %v5065_v3  ;;  %v5209_v39 = vor.u32 %v6583_v17, %v5206_v44  ;;  %v5190_v3 = vld [vmem:[%s9325_s3 + $0x110] sm:$0xf0] }
 0x24a   : > { %9363 = vst [vmem:[#allocation14_spill] sm:$0xff] %v8188_v54  ;;  %v5193_v17 = vor.u32 %v6579_v26, %v5190_v3 }
 0x24b   : > { %2272 = vmatpush.bf16.msrb.mxu1 %v5205_v40  ;;  %2328 = vmatpush.bf16.msrb.mxu3 %v5209_v39 }
 0x24d   : > { %v8207_v52 = vpop.f32.mrf.mxu2 }
 0x24e   : > { %9364 = vst [vmem:[#allocation13_spill] sm:$0xff] %v8207_v52  ;;  %v8218_v51 = vpop.f32.mrf.mxu3  ;;  %v1499_v52 = vadd.f32 %v7919_v8, %v1455_v31 }
 0x24f   : > { %9365 = vst [vmem:[#allocation15_spill] sm:$0xff] %v8218_v51  ;;  %v1628_v53 = vpop.f32.mrf.mxu0  ;;  %2273 = vmatpush.bf16.msrb.mxu1 %v5189_v1  ;;  %2329 = vmatpush.bf16.msrb.mxu3 %v5193_v17  ;;  %v1543_v1 = vadd.f32 %v7921_v41, %v7860_v30 }
 0x250   : > { %v1629_v40 = vadd.f32 %v1628_v53, %v8022_v43  ;;  %v1672_v44 = vpop.f32.mrf.mxu1  ;;  %v1780_v17 = vmax.f32 %v7855_v11, %v1499_v52 }
 0x252   : > { %v8224_v39 = vadd.f32 %v1672_v44, %v1629_v40  ;;  %v1616_v44 = vadd.f32 %v8053_v59, %v8022_v43  ;;  %v1704_v59 = vadd.f32 %v8071_v57, %v8036_v29 }
 0x254   : > { %v1660_v11 = vadd.f32 %v8057_v0, %v1616_v44 }
 0x255   : > { %v1716_v25 = vpop.f32.mrf.mxu2 }
 0x256   : > { %v1717_v51 = vadd.f32 %v1716_v25, %v8036_v29  ;;  %v1760_v16 = vpop.f32.mrf.mxu3  ;;  %v1587_v25 = vadd.f32 %v7923_v4, %v1543_v1  ;;  %v1460_v4 = vadd.f32 %v7935_v5, %v7852_v19  ;;  %v1748_v5 = vadd.f32 %v8073_v35, %v1704_v59  ;;  %v6578_v35 = vld [vmem:[%s9325_s3 + $0xf4] sm:$0xf0] }
 0x257   : > { %v1630_v22 = vpop.f32.mrf.mxu0 }
 0x258   : > { %v8230_v54 = vadd.f32 %v1760_v16, %v1717_v51  ;;  %v1631_v26 = vadd.f32 %v1630_v22, %v8022_v43  ;;  %v1674_v3 = vpop.f32.mrf.mxu1  ;;  %v1504_v0 = vadd.f32 %v7939_v7, %v1460_v4 }
 0x25a   : > { %9366 = vst [vmem:[#allocation16_spill] sm:$0xff] %v8230_v54  ;;  %v1675_v53 = vadd.f32 %v1674_v3, %v1631_v26  ;;  %v1781_v26 = vmax.f32 %v7865_v56, %v1587_v25 }
 0x25c   : > { %v1782_v10 = vmax.f32 %v8038_v28, %v1675_v53 }
 0x25d   : > { %v1718_v40 = vpop.f32.mrf.mxu2 }
 0x25e   : > { %v1808_v31 = vmax.f32 %v1780_v17, %v1782_v10  ;;  %v1719_v8 = vadd.f32 %v1718_v40, %v8036_v29  ;;  %v1762_v51 = vpop.f32.mrf.mxu3  ;;  %v9367_v17 = vmax.f32 %v7868_v15, %v7926_v58 }
 0x25f   : > { %v1633_v16 = vpop.f32.mrf.mxu0 }
 0x260   : > { %v1763_v22 = vadd.f32 %v1762_v51, %v1719_v8  ;;  %v1634_v54 = vadd.f32 %v1633_v16, %v8022_v43  ;;  %v1677_v41 = vpop.f32.mrf.mxu1  ;;  %v1822_v25 = vmax.f32 %v1808_v31, 0.0  ;;  %v6576_v31 = vld [vmem:[%s9325_s3 + $0xec] sm:$0xf] }
 0x262   : > { %v1783_v28 = vmax.f32 %v8055_v37, %v1763_v22  ;;  %v1678_v52 = vadd.f32 %v1677_v41, %v1634_v54  ;;  %v1548_v37 = vadd.f32 %v7943_v47, %v7860_v30  ;;  %v1788_v22 = vmax.f32 %v7874_v46, %v1504_v0  ;;  %v5180_v47 = vld [vmem:[%s9325_s3 + $0xe8] sm:$0xf] }
 0x263   : > { %v9368_v41 = vmax.f32 %v7871_v9, %v7937_v60 }
 0x264   : > { %v1809_v3 = vmax.f32 %v1781_v26, %v1783_v28  ;;  %v1786_v1 = vmax.f32 %v1660_v11, %v1678_v52  ;;  %v1592_v7 = vadd.f32 %v7945_v62, %v1548_v37  ;;  %v5181_v62 = vor.u32 %v6578_v35, %v5180_v47  ;;  %v5182_v11 = vld [vmem:[%s9325_s3 + $0xf8] sm:$0xf0]  ;;  %v6570_v47 = vld [vmem:[%s9325_s3 + $0xb4] sm:$0xf0]  ;;  %v6568_v35 = vld [vmem:[%s9325_s3 + $0xac] sm:$0xf] }
 0x265   : > { %v1721_v53 = vpop.f32.mrf.mxu2  ;;  %v1621_v28 = vadd.f32 %v8091_v49, %v8022_v43  ;;  %v5185_v4 = vor.u32 %v6576_v31, %v5182_v11  ;;  %v6574_v49 = vld [vmem:[%s9325_s3 + $0xd4] sm:$0xf0] }
 0x266   : > { %v1810_v10 = vmax.f32 %v9367_v17, %v1786_v1  ;;  %v1722_v56 = vadd.f32 %v1721_v53, %v8036_v29  ;;  %v1765_v40 = vpop.f32.mrf.mxu3  ;;  %v1823_v59 = vmax.f32 %v1809_v3, 0.0  ;;  %2350 = vmatpush.bf16.msra.mxu0 %v5181_v62  ;;  %v5164_v17 = vld [vmem:[%s9325_s3 + $0xc8] sm:$0xf]  ;;  %v6572_v3 = vld [vmem:[%s9325_s3 + $0xcc] sm:$0xf] }
 0x267   : > { %v1635_v54 = vpop.f32.mrf.mxu0  ;;  %2406 = vmatpush.bf16.msra.mxu2 %v5185_v4  ;;  %v6606_v4 = vld [vmem:[%s9325_s3 + $0x1d4] sm:$0xf0] }
 0x268   : > { %v1824_v57 = vmax.f32 %v1810_v10, 0.0  ;;  %v1766_v44 = vadd.f32 %v1765_v40, %v1722_v56  ;;  %v1636_v8 = vadd.f32 %v1635_v54, %v8022_v43  ;;  %v1679_v51 = vpop.f32.mrf.mxu1  ;;  %v1789_v10 = vmax.f32 %v7881_v23, %v1592_v7  ;;  %v5308_v23 = vld [vmem:[%s9325_s3 + $0x1e8] sm:$0xf] }
 0x269   : > { %v1465_v54 = vadd.f32 %v7963_v12, %v7852_v19 }
 0x26a   : > { %v8258_v16 = vpack.c.bf16 %v1824_v57, %v1822_v25  ;;  %v1787_v15 = vmax.f32 %v1748_v5, %v1766_v44  ;;  %v1680_v58 = vadd.f32 %v1679_v51, %v1636_v8  ;;  %v5166_v5 = vld [vmem:[%s9325_s3 + $0xd8] sm:$0xf0]  ;;  %v1665_v25 = vadd.f32 %v8101_v61, %v1621_v28  ;;  %v6610_v8 = vld [vmem:[%s9325_s3 + $0x1f4] sm:$0xf0]  ;;  %v6608_v51 = vld [vmem:[%s9325_s3 + $0x1ec] sm:$0xf] }
 0x26b   : > { %v5165_v57 = vor.u32 %v6574_v49, %v5164_v17  ;;  %v5169_v44 = vor.u32 %v6572_v3, %v5166_v5  ;;  %v5309_v12 = vor.u32 %v6610_v8, %v5308_v23  ;;  %v5310_v61 = vld [vmem:[%s9325_s3 + $0x1f8] sm:$0xf0]  ;;  %v8337_v62 = vadd.f32 %v7967_v24, %v1465_v54  ;;  %v6602_v8 = vld [vmem:[%s9325_s3 + $0x1b4] sm:$0xf0] }
 0x26c   : > { %v1811_v26 = vmax.f32 %v9368_v41, %v1787_v15  ;;  %v1790_v46 = vmax.f32 %v8082_v6, %v1680_v58  ;;  %2246 = vmatmul.bf16.vlgmr.msrb.gmra.mxu0 %v8258_v16  ;;  %2302 = vmatmul.bf16.vlgmr.msrb.gmra.mxu2 %v8258_v16  ;;  %v5313_v7 = vor.u32 %v6608_v51, %v5310_v61  ;;  %v5294_v17 = vld [vmem:[%s9325_s3 + $0x1d8] sm:$0xf0]  ;;  %v6600_v51 = vld [vmem:[%s9325_s3 + $0x1ac] sm:$0xf] }
 0x26d   : > { %v1723_v52 = vpop.f32.mrf.mxu2  ;;  %2351 = vmatpush.bf16.msra.mxu0 %v5165_v57  ;;  %2407 = vmatpush.bf16.msra.mxu2 %v5169_v44  ;;  %v9369_v24 = vmax.f32 %v7884_v2, %v7948_v36  ;;  %v1553_v49 = vadd.f32 %v7977_v20, %v7860_v30  ;;  %v5132_v2 = vld [vmem:[%s9325_s3 + $0x88] sm:$0xf]  ;;  %v6566_v36 = vld [vmem:[%s9325_s3 + $0x94] sm:$0xf0]  ;;  %v1450_v44 = vadd.f32 %v7897_v50, %v7852_v19 }
 0x26e   : > { %v1825_v1 = vmax.f32 %v1811_v26, 0.0  ;;  %v8282_v9 = vmax.f32 %v1788_v22, %v1790_v46  ;;  %v1724_v60 = vadd.f32 %v1723_v52, %v8036_v29  ;;  %v1767_v6 = vpop.f32.mrf.mxu3  ;;  %v1709_v22 = vadd.f32 %v8115_v14, %v8036_v29  ;;  %2378 = vmatpush.bf16.msra.mxu1 %v5309_v12  ;;  %v5150_v46 = vld [vmem:[%s9325_s3 + $0xb8] sm:$0xf0]  ;;  %2434 = vmatpush.bf16.msra.mxu3 %v5313_v7  ;;  %v5292_v52 = vld [vmem:[%s9325_s3 + $0x1c8] sm:$0xf] }
 0x26f   : > { %v1638_v53 = vpop.f32.mrf.mxu0  ;;  %v5153_v28 = vor.u32 %v6568_v35, %v5150_v46  ;;  %v5133_v54 = vor.u32 %v6566_v36, %v5132_v2  ;;  %v5276_v57 = vld [vmem:[%s9325_s3 + $0x1a8] sm:$0xf]  ;;  %v1796_v50 = vmax.f32 %v7890_v42, %v8337_v62  ;;  %v8391_v7 = vadd.f32 %v7979_v38, %v1553_v49  ;;  %v6562_v35 = vld [vmem:[%s9325_s3 + $0x74] sm:$0xf0]  ;;  %v5118_v46 = vld [vmem:[%s9325_s3 + $0x78] sm:$0xf0] }
 0x270   : > { %v8295_v56 = vpack.c.bf16 %v1825_v1, %v1823_v59  ;;  %v1768_v40 = vadd.f32 %v1767_v6, %v1724_v60  ;;  %v1639_v0 = vadd.f32 %v1638_v53, %v8022_v43  ;;  %v1682_v37 = vpop.f32.mrf.mxu1  ;;  %v1826_v31 = vmax.f32 %v8282_v9, 0.0  ;;  %v6604_v59 = vld [vmem:[%s9325_s3 + $0x1cc] sm:$0xf]  ;;  %v5260_v62 = vld [vmem:[%s9325_s3 + $0x188] sm:$0xf] }
 0x271   : > { %v5293_v53 = vor.u32 %v6606_v4, %v5292_v52  ;;  %v1753_v3 = vadd.f32 %v8123_v18, %v1709_v22  ;;  %2408 = vmatpush.bf16.msra.mxu2 %v5153_v28  ;;  %v5277_v22 = vor.u32 %v6602_v8, %v5276_v57  ;;  %v9370_v42 = vmax.f32 %v7887_v63, %v7965_v13  ;;  %v6598_v63 = vld [vmem:[%s9325_s3 + $0x194] sm:$0xf0]  ;;  %v6596_v52 = vld [vmem:[%s9325_s3 + $0x18c] sm:$0xf]  ;;  %v5262_v4 = vld [vmem:[%s9325_s3 + $0x198] sm:$0xf0] }
 0x272   : > { %v1791_v15 = vmax.f32 %v8099_v55, %v1768_v40  ;;  %v1683_v58 = vadd.f32 %v1682_v37, %v1639_v0  ;;  %2274 = vmatmul.bf16.vlgmr.msrb.gmra.mxu1 %v8295_v56  ;;  %2330 = vmatmul.bf16.vlgmr.msrb.gmra.mxu3 %v8295_v56  ;;  %v5148_v55 = vld [vmem:[%s9325_s3 + $0xa8] sm:$0xf]  ;;  %v5297_v40 = vor.u32 %v6604_v59, %v5294_v17  ;;  %v6564_v0 = vld [vmem:[%s9325_s3 + $0x8c] sm:$0xf]  ;;  %v5102_v2 = vld [vmem:[%s9325_s3 + $0x58] sm:$0xf0] }
 0x273   : > { %v5149_v26 = vor.u32 %v6570_v47, %v5148_v55  ;;  %2379 = vmatpush.bf16.msra.mxu1 %v5293_v53  ;;  %v5116_v47 = vld [vmem:[%s9325_s3 + $0x68] sm:$0xf]  ;;  %v5261_v28 = vor.u32 %v6598_v63, %v5260_v62  ;;  %v6558_v53 = vld [vmem:[%s9325_s3 + $0x54] sm:$0xf0]  ;;  %v6556_v17 = vld [vmem:[%s9325_s3 + $0x4c] sm:$0xf]  ;;  %v1494_v49 = vadd.f32 %v7901_v34, %v1450_v44  ;;  %v1797_v36 = vmax.f32 %v7899_v33, %v8391_v7 }
 0x274   : > { %v8331_v41 = vmax.f32 %v1789_v10, %v1791_v15  ;;  %v1794_v14 = vmax.f32 %v1665_v25, %v1683_v58  ;;  %v5134_v25 = vld [vmem:[%s9325_s3 + $0x98] sm:$0xf0]  ;;  %2435 = vmatpush.bf16.msra.mxu3 %v5297_v40  ;;  %v5100_v59 = vld [vmem:[%s9325_s3 + $0x48] sm:$0xf]  ;;  %v6554_v44 = vld [vmem:[%s9325_s3 + $0x34] sm:$0xf0] }
 0x275   : > { %v1726_v11 = vpop.f32.mrf.mxu2  ;;  %2352 = vmatpush.bf16.msra.mxu0 %v5149_v26  ;;  %v5137_v23 = vor.u32 %v6564_v0, %v5134_v25  ;;  %v5278_v15 = vld [vmem:[%s9325_s3 + $0x1b8] sm:$0xf0]  ;;  %v5117_v26 = vor.u32 %v6562_v35, %v5116_v47  ;;  %v5101_v40 = vor.u32 %v6558_v53, %v5100_v59  ;;  %v5244_v33 = vld [vmem:[%s9325_s3 + $0x168] sm:$0xf]  ;;  %v6550_v63 = vld [vmem:[%s9325_s3 + $0x14] sm:$0xf0] }
 0x276   : > { %v1827_v1 = vmax.f32 %v8331_v41, 0.0  ;;  %v1814_v9 = vmax.f32 %v9369_v24, %v1794_v14  ;;  %v1727_v60 = vadd.f32 %v1726_v11, %v8036_v29  ;;  %v1770_v6 = vpop.f32.mrf.mxu3  ;;  %v5281_v55 = vor.u32 %v6600_v51, %v5278_v15  ;;  %v6594_v41 = vld [vmem:[%s9325_s3 + $0x174] sm:$0xf0]  ;;  %v5084_v57 = vld [vmem:[%s9325_s3 + $0x28] sm:$0xf] }
 0x277   : > { %v1640_v10 = vpop.f32.mrf.mxu0  ;;  %2409 = vmatpush.bf16.msra.mxu2 %v5137_v23  ;;  %2380 = vmatpush.bf16.msra.mxu1 %v5277_v22  ;;  %v9372_v23 = vld [vmem:[#allocation13_spill] sm:$0xff]  ;;  %v5085_v15 = vor.u32 %v6554_v44, %v5084_v57  ;;  %v5228_v22 = vld [vmem:[%s9325_s3 + $0x148] sm:$0xf]  ;;  %v6582_v44 = vld [vmem:[%s9325_s3 + $0x114] sm:$0xf0] }
 0x278   : > { %v1828_v37 = vmax.f32 %v1814_v9, 0.0  ;;  %v1771_v20 = vadd.f32 %v1770_v6, %v1727_v60  ;;  %v1641_v18 = vadd.f32 %v1640_v10, %v8022_v43  ;;  %v1684_v5 = vpop.f32.mrf.mxu1  ;;  %2436 = vmatpush.bf16.msra.mxu3 %v5281_v55  ;;  %v5265_v6 = vor.u32 %v6596_v52, %v5262_v4  ;;  %v5068_v62 = vld [vmem:[%s9325_s3 + $0x8] sm:$0xf] }
 0x279   : > { %2353 = vmatpush.bf16.msra.mxu0 %v5133_v54  ;;  %v9371_v54 = vld [vmem:[#allocation14_spill] sm:$0xff]  ;;  %v1714_v8 = vadd.f32 %v9372_v23, %v8036_v29  ;;  %v6580_v23 = vld [vmem:[%s9325_s3 + $0x10c] sm:$0xf] }
 0x27a   : > { %v8386_v58 = vpack.c.bf16 %v1828_v37, %v1826_v31  ;;  %v1795_v12 = vmax.f32 %v1753_v3, %v1771_v20  ;;  %v1685_v61 = vadd.f32 %v1684_v5, %v1641_v18  ;;  %v6560_v31 = vld [vmem:[%s9325_s3 + $0x6c] sm:$0xf]  ;;  %v1538_v3 = vadd.f32 %v7903_v21, %v7860_v30 }
 0x27b   : > { %v5121_v11 = vor.u32 %v6560_v31, %v5118_v46  ;;  %v1470_v21 = vadd.f32 %v8009_v32, %v7852_v19  ;;  %2381 = vmatpush.bf16.msra.mxu1 %v5261_v28  ;;  %v5105_v5 = vor.u32 %v6556_v17, %v5102_v2  ;;  %v5245_v32 = vor.u32 %v6594_v41, %v5244_v33  ;;  %v6590_v31 = vld [vmem:[%s9325_s3 + $0x154] sm:$0xf0]  ;;  %v9375_v28 = vld [vmem:[#allocation8_spill] sm:$0xff]  ;;  %v5214_v2 = vld [vmem:[%s9325_s3 + $0x138] sm:$0xf0] }
 0x27c   : > { %v1815_v38 = vmax.f32 %v9370_v42, %v1795_v12  ;;  %v1798_v14 = vmax.f32 %v8147_v48, %v1685_v61  ;;  %2251 = vmatmul.bf16.gmra.mxu0 %v8386_v58  ;;  %2307 = vmatmul.bf16.gmra.mxu2 %v8386_v58  ;;  %v1626_v48 = vadd.f32 %v8177_v45, %v8022_v43  ;;  %v6552_v12 = vld [vmem:[%s9325_s3 + $0x2c] sm:$0xf]  ;;  %v5086_v61 = vld [vmem:[%s9325_s3 + $0x38] sm:$0xf0] }
 0x27d   : > { %v1728_v13 = vpop.f32.mrf.mxu2  ;;  %2354 = vmatpush.bf16.msra.mxu0 %v5117_v26  ;;  %2410 = vmatpush.bf16.msra.mxu2 %v5121_v11  ;;  %v5089_v35 = vor.u32 %v6552_v12, %v5086_v61  ;;  %v6588_v42 = vld [vmem:[%s9325_s3 + $0x14c] sm:$0xf]  ;;  %v5229_v26 = vor.u32 %v6590_v31, %v5228_v22  ;;  %v1514_v52 = vadd.f32 %v9375_v28, %v1470_v21  ;;  %v9377_v21 = vld [vmem:[#allocation9_spill] sm:$0xff]  ;;  %v5198_v61 = vld [vmem:[%s9325_s3 + $0x118] sm:$0xf0] }
 0x27e   : > { %v1829_v24 = vmax.f32 %v1815_v38, 0.0  ;;  %v8428_v9 = vmax.f32 %v1796_v50, %v1798_v14  ;;  %v1729_v45 = vadd.f32 %v1728_v13, %v8036_v29  ;;  %v1772_v60 = vpop.f32.mrf.mxu3  ;;  %v1670_v18 = vadd.f32 %v8190_v27, %v1626_v48  ;;  %2437 = vmatpush.bf16.msra.mxu3 %v5265_v6  ;;  %v5246_v27 = vld [vmem:[%s9325_s3 + $0x178] sm:$0xf0]  ;;  %v6548_v48 = vld [vmem:[%s9325_s3 + $0xc] sm:$0xf]  ;;  %v9376_v6 = vld [vmem:[#allocation15_spill] sm:$0xff] }
 0x27f   : > { %v1643_v10 = vpop.f32.mrf.mxu0  ;;  %v9373_v50 = vld [vmem:[#allocation10_spill] sm:$0xff]  ;;  %2382 = vmatpush.bf16.msra.mxu1 %v5245_v32  ;;  %v1758_v53 = vadd.f32 %v9376_v6, %v1714_v8  ;;  %v9380_v8 = vld [vmem:[#allocation12_spill] sm:$0xff]  ;;  %v6611_v6 = vld [vmem:[%s9326_s4] sm:$0xff] }
 0x280   : > { %v8447_v0 = vpack.c.bf16 %v1829_v24, %v1827_v1  ;;  %v1773_v37 = vadd.f32 %v1772_v60, %v1729_v45  ;;  %v1644_v34 = vadd.f32 %v1643_v10, %v8022_v43  ;;  %v1687_v20 = vpop.f32.mrf.mxu1  ;;  %v6592_v1 = vld [vmem:[%s9325_s3 + $0x16c] sm:$0xf]  ;;  %v1800_v7 = vmax.f32 %v1494_v49, %v9373_v50  ;;  %v5230_v38 = vld [vmem:[%s9325_s3 + $0x158] sm:$0xf0]  ;;  %v5212_v60 = vld [vmem:[%s9325_s3 + $0x128] sm:$0xf] }
 0x281   : > { %2355 = vmatpush.bf16.msra.mxu0 %v5101_v40  ;;  %2411 = vmatpush.bf16.msra.mxu2 %v5105_v5  ;;  %v5249_v51 = vor.u32 %v6592_v1, %v5246_v27  ;;  %v5233_v46 = vor.u32 %v6588_v42, %v5230_v38  ;;  %v9374_v13 = vld [vmem:[#allocation6_spill] sm:$0xff]  ;;  %v5069_v49 = vor.u32 %v6550_v63, %v5068_v62  ;;  %v6584_v40 = vld [vmem:[%s9325_s3 + $0x12c] sm:$0xf]  ;;  %v9378_v1 = vld [vmem:[#allocation11_spill] sm:$0xff] }
 0x282   : > { %v1799_v25 = vmax.f32 %v9371_v54, %v1773_v37  ;;  %v1688_v19 = vadd.f32 %v1687_v20, %v1644_v34  ;;  %2279 = vmatmul.bf16.gmra.mxu1 %v8447_v0  ;;  %2335 = vmatmul.bf16.gmra.mxu3 %v8447_v0  ;;  %v1582_v11 = vadd.f32 %v9374_v13, %v1538_v3  ;;  %v5070_v45 = vld [vmem:[%s9325_s3 + $0x18] sm:$0xf0]  ;;  %v6586_v10 = vld [vmem:[%s9325_s3 + $0x134] sm:$0xf0]  ;;  %v6617_v13 = vld [vmem:[%s9326_s4 + $0x30] sm:$0xff] }
 0x283   : > { %2438 = vmatpush.bf16.msra.mxu3 %v5249_v51  ;;  %v5073_v3 = vor.u32 %v6548_v48, %v5070_v45  ;;  %2383 = vmatpush.bf16.msra.mxu1 %v5229_v26  ;;  %v5213_v33 = vor.u32 %v6586_v10, %v5212_v60  ;;  %v5217_v41 = vor.u32 %v6584_v40, %v5214_v2  ;;  %v6618_v48 = vld [vmem:[%s9326_s4 + $0x38] sm:$0xff]  ;;  %v6616_v28 = vld [vmem:[%s9326_s4 + $0x28] sm:$0xff]  ;;  %v6643_v10 = vld [vmem:[%s9326_s4 + $0x100] sm:$0xff] }
 0x284   : > { %v8486_v55 = vmax.f32 %v1797_v36, %v1799_v25  ;;  %v1802_v47 = vmax.f32 %v1670_v18, %v1688_v19  ;;  %v1830_v36 = vmax.f32 %v8428_v9, 0.0  ;;  %v1558_v18 = vadd.f32 %v9377_v21, %v7860_v30  ;;  %v9379_v9 = vld [vmem:[#allocation5_spill] sm:$0xff]  ;;  %v5196_v30 = vld [vmem:[%s9325_s3 + $0x108] sm:$0xf]  ;;  %v6619_v2 = vld [vmem:[%s9326_s4 + $0x40] sm:$0xff] }
 0x285   : > { %v1731_v14 = vpop.f32.mrf.mxu2  ;;  %2356 = vmatpush.bf16.msra.mxu0 %v5085_v15  ;;  %2412 = vmatpush.bf16.msra.mxu2 %v5089_v35  ;;  %v1801_v54 = vmax.f32 %v1582_v11, %v9378_v1  ;;  %v1804_v27 = vmax.f32 %v9379_v9, %v1514_v52  ;;  %v5197_v12 = vor.u32 %v6582_v44, %v5196_v30  ;;  %v6615_v52 = vld [vmem:[%s9326_s4 + $0x20] sm:$0xff]  ;;  %v6612_v45 = vld [vmem:[%s9326_s4 + $0x8] sm:$0xff]  ;;  %v6649_v1 = vld [vmem:[%s9326_s4 + $0x130] sm:$0xff] }
 0x286   : > { %v1818_v4 = vmax.f32 %v1800_v7, %v1802_v47  ;;  %v1732_v59 = vadd.f32 %v1731_v14, %v8036_v29  ;;  %v1775_v24 = vpop.f32.mrf.mxu3  ;;  %v1602_v51 = vadd.f32 %v9380_v8, %v1558_v18  ;;  %v5201_v47 = vor.u32 %v6580_v23, %v5198_v61  ;;  %v9382_v14 = vld [vmem:[#allocation16_spill] sm:$0xff]  ;;  %v6639_v18 = vld [vmem:[%s9326_s4 + $0xe0] sm:$0xff]  ;;  %v6630_v44 = vld [vmem:[%s9326_s4 + $0x98] sm:$0xff] }
 0x287   : > { %v1645_v17 = vpop.f32.mrf.mxu0  ;;  %2439 = vmatpush.bf16.msra.mxu3 %v5233_v46  ;;  %2384 = vmatpush.bf16.msra.mxu1 %v5213_v33  ;;  %v6624_v60 = vld [vmem:[%s9326_s4 + $0x68] sm:$0xff]  ;;  %v6650_v33 = vld [vmem:[%s9326_s4 + $0x138] sm:$0xff]  ;;  %v6647_v9 = vld [vmem:[%s9326_s4 + $0x120] sm:$0xff] }
 0x288   : > { %v1832_v37 = vmax.f32 %v1818_v4, 0.0  ;;  %v1776_v34 = vadd.f32 %v1775_v24, %v1732_v59  ;;  %v1646_v20 = vadd.f32 %v1645_v17, %v8022_v43  ;;  %v1689_v5 = vpop.f32.mrf.mxu1  ;;  %v6614_v4 = vld [vmem:[%s9326_s4 + $0x18] sm:$0xff]  ;;  %v6613_v24 = vld [vmem:[%s9326_s4 + $0x10] sm:$0xff]  ;;  %v6620_v40 = vld [vmem:[%s9326_s4 + $0x48] sm:$0xff] }
 0x289   : > { %2357 = vmatpush.bf16.msra.mxu0 %v5069_v49  ;;  %2413 = vmatpush.bf16.msra.mxu2 %v5073_v3  ;;  %v6626_v59 = vld [vmem:[%s9326_s4 + $0x78] sm:$0xff]  ;;  %v6645_v17 = vld [vmem:[%s9326_s4 + $0x110] sm:$0xff]  ;;  %v6644_v3 = vld [vmem:[%s9326_s4 + $0x108] sm:$0xff] }
 0x28a   : > { %v8530_v25 = vpack.c.bf16 %v1832_v37, %v1830_v36  ;;  %v1803_v19 = vmax.f32 %v1758_v53, %v1776_v34  ;;  %v1690_v32 = vadd.f32 %v1689_v5, %v1646_v20  ;;  %v6623_v53 = vld [vmem:[%s9326_s4 + $0x60] sm:$0xff]  ;;  %v6622_v49 = vld [vmem:[%s9326_s4 + $0x58] sm:$0xff]  ;;  %v6641_v37 = vld [vmem:[%s9326_s4 + $0xf0] sm:$0xff] }
 0x28b   : > { %2440 = vmatpush.bf16.msra.mxu3 %v5217_v41  ;;  %2385 = vmatpush.bf16.msra.mxu1 %v5197_v12  ;;  %v6654_v36 = vld [vmem:[%s9326_s4 + $0x158] sm:$0xff]  ;;  %v6653_v34 = vld [vmem:[%s9326_s4 + $0x150] sm:$0xff]  ;;  %v6640_v20 = vld [vmem:[%s9326_s4 + $0xe8] sm:$0xff] }
 0x28c   : > { %v1819_v57 = vmax.f32 %v1801_v54, %v1803_v19  ;;  %v1806_v43 = vmax.f32 %v8224_v39, %v1690_v32  ;;  %2256 = vmatmul.bf16.gmra.mxu0 %v8530_v25  ;;  %2312 = vmatmul.bf16.gmra.mxu2 %v8530_v25  ;;  %v1831_v39 = vmax.f32 %v8486_v55, 0.0  ;;  %v9381_v55 = vld [vmem:[#allocation7_spill] sm:$0xff]  ;;  %v6652_v21 = vld [vmem:[%s9326_s4 + $0x148] sm:$0xff]  ;;  %v6634_v41 = vld [vmem:[%s9326_s4 + $0xb8] sm:$0xff] }
 0x28d   : > { %v1733_v15 = vpop.f32.mrf.mxu2  ;;  %v1805_v38 = vmax.f32 %v9381_v55, %v1602_v51  ;;  %2727 = vmatpush.bf16.msrb.mxu0 %v6618_v48  ;;  %v6651_v5 = vld [vmem:[%s9326_s4 + $0x140] sm:$0xff]  ;;  %2753 = vmatpush.bf16.msrb.mxu2 %v6634_v41  ;;  %v6633_v54 = vld [vmem:[%s9326_s4 + $0xb0] sm:$0xff]  ;;  %v6632_v19 = vld [vmem:[%s9326_s4 + $0xa8] sm:$0xff] }
 0x28e   : > { %v1833_v22 = vmax.f32 %v1819_v57, 0.0  ;;  %v1820_v50 = vmax.f32 %v1804_v27, %v1806_v43  ;;  %v1734_v7 = vadd.f32 %v1733_v15, %v8036_v29  ;;  %v1777_v35 = vpop.f32.mrf.mxu3  ;;  %v8686_v32 = vld [vmem:[%s9328_s6] sm:$0xf]  ;;  %v6629_v61 = vld [vmem:[%s9326_s4 + $0x90] sm:$0xff]  ;;  %v6680_v48 = vld [vmem:[%s9326_s4 + $0x228] sm:$0xff] }
 0x28f   : > { %2441 = vmatpush.bf16.msra.mxu3 %v5201_v47  ;;  %2740 = vmatpush.bf16.msrb.mxu1 %v6626_v59  ;;  %v8692_v57 = vperm.slane %v8686_v32, 0  ;;  %v6631_v43 = vld [vmem:[%s9326_s4 + $0xa0] sm:$0xff] }
 0x290   : > { %v8551_v31 = vpack.c.bf16 %v1833_v22, %v1831_v39  ;;  %v1778_v42 = vadd.f32 %v1777_v35, %v1734_v7  ;;  %v1834_v62 = vmax.f32 %v1820_v50, 0.0  ;;  %v8702_v39 = vperm.slane %v8686_v32, 1  ;;  %v6682_v22 = vld [vmem:[%s9326_s4 + $0x238] sm:$0xff] }
 0x291   : > { %2728 = vmatpush.bf16.msrb.mxu0 %v6617_v13  ;;  %2754 = vmatpush.bf16.msrb.mxu2 %v6633_v54  ;;  %v6662_v13 = vld [vmem:[%s9326_s4 + $0x198] sm:$0xff] }
 0x292   : > { %v1807_v26 = vmax.f32 %v9382_v14, %v1778_v42  ;;  %2284 = vmatmul.bf16.gmra.mxu1 %v8551_v31  ;;  %2340 = vmatmul.bf16.gmra.mxu3 %v8551_v31  ;;  %v8557_v63 = vpack.c.bf16 %v1834_v62, %v1834_v62 }
 0x294   : > { %v1821_v46 = vmax.f32 %v1805_v38, %v1807_v26  ;;  %v6681_v38 = vld [vmem:[%s9326_s4 + $0x230] sm:$0xff] }
 0x295   : > { %2729 = vmatpush.bf16.msrb.mxu0 %v6616_v28  ;;  %2755 = vmatpush.bf16.msrb.mxu2 %v6632_v19  ;;  %v6686_v19 = vld [vmem:[%s9326_s4 + $0x258] sm:$0xff] }
 0x296   : > { %v1835_v29 = vmax.f32 %v1821_v46, 0.0 }
 0x298   : > { %v8567_v11 = vpack.c.bf16 %v1835_v29, %v1835_v29  ;;  %v6627_v29 = vld [vmem:[%s9326_s4 + $0x80] sm:$0xff] }
 0x299   : > { %2730 = vmatpush.bf16.msrb.mxu0 %v6615_v52  ;;  %2756 = vmatpush.bf16.msrb.mxu2 %v6631_v43 }
 0x29c   : > { %2261 = vmatmul.bf16.gmra.mxu0 %v8557_v63  ;;  %2317 = vmatmul.bf16.gmra.mxu2 %v8557_v63 }
 0x29d   : > { %2731 = vmatpush.bf16.msrb.mxu0 %v6614_v4  ;;  %2757 = vmatpush.bf16.msrb.mxu2 %v6630_v44  ;;  %v6666_v44 = vld [vmem:[%s9326_s4 + $0x1b8] sm:$0xff] }
 0x2a1   : > { %2732 = vmatpush.bf16.msrb.mxu0 %v6613_v24  ;;  %2758 = vmatpush.bf16.msrb.mxu2 %v6629_v61  ;;  %v6679_v24 = vld [vmem:[%s9326_s4 + $0x220] sm:$0xff] }
 0x2a2   : > { %2289 = vmatmul.bf16.gmra.mxu1 %v8567_v11  ;;  %2345 = vmatmul.bf16.gmra.mxu3 %v8567_v11 }
 0x2a5   : > { %2733 = vmatpush.bf16.msrb.mxu0 %v6612_v45  ;;  %v6689_v45 = vld [vmem:[%s9326_s4 + $0x270] sm:$0xff] }
 0x2a9   : > { %2734 = vmatpush.bf16.msrb.mxu0 %v6611_v6 }
 0x2ac   : > { %2358 = vmatmul.bf16.vlgmr.msra.gmra.mxu0 %v8258_v16  ;;  %2414 = vmatmul.bf16.vlgmr.msra.gmra.mxu2 %v8258_v16  ;;  %v6625_v16 = vld [vmem:[%s9326_s4 + $0x70] sm:$0xff] }
 0x2ad   : > { %2741 = vmatpush.bf16.msrb.mxu1 %v6625_v16  ;;  %v6661_v16 = vld [vmem:[%s9326_s4 + $0x190] sm:$0xff] }
 0x2b1   : > { %2742 = vmatpush.bf16.msrb.mxu1 %v6624_v60 }
 0x2b2   : > { %2386 = vmatmul.bf16.vlgmr.msra.gmra.mxu1 %v8295_v56  ;;  %2442 = vmatmul.bf16.vlgmr.msra.gmra.mxu3 %v8295_v56  ;;  %v6646_v56 = vld [vmem:[%s9326_s4 + $0x118] sm:$0xff] }
 0x2b3   : > { %3012 = vmatpush.bf16.msra.mxu0 %v6646_v56 }
 0x2b5   : > { %2743 = vmatpush.bf16.msrb.mxu1 %v6623_v53 }
 0x2b7   : > { %3013 = vmatpush.bf16.msra.mxu0 %v6645_v17  ;;  %v6638_v17 = vld [vmem:[%s9326_s4 + $0xd8] sm:$0xff] }
 0x2b8   : > { %2770 = vmatpush.bf16.msrb.mxu3 %v6638_v17 }
 0x2b9   : > { %2744 = vmatpush.bf16.msrb.mxu1 %v6622_v49 }
 0x2bb   : > { %3014 = vmatpush.bf16.msra.mxu0 %v6644_v3  ;;  %v6678_v3 = vld [vmem:[%s9326_s4 + $0x218] sm:$0xff] }
 0x2bc   : > { %2363 = vmatmul.bf16.gmra.mxu0 %v8386_v58  ;;  %2419 = vmatmul.bf16.gmra.mxu2 %v8386_v58  ;;  %v6621_v58 = vld [vmem:[%s9326_s4 + $0x50] sm:$0xff] }
 0x2bd   : > { %2745 = vmatpush.bf16.msrb.mxu1 %v6621_v58  ;;  %v6660_v58 = vld [vmem:[%s9326_s4 + $0x188] sm:$0xff] }
 0x2bf   : > { %3015 = vmatpush.bf16.msra.mxu0 %v6643_v10  ;;  %v6688_v10 = vld [vmem:[%s9326_s4 + $0x268] sm:$0xff] }
 0x2c1   : > { %2746 = vmatpush.bf16.msrb.mxu1 %v6620_v40 }
 0x2c2   : > { %2391 = vmatmul.bf16.gmra.mxu1 %v8447_v0  ;;  %2447 = vmatmul.bf16.gmra.mxu3 %v8447_v0  ;;  %v6642_v0 = vld [vmem:[%s9326_s4 + $0xf8] sm:$0xff] }
 0x2c3   : > { %3016 = vmatpush.bf16.msra.mxu0 %v6642_v0 }
 0x2c5   : > { %2747 = vmatpush.bf16.msrb.mxu1 %v6619_v2  ;;  %v6637_v2 = vld [vmem:[%s9326_s4 + $0xd0] sm:$0xff] }
 0x2c6   : > { %2771 = vmatpush.bf16.msrb.mxu3 %v6637_v2 }
 0x2c7   : > { %3017 = vmatpush.bf16.msra.mxu0 %v6641_v37 }
 0x2c9   : > { %3025 = vmatpush.bf16.msra.mxu1 %v6654_v36 }
 0x2cb   : > { %3018 = vmatpush.bf16.msra.mxu0 %v6640_v20  ;;  %v6677_v20 = vld [vmem:[%s9326_s4 + $0x210] sm:$0xff] }
 0x2cc   : > { %2368 = vmatmul.bf16.gmra.mxu0 %v8530_v25  ;;  %2424 = vmatmul.bf16.gmra.mxu2 %v8530_v25  ;;  %v6648_v25 = vld [vmem:[%s9326_s4 + $0x128] sm:$0xff] }
 0x2cd   : > { %3026 = vmatpush.bf16.msra.mxu1 %v6653_v34 }
 0x2cf   : > { %3019 = vmatpush.bf16.msra.mxu0 %v6639_v18  ;;  %v6687_v18 = vld [vmem:[%s9326_s4 + $0x260] sm:$0xff] }
 0x2d1   : > { %3027 = vmatpush.bf16.msra.mxu1 %v6652_v21  ;;  %v6659_v21 = vld [vmem:[%s9326_s4 + $0x180] sm:$0xff] }
 0x2d2   : > { %2396 = vmatmul.bf16.gmra.mxu1 %v8551_v31  ;;  %2452 = vmatmul.bf16.gmra.mxu3 %v8551_v31  ;;  %v6628_v31 = vld [vmem:[%s9326_s4 + $0x88] sm:$0xff] }
 0x2d3   : > { %2759 = vmatpush.bf16.msrb.mxu2 %v6628_v31  ;;  %v6656_v31 = vld [vmem:[%s9326_s4 + $0x168] sm:$0xff] }
 0x2d5   : > { %3028 = vmatpush.bf16.msra.mxu1 %v6651_v5 }
 0x2d7   : > { %2760 = vmatpush.bf16.msrb.mxu2 %v6627_v29  ;;  %v6655_v29 = vld [vmem:[%s9326_s4 + $0x160] sm:$0xff] }
 0x2d9   : > { %3029 = vmatpush.bf16.msra.mxu1 %v6650_v33  ;;  %v6636_v33 = vld [vmem:[%s9326_s4 + $0xc8] sm:$0xff] }
 0x2da   : > { %2772 = vmatpush.bf16.msrb.mxu3 %v6636_v33  ;;  %v6711_v33 = vld [vmem:[%s9326_s4 + $0x320] sm:$0xff] }
 0x2db   : > { %3038 = vmatpush.bf16.msra.mxu2 %v6662_v13  ;;  %v6716_v13 = vld [vmem:[%s9326_s4 + $0x348] sm:$0xff] }
 0x2dc   : > { %2373 = vmatmul.bf16.gmra.mxu0 %v8557_v63  ;;  %2429 = vmatmul.bf16.gmra.mxu2 %v8557_v63 }
 0x2dd   : > { %3030 = vmatpush.bf16.msra.mxu1 %v6649_v1 }
 0x2df   : > { %3039 = vmatpush.bf16.msra.mxu2 %v6661_v16 }
 0x2e1   : > { %3031 = vmatpush.bf16.msra.mxu1 %v6648_v25  ;;  %v6658_v25 = vld [vmem:[%s9326_s4 + $0x178] sm:$0xff] }
 0x2e2   : > { %2401 = vmatmul.bf16.gmra.mxu1 %v8567_v11  ;;  %2457 = vmatmul.bf16.gmra.mxu3 %v8567_v11  ;;  %v6690_v11 = vld [vmem:[%s9326_s4 + $0x278] sm:$0xff] }
 0x2e3   : > { %3040 = vmatpush.bf16.msra.mxu2 %v6660_v58 }
 0x2e5   : > { %3032 = vmatpush.bf16.msra.mxu1 %v6647_v9  ;;  %v6676_v9 = vld [vmem:[%s9326_s4 + $0x208] sm:$0xff] }
 0x2e7   : > { %3041 = vmatpush.bf16.msra.mxu2 %v6659_v21  ;;  %v6712_v21 = vld [vmem:[%s9326_s4 + $0x328] sm:$0xff] }
 0x2e9   : > { %v2247_v27 = vpop.f32.mrf.mxu0 }
 0x2ea   : > { %v2248_v30 = vadd.f32 %v2247_v27, %v8692_v57 }
 0x2eb   : > { %3042 = vmatpush.bf16.msra.mxu2 %v6658_v25 }
 0x2ef   : > { %v2275_v23 = vpop.f32.mrf.mxu1  ;;  %v2303_v8 = vpop.f32.mrf.mxu2 }
 0x2f0   : > { %v2276_v51 = vadd.f32 %v2275_v23, %v2248_v30  ;;  %v2304_v7 = vadd.f32 %v2303_v8, %v8702_v39  ;;  %v6635_v30 = vld [vmem:[%s9326_s4 + $0xc0] sm:$0xff] }
 0x2f1   : > { %v2249_v15 = vpop.f32.mrf.mxu0  ;;  %2773 = vmatpush.bf16.msrb.mxu3 %v6635_v30 }
 0x2f2   : > { %v2462_v12 = vmax.f32 %v2276_v51, 0.0  ;;  %v2250_v46 = vadd.f32 %v2249_v15, %v8692_v57  ;;  %v6675_v51 = vld [vmem:[%s9326_s4 + $0x200] sm:$0xff]  ;;  %v6657_v15 = vld [vmem:[%s9326_s4 + $0x170] sm:$0xff] }
 0x2f3   : > { %3043 = vmatpush.bf16.msra.mxu2 %v6657_v15 }
 0x2f4   : > { %v2495_v50 = vpack.c.bf16 %v2462_v12, %v2462_v12  ;;  %v6685_v12 = vld [vmem:[%s9326_s4 + $0x250] sm:$0xff] }
 0x2f5   : > { %v2331_v47 = vpop.f32.mrf.mxu3  ;;  %3055 = vmatpush.bf16.msra.mxu3 %v6666_v44  ;;  %v6749_v44 = vld [vmem:[%s9326_s4 + $0x450] sm:$0xff] }
 0x2f6   : > { %v2332_v35 = vadd.f32 %v2331_v47, %v2304_v7  ;;  %2735 = vmatmul.bf16.vlgmr.msrb.gmra.mxu0 %v2495_v50  ;;  %v6718_v7 = vld [vmem:[%s9326_s4 + $0x358] sm:$0xff] }
 0x2f7   : > { %v2277_v42 = vpop.f32.mrf.mxu1  ;;  %v2305_v55 = vpop.f32.mrf.mxu2  ;;  %3310 = vmatpush.bf16.msrb.mxu0 %v6682_v22  ;;  %3044 = vmatpush.bf16.msra.mxu2 %v6656_v31 }
 0x2f8   : > { %v2463_v14 = vmax.f32 %v2332_v35, 0.0  ;;  %v2278_v28 = vadd.f32 %v2277_v42, %v2250_v46  ;;  %v2306_v6 = vadd.f32 %v2305_v55, %v8702_v39  ;;  %v6665_v35 = vld [vmem:[%s9326_s4 + $0x1b0] sm:$0xff]  ;;  %v6684_v42 = vld [vmem:[%s9326_s4 + $0x248] sm:$0xff] }
 0x2f9   : > { %v2252_v26 = vpop.f32.mrf.mxu0  ;;  %3056 = vmatpush.bf16.msra.mxu3 %v6665_v35  ;;  %v6664_v46 = vld [vmem:[%s9326_s4 + $0x1a8] sm:$0xff]  ;;  %v6693_v35 = vld [vmem:[%s9326_s4 + $0x290] sm:$0xff] }
 0x2fa   : > { %v2496_v62 = vpack.c.bf16 %v2463_v14, %v2463_v14  ;;  %v2253_v63 = vadd.f32 %v2252_v26, %v8692_v57  ;;  %v2466_v60 = vmax.f32 %v2278_v28, 0.0 }
 0x2fb   : > { %3311 = vmatpush.bf16.msrb.mxu0 %v6681_v38  ;;  %v6717_v38 = vld [vmem:[%s9326_s4 + $0x350] sm:$0xff]  ;;  %3045 = vmatpush.bf16.msra.mxu2 %v6655_v29  ;;  %v6692_v29 = vld [vmem:[%s9326_s4 + $0x288] sm:$0xff] }
 0x2fc   : > { %2748 = vmatmul.bf16.vlgmr.msrb.gmra.mxu1 %v2496_v62  ;;  %v2780_v40 = vpack.c.bf16 %v2466_v60, %v2466_v60 }
 0x2fd   : > { %v2333_v52 = vpop.f32.mrf.mxu3  ;;  %3323 = vmatpush.bf16.msrb.mxu1 %v6690_v11  ;;  %3057 = vmatpush.bf16.msra.mxu3 %v6664_v46  ;;  %v6722_v11 = vld [vmem:[%s9326_s4 + $0x378] sm:$0xff] }
 0x2fe   : > { %v2334_v49 = vadd.f32 %v2333_v52, %v2306_v6 }
 0x2ff   : > { %v2280_v4 = vpop.f32.mrf.mxu1  ;;  %v2308_v59 = vpop.f32.mrf.mxu2  ;;  %3312 = vmatpush.bf16.msrb.mxu0 %v6680_v48  ;;  %v6683_v48 = vld [vmem:[%s9326_s4 + $0x240] sm:$0xff] }
 0x300   : > { %v8741_v56 = vadd.f32 %v2280_v4, %v2253_v63  ;;  %v2467_v36 = vmax.f32 %v2334_v49, 0.0  ;;  %v2309_v1 = vadd.f32 %v2308_v59, %v8702_v39  ;;  %v6663_v4 = vld [vmem:[%s9326_s4 + $0x1a0] sm:$0xff]  ;;  %v6714_v49 = vld [vmem:[%s9326_s4 + $0x338] sm:$0xff] }
 0x301   : > { %v8743_v53 = vpop.f32.mrf.mxu0  ;;  %3324 = vmatpush.bf16.msrb.mxu1 %v6689_v45  ;;  %v6715_v59 = vld [vmem:[%s9326_s4 + $0x340] sm:$0xff]  ;;  %3058 = vmatpush.bf16.msra.mxu3 %v6663_v4 }
 0x302   : > { %v2781_v41 = vpack.c.bf16 %v2467_v36, %v2467_v36 }
 0x303   : > { %3313 = vmatpush.bf16.msrb.mxu0 %v6679_v24  ;;  %v6721_v24 = vld [vmem:[%s9326_s4 + $0x370] sm:$0xff] }
 0x305   : > { %v2336_v0 = vpop.f32.mrf.mxu3  ;;  %3325 = vmatpush.bf16.msrb.mxu1 %v6688_v10  ;;  %v6713_v10 = vld [vmem:[%s9326_s4 + $0x330] sm:$0xff] }
 0x306   : > { %3020 = vmatmul.bf16.vlgmr.msra.gmra.mxu0 %v2780_v40  ;;  %v2337_v27 = vadd.f32 %v2336_v0, %v2309_v1  ;;  %v6719_v40 = vld [vmem:[%s9326_s4 + $0x360] sm:$0xff]  ;;  %v6750_v1 = vld [vmem:[%s9326_s4 + $0x458] sm:$0xff] }
 0x307   : > { %v8760_v37 = vpop.f32.mrf.mxu1  ;;  %v8762_v34 = vpop.f32.mrf.mxu2  ;;  %3314 = vmatpush.bf16.msrb.mxu0 %v6678_v3  ;;  %v6720_v3 = vld [vmem:[%s9326_s4 + $0x368] sm:$0xff] }
 0x308   : > { %v2471_v61 = vmax.f32 %v2337_v27, 0.0  ;;  %v8888_v27 = vperm.slane %v8686_v32, 3 }
 0x309   : > { %v2257_v5 = vpop.f32.mrf.mxu0  ;;  %3326 = vmatpush.bf16.msrb.mxu1 %v6687_v18 }
 0x30a   : > { %v2258_v54 = vadd.f32 %v2257_v5, %v8692_v57  ;;  %v3066_v55 = vpack.c.bf16 %v2471_v61, %v2471_v61  ;;  %v8878_v5 = vperm.slane %v8686_v32, 2  ;;  %v6748_v32 = vld [vmem:[%s9326_s4 + $0x448] sm:$0xff] }
 0x30b   : > { %3315 = vmatpush.bf16.msrb.mxu0 %v6677_v20 }
 0x30c   : > { %3033 = vmatmul.bf16.vlgmr.msra.gmra.mxu1 %v2781_v41 }
 0x30d   : > { %v8787_v43 = vpop.f32.mrf.mxu3  ;;  %3327 = vmatpush.bf16.msrb.mxu1 %v6686_v19 }
 0x30f   : > { %v2285_v23 = vpop.f32.mrf.mxu1  ;;  %v2313_v8 = vpop.f32.mrf.mxu2  ;;  %3316 = vmatpush.bf16.msrb.mxu0 %v6676_v9 }
 0x310   : > { %v8804_v22 = vadd.f32 %v2285_v23, %v2258_v54  ;;  %v2314_v50 = vadd.f32 %v2313_v8, %v8702_v39  ;;  %v6694_v8 = vld [vmem:[%s9326_s4 + $0x298] sm:$0xff] }
 0x311   : > { %v8810_v47 = vpop.f32.mrf.mxu0  ;;  %3328 = vmatpush.bf16.msrb.mxu1 %v6685_v12 }
 0x313   : > { %3317 = vmatpush.bf16.msrb.mxu0 %v6675_v51 }
 0x315   : > { %v2341_v14 = vpop.f32.mrf.mxu3  ;;  %3329 = vmatpush.bf16.msrb.mxu1 %v6684_v42 }
 0x316   : > { %v8824_v26 = vadd.f32 %v2341_v14, %v2314_v50  ;;  %3318 = vmatmul.bf16.vlgmr.msrb.gmra.mxu0 %v3066_v55  ;;  %v6674_v55 = vld [vmem:[%s9326_s4 + $0x1f8] sm:$0xff] }
 0x317   : > { %3608 = vmatpush.bf16.msra.mxu0 %v6718_v7  ;;  %v8829_v62 = vpop.f32.mrf.mxu1  ;;  %v8831_v63 = vpop.f32.mrf.mxu2 }
 0x319   : > { %v2262_v28 = vpop.f32.mrf.mxu0  ;;  %3330 = vmatpush.bf16.msrb.mxu1 %v6683_v48 }
 0x31a   : > { %v2263_v52 = vadd.f32 %v2262_v28, %v8692_v57 }
 0x31b   : > { %3609 = vmatpush.bf16.msra.mxu0 %v6717_v38  ;;  %v6747_v38 = vld [vmem:[%s9326_s4 + $0x440] sm:$0xff] }
 0x31d   : > { %3625 = vmatpush.bf16.msra.mxu1 %v6722_v11  ;;  %v8855_v16 = vpop.f32.mrf.mxu3  ;;  %v6673_v11 = vld [vmem:[%s9326_s4 + $0x1f0] sm:$0xff] }
 0x31f   : > { %3610 = vmatpush.bf16.msra.mxu0 %v6716_v13  ;;  %v2290_v45 = vpop.f32.mrf.mxu1  ;;  %v2318_v60 = vpop.f32.mrf.mxu2 }
 0x320   : > { %v8857_v6 = vadd.f32 %v2290_v45, %v2263_v52  ;;  %v2319_v17 = vadd.f32 %v2318_v60, %v8702_v39 }
 0x321   : > { %3626 = vmatpush.bf16.msra.mxu1 %v6721_v24  ;;  %v2264_v58 = vpop.f32.mrf.mxu0 }
 0x323   : > { %3611 = vmatpush.bf16.msra.mxu0 %v6715_v59  ;;  %v6691_v59 = vld [vmem:[%s9326_s4 + $0x280] sm:$0xff] }
 0x325   : > { %3627 = vmatpush.bf16.msra.mxu1 %v6720_v3  ;;  %v2346_v0 = vpop.f32.mrf.mxu3 }
 0x326   : > { %v8872_v2 = vadd.f32 %v2346_v0, %v2319_v17 }
 0x327   : > { %3612 = vmatpush.bf16.msra.mxu0 %v6714_v49  ;;  %v2292_v36 = vpop.f32.mrf.mxu1  ;;  %v2320_v20 = vpop.f32.mrf.mxu2  ;;  %v6672_v49 = vld [vmem:[%s9326_s4 + $0x1e8] sm:$0xff] }
 0x329   : > { %3628 = vmatpush.bf16.msra.mxu1 %v6719_v40  ;;  %v2359_v18 = vpop.f32.mrf.mxu0  ;;  %v6730_v40 = vld [vmem:[%s9326_s4 + $0x3b8] sm:$0xff] }
 0x32a   : > { %v2360_v54 = vadd.f32 %v2359_v18, %v8878_v5 }
 0x32b   : > { %3613 = vmatpush.bf16.msra.mxu0 %v6713_v10  ;;  %v6702_v10 = vld [vmem:[%s9326_s4 + $0x2d8] sm:$0xff] }
 0x32d   : > { %v2348_v41 = vpop.f32.mrf.mxu3 }
 0x32f   : > { %3614 = vmatpush.bf16.msra.mxu0 %v6712_v21  ;;  %v2387_v25 = vpop.f32.mrf.mxu1  ;;  %v2415_v19 = vpop.f32.mrf.mxu2  ;;  %v6671_v21 = vld [vmem:[%s9326_s4 + $0x1e0] sm:$0xff] }
 0x330   : > { %v2388_v9 = vadd.f32 %v2387_v25, %v2360_v54  ;;  %v2416_v15 = vadd.f32 %v2415_v19, %v8888_v27  ;;  %v6701_v54 = vld [vmem:[%s9326_s4 + $0x2d0] sm:$0xff] }
 0x331   : > { %v2361_v30 = vpop.f32.mrf.mxu0  ;;  %v6729_v25 = vld [vmem:[%s9326_s4 + $0x3b0] sm:$0xff] }
 0x332   : > { %v2464_v23 = vmax.f32 %v2388_v9, 0.0  ;;  %v2362_v14 = vadd.f32 %v2361_v30, %v8878_v5  ;;  %v6670_v30 = vld [vmem:[%s9326_s4 + $0x1d8] sm:$0xff] }
 0x333   : > { %3615 = vmatpush.bf16.msra.mxu0 %v6711_v33 }
 0x334   : > { %v2497_v51 = vpack.c.bf16 %v2464_v23, %v2464_v23 }
 0x335   : > { %v2443_v12 = vpop.f32.mrf.mxu3 }
 0x336   : > { %v2444_v61 = vadd.f32 %v2443_v12, %v2416_v15  ;;  %2761 = vmatmul.bf16.vlgmr.msrb.gmra.mxu2 %v2497_v51  ;;  %v6700_v15 = vld [vmem:[%s9326_s4 + $0x2c8] sm:$0xff] }
 0x337   : > { %3910 = vmatpush.bf16.msrb.mxu0 %v6750_v1  ;;  %v2389_v50 = vpop.f32.mrf.mxu1  ;;  %v2417_v7 = vpop.f32.mrf.mxu2  ;;  %3340 = vmatpush.bf16.msrb.mxu2 %v6694_v8  ;;  %v6728_v12 = vld [vmem:[%s9326_s4 + $0x3a8] sm:$0xff] }
 0x338   : > { %v2465_v31 = vmax.f32 %v2444_v61, 0.0  ;;  %v2390_v48 = vadd.f32 %v2389_v50, %v2362_v14  ;;  %v2418_v45 = vadd.f32 %v2417_v7, %v8888_v27  ;;  %v6758_v7 = vld [vmem:[%s9326_s4 + $0x498] sm:$0xff]  ;;  %v6699_v14 = vld [vmem:[%s9326_s4 + $0x2c0] sm:$0xff] }
 0x339   : > { %v2364_v42 = vpop.f32.mrf.mxu0 }
 0x33a   : > { %v2498_v46 = vpack.c.bf16 %v2465_v31, %v2465_v31  ;;  %v2365_v28 = vadd.f32 %v2364_v42, %v8878_v5  ;;  %v2468_v24 = vmax.f32 %v2390_v48, 0.0  ;;  %v6669_v31 = vld [vmem:[%s9326_s4 + $0x1d0] sm:$0xff] }
 0x33b   : > { %3911 = vmatpush.bf16.msrb.mxu0 %v6749_v44  ;;  %3341 = vmatpush.bf16.msrb.mxu2 %v6693_v35 }
 0x33c   : > { %5426 = vmatmul.msk.bf16.vlgmr.msrb.gmra.mxu3 %vm2723_vm1, %v2498_v46  ;;  %v2782_v0 = vpack.c.bf16 %v2468_v24, %v2468_v24  ;;  %v6727_v46 = vld [vmem:[%s9326_s4 + $0x3a0] sm:$0xff]  ;;  %v6726_v24 = vld [vmem:[%s9326_s4 + $0x398] sm:$0xff] }
 0x33d   : > { %3297 = vmatpush.bf16.msrb.mxu3 %v6674_v55  ;;  %v2445_v13 = vpop.f32.mrf.mxu3 }
 0x33e   : > { %v2446_v3 = vadd.f32 %v2445_v13, %v2418_v45 }
 0x33f   : > { %3912 = vmatpush.bf16.msrb.mxu0 %v6748_v32  ;;  %v2392_v52 = vpop.f32.mrf.mxu1  ;;  %v2420_v4 = vpop.f32.mrf.mxu2  ;;  %3342 = vmatpush.bf16.msrb.mxu2 %v6692_v29 }
 0x340   : > { %v2393_v60 = vadd.f32 %v2392_v52, %v2365_v28  ;;  %v2469_v18 = vmax.f32 %v2446_v3, 0.0  ;;  %v2421_v23 = vadd.f32 %v2420_v4, %v8888_v27  ;;  %v6668_v52 = vld [vmem:[%s9326_s4 + $0x1c8] sm:$0xff] }
 0x341   : > { %3298 = vmatpush.bf16.msrb.mxu3 %v6673_v11  ;;  %v2366_v17 = vpop.f32.mrf.mxu0  ;;  %v6757_v11 = vld [vmem:[%s9326_s4 + $0x490] sm:$0xff] }
 0x342   : > { %v2472_v58 = vmax.f32 %v2393_v60, 0.0  ;;  %v2367_v33 = vadd.f32 %v2366_v17, %v8878_v5  ;;  %v2783_v44 = vpack.c.bf16 %v2469_v18, %v2469_v18 }
 0x343   : > { %3913 = vmatpush.bf16.msrb.mxu0 %v6747_v38  ;;  %3343 = vmatpush.bf16.msrb.mxu2 %v6691_v59  ;;  %v6698_v59 = vld [vmem:[%s9326_s4 + $0x2b8] sm:$0xff] }
 0x344   : > { %v3067_v36 = vpack.c.bf16 %v2472_v58, %v2472_v58  ;;  %v6667_v58 = vld [vmem:[%s9326_s4 + $0x1c0] sm:$0xff] }
 0x345   : > { %3299 = vmatpush.bf16.msrb.mxu3 %v6672_v49  ;;  %v2448_v20 = vpop.f32.mrf.mxu3  ;;  %v6756_v49 = vld [vmem:[%s9326_s4 + $0x488] sm:$0xff] }
 0x346   : > { %3046 = vmatmul.bf16.vlgmr.msra.gmra.mxu2 %v2782_v0  ;;  %3331 = vmatmul.bf16.vlgmr.msrb.gmra.mxu1 %v3067_v36  ;;  %v2449_v32 = vadd.f32 %v2448_v20, %v2421_v23  ;;  %v6710_v0 = vld [vmem:[%s9326_s4 + $0x318] sm:$0xff] }
 0x347   : > { %3582 = vmatpush.bf16.msra.mxu2 %v6702_v10  ;;  %3867 = vmatpush.bf16.msrb.mxu1 %v6730_v40  ;;  %v2394_v41 = vpop.f32.mrf.mxu1  ;;  %v2422_v1 = vpop.f32.mrf.mxu2  ;;  %v2470_v10 = vmax.f32 %v8741_v56, 0.0  ;;  %v6725_v56 = vld [vmem:[%s9326_s4 + $0x390] sm:$0xff] }
 0x348   : > { %v2395_v19 = vadd.f32 %v2394_v41, %v2367_v33  ;;  %v2423_v50 = vadd.f32 %v2422_v1, %v8888_v27  ;;  %v2473_v29 = vmax.f32 %v2449_v32, 0.0  ;;  %v6755_v1 = vld [vmem:[%s9326_s4 + $0x480] sm:$0xff] }
 0x349   : > { %3300 = vmatpush.bf16.msrb.mxu3 %v6671_v21  ;;  %v2369_v9 = vpop.f32.mrf.mxu0  ;;  %v6697_v21 = vld [vmem:[%s9326_s4 + $0x2b0] sm:$0xff] }
 0x34a   : > { %v2476_v8 = vmax.f32 %v2395_v19, 0.0  ;;  %v2370_v51 = vadd.f32 %v2369_v9, %v8878_v5  ;;  %v3068_v45 = vpack.c.bf16 %v2473_v29, %v2473_v29  ;;  %v2255_v19 = vadd.f32 %v8743_v53, %v8692_v57  ;;  %v6709_v9 = vld [vmem:[%s9326_s4 + $0x310] sm:$0xff]  ;;  %v6754_v53 = vld [vmem:[%s9326_s4 + $0x478] sm:$0xff] }
 0x34b   : > { %3583 = vmatpush.bf16.msra.mxu2 %v6701_v54  ;;  %3868 = vmatpush.bf16.msrb.mxu1 %v6729_v25  ;;  %v3065_v25 = vpack.c.bf16 %v2470_v10, %v2470_v10 }
 0x34c   : > { %v3352_v61 = vpack.c.bf16 %v2476_v8, %v2476_v8  ;;  %5595 = vmatmul.msk.bf16.vlgmr.msra.gmra.mxu3 %vm2723_vm1, %v2783_v44  ;;  %v6724_v44 = vld [vmem:[%s9326_s4 + $0x388] sm:$0xff]  ;;  %v2283_v23 = vadd.f32 %v8760_v37, %v2255_v19 }
 0x34d   : > { %3301 = vmatpush.bf16.msrb.mxu3 %v6670_v30  ;;  %v2450_v35 = vpop.f32.mrf.mxu3  ;;  %v6696_v30 = vld [vmem:[%s9326_s4 + $0x2a8] sm:$0xff] }
 0x34e   : > { %v2451_v42 = vadd.f32 %v2450_v35, %v2423_v50  ;;  %3616 = vmatmul.bf16.vlgmr.msra.gmra.mxu0 %v3352_v61  ;;  %v6695_v61 = vld [vmem:[%s9326_s4 + $0x2a0] sm:$0xff] }
 0x34f   : > { %3584 = vmatpush.bf16.msra.mxu2 %v6700_v15  ;;  %3869 = vmatpush.bf16.msrb.mxu1 %v6728_v12  ;;  %v2397_v55 = vpop.f32.mrf.mxu1  ;;  %v2425_v38 = vpop.f32.mrf.mxu2  ;;  %v6708_v12 = vld [vmem:[%s9326_s4 + $0x308] sm:$0xff]  ;;  %v6723_v50 = vld [vmem:[%s9326_s4 + $0x380] sm:$0xff] }
 0x350   : > { %v2477_v48 = vmax.f32 %v2451_v42, 0.0  ;;  %4152 = vmatpush.bf16.msra.mxu0 %v6758_v7  ;;  %v8966_v13 = vadd.f32 %v2397_v55, %v2370_v51  ;;  %v2426_v17 = vadd.f32 %v2425_v38, %v8888_v27  ;;  %v2474_v7 = vmax.f32 %v2283_v23, 0.0  ;;  %v6738_v42 = vld [vmem:[%s9326_s4 + $0x3f8] sm:$0xff]  ;;  %v6745_v23 = vld [vmem:[%s9326_s4 + $0x430] sm:$0xff] }
 0x351   : > { %3302 = vmatpush.bf16.msrb.mxu3 %v6669_v31  ;;  %v2371_v28 = vpop.f32.mrf.mxu0  ;;  %v6753_v31 = vld [vmem:[%s9326_s4 + $0x470] sm:$0xff]  ;;  %v2478_v55 = vmax.f32 %v8804_v22, 0.0  ;;  %v6752_v22 = vld [vmem:[%s9326_s4 + $0x468] sm:$0xff] }
 0x352   : > { %v2372_v4 = vadd.f32 %v2371_v28, %v8878_v5  ;;  %v3353_v60 = vpack.c.bf16 %v2477_v48, %v2477_v48  ;;  %v3350_v29 = vpack.c.bf16 %v2474_v7, %v2474_v7  ;;  %v6737_v48 = vld [vmem:[%s9326_s4 + $0x3f0] sm:$0xff]  ;;  %v6744_v7 = vld [vmem:[%s9326_s4 + $0x428] sm:$0xff] }
 0x353   : > { %3585 = vmatpush.bf16.msra.mxu2 %v6699_v14  ;;  %3870 = vmatpush.bf16.msrb.mxu1 %v6727_v46  ;;  %v6766_v14 = vld [vmem:[%s9326_s4 + $0x4d8] sm:$0xff]  ;;  %v2260_v46 = vadd.f32 %v8810_v47, %v8692_v57  ;;  %v6765_v57 = vld [vmem:[%s9326_s4 + $0x4d0] sm:$0xff] }
 0x354   : > { %4153 = vmatpush.bf16.msra.mxu0 %v6757_v11  ;;  %v3635_v11 = vpack.c.bf16 %v2478_v55, %v2478_v55 }
 0x355   : > { %3303 = vmatpush.bf16.msrb.mxu3 %v6668_v52  ;;  %v2453_v3 = vpop.f32.mrf.mxu3  ;;  %v2288_v28 = vadd.f32 %v8829_v62, %v2260_v46  ;;  %v6751_v62 = vld [vmem:[%s9326_s4 + $0x460] sm:$0xff] }
 0x356   : > { %v2454_v40 = vadd.f32 %v2453_v3, %v2426_v17  ;;  %5764 = vmatmul.msk.bf16.vlgmr.msrb.gmra.mxu2 %vm2723_vm1, %v3068_v45  ;;  %5933 = vmatmul.msk.bf16.vlgmr.msra.gmra.mxu1 %vm2723_vm1, %v3353_v60  ;;  %v6736_v45 = vld [vmem:[%s9326_s4 + $0x3e8] sm:$0xff]  ;;  %v6705_v3 = vld [vmem:[%s9326_s4 + $0x2f0] sm:$0xff] }
 0x357   : > { %3586 = vmatpush.bf16.msra.mxu2 %v6698_v59  ;;  %3871 = vmatpush.bf16.msrb.mxu1 %v6726_v24  ;;  %v2399_v36 = vpop.f32.mrf.mxu1  ;;  %v2427_v20 = vpop.f32.mrf.mxu2  ;;  %v2482_v60 = vmax.f32 %v2288_v28, 0.0  ;;  %v6764_v17 = vld [vmem:[%s9326_s4 + $0x4c8] sm:$0xff] }
 0x358   : > { %v2481_v18 = vmax.f32 %v2454_v40, 0.0  ;;  %4154 = vmatpush.bf16.msra.mxu0 %v6756_v49  ;;  %v9000_v33 = vadd.f32 %v2399_v36, %v2372_v4  ;;  %v2428_v41 = vadd.f32 %v2427_v20, %v8888_v27  ;;  %v6706_v4 = vld [vmem:[%s9326_s4 + $0x2f8] sm:$0xff]  ;;  %v6793_v36 = vld [vmem:[%s9326_s4 + $0x5b0] sm:$0xff]  ;;  %v2311_v20 = vadd.f32 %v8762_v34, %v8702_v39  ;;  %v6792_v34 = vld [vmem:[%s9326_s4 + $0x5a8] sm:$0xff] }
 0x359   : > { %3304 = vmatpush.bf16.msrb.mxu3 %v6667_v58  ;;  %v9006_v54 = vpop.f32.mrf.mxu0  ;;  %v6794_v49 = vld [vmem:[%s9326_s4 + $0x5b8] sm:$0xff]  ;;  %v6735_v58 = vld [vmem:[%s9326_s4 + $0x3e0] sm:$0xff]  ;;  %v3920_v10 = vpack.c.bf16 %v2482_v60, %v2482_v60 }
 0x35a   : > { %v3638_v8 = vpack.c.bf16 %v2481_v18, %v2481_v18  ;;  %v6734_v18 = vld [vmem:[%s9326_s4 + $0x3d8] sm:$0xff] }
 0x35b   : > { %3587 = vmatpush.bf16.msra.mxu2 %v6697_v21  ;;  %3872 = vmatpush.bf16.msrb.mxu1 %v6725_v56  ;;  %v6704_v21 = vld [vmem:[%s9326_s4 + $0x2e8] sm:$0xff]  ;;  %v2339_v56 = vadd.f32 %v8787_v43, %v2311_v20  ;;  %v6703_v43 = vld [vmem:[%s9326_s4 + $0x2e0] sm:$0xff]  ;;  %v2480_v20 = vmax.f32 %v8966_v13, 0.0 }
 0x35c   : > { %4155 = vmatpush.bf16.msra.mxu0 %v6755_v1  ;;  %3305 = vmatmul.bf16.vlgmr.msrb.gmra.mxu3 %v3065_v25  ;;  %v6746_v25 = vld [vmem:[%s9326_s4 + $0x438] sm:$0xff] }
 0x35d   : > { %3595 = vmatpush.bf16.msra.mxu3 %v6710_v0  ;;  %v2455_v51 = vpop.f32.mrf.mxu3  ;;  %v6763_v0 = vld [vmem:[%s9326_s4 + $0x4c0] sm:$0xff]  ;;  %v2475_v19 = vmax.f32 %v2339_v56, 0.0  ;;  %v6769_v56 = vld [vmem:[%s9326_s4 + $0x4f0] sm:$0xff]  ;;  %v3637_v13 = vpack.c.bf16 %v2480_v20, %v2480_v20 }
 0x35e   : > { %v9023_v15 = vadd.f32 %v2455_v51, %v2428_v41  ;;  %6102 = vmatmul.msk.bf16.vlgmr.msrb.gmra.mxu0 %vm2723_vm1, %v3638_v8  ;;  %v6762_v41 = vld [vmem:[%s9326_s4 + $0x4b8] sm:$0xff]  ;;  %v6732_v51 = vld [vmem:[%s9326_s4 + $0x3c8] sm:$0xff] }
 0x35f   : > { %3588 = vmatpush.bf16.msra.mxu2 %v6696_v30  ;;  %3873 = vmatpush.bf16.msrb.mxu1 %v6724_v44  ;;  %v9029_v37 = vpop.f32.mrf.mxu1  ;;  %v2430_v32 = vpop.f32.mrf.mxu2  ;;  %v6761_v30 = vld [vmem:[%s9326_s4 + $0x4b0] sm:$0xff]  ;;  %v6791_v44 = vld [vmem:[%s9326_s4 + $0x5a0] sm:$0xff]  ;;  %v3351_v8 = vpack.c.bf16 %v2475_v19, %v2475_v19 }
 0x360   : > { %4156 = vmatpush.bf16.msra.mxu0 %v6754_v53  ;;  %v2431_v35 = vadd.f32 %v2430_v32, %v8888_v27  ;;  %v6707_v27 = vld [vmem:[%s9326_s4 + $0x300] sm:$0xff]  ;;  %v2316_v53 = vadd.f32 %v8831_v63, %v8702_v39  ;;  %v6760_v32 = vld [vmem:[%s9326_s4 + $0x4a8] sm:$0xff] }
 0x361   : > { %3596 = vmatpush.bf16.msra.mxu3 %v6709_v9  ;;  %v2376_v38 = vpop.f32.mrf.mxu0  ;;  %v6733_v9 = vld [vmem:[%s9326_s4 + $0x3d0] sm:$0xff] }
 0x362   : > { %v6774_v38 = vld [vmem:[%s9326_s4 + $0x518] sm:$0xff] }
 0x363   : > { %3589 = vmatpush.bf16.msra.mxu2 %v6695_v61  ;;  %3874 = vmatpush.bf16.msrb.mxu1 %v6723_v50  ;;  %v6790_v61 = vld [vmem:[%s9326_s4 + $0x598] sm:$0xff]  ;;  %v2344_v50 = vadd.f32 %v8855_v16, %v2316_v53  ;;  %v6759_v16 = vld [vmem:[%s9326_s4 + $0x4a0] sm:$0xff] }
 0x364   : > { %4157 = vmatpush.bf16.msra.mxu0 %v6753_v31  ;;  %v2479_v31 = vmax.f32 %v8824_v26, 0.0  ;;  %v6743_v26 = vld [vmem:[%s9326_s4 + $0x420] sm:$0xff]  ;;  %v6786_v53 = vld [vmem:[%s9326_s4 + $0x578] sm:$0xff] }
 0x365   : > { %3597 = vmatpush.bf16.msra.mxu3 %v6708_v12  ;;  %v2458_v52 = vpop.f32.mrf.mxu3  ;;  %v2483_v55 = vmax.f32 %v2344_v50, 0.0  ;;  %v6804_v50 = vld [vmem:[%s9326_s4 + $0x608] sm:$0xff] }
 0x366   : > { %v9063_v47 = vadd.f32 %v2458_v52, %v2431_v35  ;;  %3590 = vmatmul.bf16.vlgmr.msra.gmra.mxu2 %v3350_v29  ;;  %3875 = vmatmul.bf16.vlgmr.msrb.gmra.mxu1 %v3635_v11  ;;  %v6731_v35 = vld [vmem:[%s9326_s4 + $0x3c0] sm:$0xff]  ;;  %v6788_v29 = vld [vmem:[%s9326_s4 + $0x588] sm:$0xff]  ;;  %v6801_v11 = vld [vmem:[%s9326_s4 + $0x5f0] sm:$0xff] }
 0x367   : > { %3880 = vmatpush.bf16.msrb.mxu2 %v6738_v42  ;;  %4165 = vmatpush.bf16.msra.mxu1 %v6766_v14  ;;  %v2404_v59 = vpop.f32.mrf.mxu1  ;;  %v2432_v24 = vpop.f32.mrf.mxu2  ;;  %v6789_v42 = vld [vmem:[%s9326_s4 + $0x590] sm:$0xff]  ;;  %v6802_v14 = vld [vmem:[%s9326_s4 + $0x5f8] sm:$0xff] }
 0x368   : > { %4158 = vmatpush.bf16.msra.mxu0 %v6752_v22  ;;  %v3921_v22 = vpack.c.bf16 %v2483_v55, %v2483_v55  ;;  %v6742_v52 = vld [vmem:[%s9326_s4 + $0x418] sm:$0xff]  ;;  %v6772_v59 = vld [vmem:[%s9326_s4 + $0x508] sm:$0xff]  ;;  %v6781_v55 = vld [vmem:[%s9326_s4 + $0x550] sm:$0xff] }
 0x369   : > { %3598 = vmatpush.bf16.msra.mxu3 %v6707_v27  ;;  %v3636_v27 = vpack.c.bf16 %v2479_v31, %v2479_v31  ;;  %v6800_v24 = vld [vmem:[%s9326_s4 + $0x5e8] sm:$0xff]  ;;  %v2489_v31 = vmax.f32 %v9063_v47, 0.0 }
 0x36b   : > { %3881 = vmatpush.bf16.msrb.mxu2 %v6737_v48  ;;  %4166 = vmatpush.bf16.msra.mxu1 %v6765_v57  ;;  %v6773_v48 = vld [vmem:[%s9326_s4 + $0x510] sm:$0xff]  ;;  %v6787_v57 = vld [vmem:[%s9326_s4 + $0x580] sm:$0xff] }
 0x36c   : > { %4159 = vmatpush.bf16.msra.mxu0 %v6751_v62  ;;  %v6741_v62 = vld [vmem:[%s9326_s4 + $0x410] sm:$0xff] }
 0x36d   : > { %3599 = vmatpush.bf16.msra.mxu3 %v6706_v4  ;;  %v2460_v40 = vpop.f32.mrf.mxu3  ;;  %v2487_v4 = vmax.f32 %v8872_v2, 0.0 }
 0x36e   : > { %v6798_v40 = vld [vmem:[%s9326_s4 + $0x5d8] sm:$0xff] }
 0x36f   : > { %3882 = vmatpush.bf16.msrb.mxu2 %v6736_v45  ;;  %4167 = vmatpush.bf16.msra.mxu1 %v6764_v17  ;;  %v4206_v60 = vpack.c.bf16 %v2487_v4, %v2487_v4  ;;  %v6771_v17 = vld [vmem:[%s9326_s4 + $0x500] sm:$0xff] }
 0x370   : > { %4450 = vmatpush.bf16.msrb.mxu0 %v6794_v49  ;;  %v6799_v49 = vld [vmem:[%s9326_s4 + $0x5e0] sm:$0xff] }
 0x371   : > { %3600 = vmatpush.bf16.msra.mxu3 %v6705_v3  ;;  %4160 = vmatmul.bf16.vlgmr.msra.gmra.mxu0 %v3920_v10  ;;  %v6770_v10 = vld [vmem:[%s9326_s4 + $0x4f8] sm:$0xff] }
 0x373   : > { %3883 = vmatpush.bf16.msrb.mxu2 %v6735_v58  ;;  %4168 = vmatpush.bf16.msra.mxu1 %v6763_v0  ;;  %v2736_v1 = vpop.f32.mrf.mxu0  ;;  %v6740_v58 = vld [vmem:[%s9326_s4 + $0x408] sm:$0xff]  ;;  %v6739_v0 = vld [vmem:[%s9326_s4 + $0x400] sm:$0xff] }
 0x374   : > { %4451 = vmatpush.bf16.msrb.mxu0 %v6793_v36  ;;  %v6778_v36 = vld [vmem:[%s9326_s4 + $0x538] sm:$0xff] }
 0x375   : > { %3601 = vmatpush.bf16.msra.mxu3 %v6704_v21 }
 0x377   : > { %3884 = vmatpush.bf16.msrb.mxu2 %v6734_v18  ;;  %4169 = vmatpush.bf16.msra.mxu1 %v6762_v41  ;;  %v6797_v18 = vld [vmem:[%s9326_s4 + $0x5d0] sm:$0xff] }
 0x378   : > { %4452 = vmatpush.bf16.msrb.mxu0 %v6792_v34  ;;  %v6777_v34 = vld [vmem:[%s9326_s4 + $0x530] sm:$0xff] }
 0x379   : > { %3602 = vmatpush.bf16.msra.mxu3 %v6703_v43  ;;  %v2749_v12 = vpop.f32.mrf.mxu1  ;;  %v2375_v43 = vadd.f32 %v9006_v54, %v8878_v5  ;;  %v6767_v5 = vld [vmem:[%s9326_s4 + $0x4e0] sm:$0xff] }
 0x37a   : > { %v9137_v39 = vadd.f32 %v2749_v12, %v2736_v1  ;;  %v6768_v1 = vld [vmem:[%s9326_s4 + $0x4e8] sm:$0xff]  ;;  %v6795_v54 = vld [vmem:[%s9326_s4 + $0x5c0] sm:$0xff] }
 0x37b   : > { %3885 = vmatpush.bf16.msrb.mxu2 %v6733_v9  ;;  %4170 = vmatpush.bf16.msra.mxu1 %v6761_v30  ;;  %v2738_v63 = vpop.f32.mrf.mxu0  ;;  %v2403_v19 = vadd.f32 %v9029_v37, %v2375_v43  ;;  %v6776_v9 = vld [vmem:[%s9326_s4 + $0x528] sm:$0xff]  ;;  %v2484_v30 = vmax.f32 %v9000_v33, 0.0  ;;  %v6805_v33 = vld [vmem:[%s9326_s4 + $0x610] sm:$0xff] }
 0x37c   : > { %4453 = vmatpush.bf16.msrb.mxu0 %v6791_v44  ;;  %3603 = vmatmul.bf16.vlgmr.msra.gmra.mxu3 %v3351_v8  ;;  %v6775_v8 = vld [vmem:[%s9326_s4 + $0x520] sm:$0xff] }
 0x37d   : > { %3893 = vmatpush.bf16.msrb.mxu3 %v6746_v25  ;;  %v6796_v25 = vld [vmem:[%s9326_s4 + $0x5c8] sm:$0xff]  ;;  %v2488_v44 = vmax.f32 %v2403_v19, 0.0 }
 0x37f   : > { %3886 = vmatpush.bf16.msrb.mxu2 %v6732_v51  ;;  %4171 = vmatpush.bf16.msra.mxu1 %v6760_v32  ;;  %v3922_v51 = vpack.c.bf16 %v2484_v30, %v2484_v30  ;;  %v4207_v12 = vpack.c.bf16 %v2488_v44, %v2488_v44  ;;  %v2485_v32 = vmax.f32 %v9023_v15, 0.0  ;;  %v6803_v15 = vld [vmem:[%s9326_s4 + $0x600] sm:$0xff] }
 0x380   : > { %4454 = vmatpush.bf16.msrb.mxu0 %v6790_v61  ;;  %v6785_v61 = vld [vmem:[%s9326_s4 + $0x570] sm:$0xff] }
 0x381   : > { %3894 = vmatpush.bf16.msrb.mxu3 %v6745_v23  ;;  %v2751_v46 = vpop.f32.mrf.mxu1  ;;  %v6806_v23 = vld [vmem:[%s9326_s4 + $0x618] sm:$0xff]  ;;  %v3923_v63 = vpack.c.bf16 %v2485_v32, %v2485_v32 }
 0x383   : > { %3887 = vmatpush.bf16.msrb.mxu2 %v6731_v35  ;;  %4172 = vmatpush.bf16.msra.mxu1 %v6759_v16  ;;  %v3021_v28 = vpop.f32.mrf.mxu0  ;;  %v6783_v35 = vld [vmem:[%s9326_s4 + $0x560] sm:$0xff]  ;;  %v6782_v16 = vld [vmem:[%s9326_s4 + $0x558] sm:$0xff] }
 0x384   : > { %4455 = vmatpush.bf16.msrb.mxu0 %v6789_v42  ;;  %v4208_v42 = vpack.c.bf16 %v2489_v31, %v2489_v31 }
 0x385   : > { %3895 = vmatpush.bf16.msrb.mxu3 %v6744_v7  ;;  %v6784_v7 = vld [vmem:[%s9326_s4 + $0x568] sm:$0xff] }
 0x386   : > { %3888 = vmatmul.bf16.vlgmr.msrb.gmra.mxu2 %v3636_v27  ;;  %4173 = vmatmul.bf16.vlgmr.msra.gmra.mxu1 %v3921_v22  ;;  %v2486_v27 = vmax.f32 %v8857_v6, 0.0 }
 0x387   : > { %4178 = vmatpush.bf16.msra.mxu2 %v6774_v38  ;;  %4463 = vmatpush.bf16.msrb.mxu1 %v6802_v14  ;;  %v6780_v38 = vld [vmem:[%s9326_s4 + $0x548] sm:$0xff] }
 0x388   : > { %4456 = vmatpush.bf16.msrb.mxu0 %v6788_v29  ;;  %v4205_v46 = vpack.c.bf16 %v2486_v27, %v2486_v27 }
 0x389   : > { %3896 = vmatpush.bf16.msrb.mxu3 %v6743_v26  ;;  %v3034_v45 = vpop.f32.mrf.mxu1  ;;  %v6779_v26 = vld [vmem:[%s9326_s4 + $0x540] sm:$0xff] }
 0x38a   : > { %v9186_v2 = vadd.f32 %v3034_v45, %v3021_v28 }
 0x38b   : > { %4179 = vmatpush.bf16.msra.mxu2 %v6773_v48  ;;  %4464 = vmatpush.bf16.msrb.mxu1 %v6801_v11  ;;  %v3023_v3 = vpop.f32.mrf.mxu0 }
 0x38c   : > { %4457 = vmatpush.bf16.msrb.mxu0 %v6787_v57 }
 0x38d   : > { %3897 = vmatpush.bf16.msrb.mxu3 %v6742_v52 }
 0x38f   : > { %4180 = vmatpush.bf16.msra.mxu2 %v6772_v59  ;;  %4465 = vmatpush.bf16.msrb.mxu1 %v6800_v24 }
 0x390   : > { %4458 = vmatmul.bf16.vlgmr.msrb.gmra.mxu0 %v4206_v60 }
 0x391   : > { %3898 = vmatpush.bf16.msrb.mxu3 %v6741_v62  ;;  %v3036_v21 = vpop.f32.mrf.mxu1 }
 0x393   : > { %4181 = vmatpush.bf16.msra.mxu2 %v6771_v17  ;;  %4466 = vmatpush.bf16.msrb.mxu1 %v6799_v49  ;;  %v9216_v41 = vpop.f32.mrf.mxu0 }
 0x395   : > { %3899 = vmatpush.bf16.msrb.mxu3 %v6740_v58 }
 0x397   : > { %4182 = vmatpush.bf16.msra.mxu2 %v6770_v10  ;;  %4467 = vmatpush.bf16.msrb.mxu1 %v6798_v40 }
 0x399   : > { %3900 = vmatpush.bf16.msrb.mxu3 %v6739_v0 }
 0x39b   : > { %4183 = vmatpush.bf16.msra.mxu2 %v6769_v56  ;;  %4468 = vmatpush.bf16.msrb.mxu1 %v6797_v18  ;;  %v3321_v37 = vpop.f32.mrf.mxu0 }
 0x39c   : > { %3901 = vmatmul.bf16.vlgmr.msrb.gmra.mxu3 %v3637_v13 }
 0x39d   : > { %4195 = vmatpush.bf16.msra.mxu3 %v6778_v36 }
 0x39f   : > { %4184 = vmatpush.bf16.msra.mxu2 %v6768_v1  ;;  %4469 = vmatpush.bf16.msrb.mxu1 %v6796_v25 }
 0x3a1   : > { %4196 = vmatpush.bf16.msra.mxu3 %v6777_v34 }
 0x3a3   : > { %4185 = vmatpush.bf16.msra.mxu2 %v6767_v5  ;;  %4470 = vmatpush.bf16.msrb.mxu1 %v6795_v54 }
 0x3a5   : > { %4197 = vmatpush.bf16.msra.mxu3 %v6776_v9 }
 0x3a6   : > { %4186 = vmatmul.bf16.vlgmr.msra.gmra.mxu2 %v3922_v51  ;;  %4471 = vmatmul.bf16.vlgmr.msrb.gmra.mxu1 %v4207_v12 }
 0x3a7   : > { %4480 = vmatpush.bf16.msrb.mxu2 %v6806_v23 }
 0x3a9   : > { %4198 = vmatpush.bf16.msra.mxu3 %v6775_v8 }
 0x3ab   : > { %4481 = vmatpush.bf16.msrb.mxu2 %v6805_v33 }
 0x3ac   : > { %6271 = vmatmul.msk.bf16.vlgmr.msra.gmra.mxu3 %vm2723_vm1, %v3923_v63 }
 0x3ad   : > { %4437 = vmatpush.bf16.msrb.mxu3 %v6786_v53 }
 0x3af   : > { %4482 = vmatpush.bf16.msrb.mxu2 %v6804_v50 }
 0x3b1   : > { %4438 = vmatpush.bf16.msrb.mxu3 %v6785_v61 }
 0x3b3   : > { %4483 = vmatpush.bf16.msrb.mxu2 %v6803_v15 }
 0x3b5   : > { %4439 = vmatpush.bf16.msrb.mxu3 %v6784_v7 }
 0x3b6   : > { %6440 = vmatmul.msk.bf16.vlgmr.msrb.gmra.mxu2 %vm2723_vm1, %v4208_v42 }
 0x3b9   : > { %4440 = vmatpush.bf16.msrb.mxu3 %v6783_v35  ;;  %v2762_v47 = vpop.f32.mrf.mxu2 }
 0x3ba   : > { %v2763_v14 = vadd.f32 %v2762_v47, %v9137_v39  ;;  %v6846_v39 = vld [vmem:[%s9329_s7] ss:$0 sm:$0xff] }
 0x3bd   : > { %4441 = vmatpush.bf16.msrb.mxu3 %v6782_v16 }
 0x3bf   : > { %v2775_v29 = vpop.f32.mrf.mxu3 }
 0x3c0   : > { %v2776_v22 = vadd.f32 %v2775_v29, %v2763_v14 }
 0x3c1   : > { %4442 = vmatpush.bf16.msrb.mxu3 %v6781_v55  ;;  %v2764_v48 = vpop.f32.mrf.mxu2 }
 0x3c2   : > { %v2779_v62 = vadd.f32 %v6846_v39, %v2776_v22 }
 0x3c3   : > { %v3332_v11 = vpop.f32.mrf.mxu1 }
 0x3c5   : > { %4443 = vmatpush.bf16.msrb.mxu3 %v6780_v38 }
 0x3c7   : > { %v2777_v28 = vpop.f32.mrf.mxu3 }
 0x3c9   : > { %4444 = vmatpush.bf16.msrb.mxu3 %v6779_v26  ;;  %v3047_v52 = vpop.f32.mrf.mxu2 }
 0x3ca   : > { %v3048_v57 = vadd.f32 %v3047_v52, %v9186_v2 }
 0x3cb   : > { %v3334_v4 = vpop.f32.mrf.mxu1  ;;  %v3617_v59 = vpop.f32.mrf.mxu0 }
 0x3cc   : > { %4445 = vmatmul.bf16.vlgmr.msrb.gmra.mxu3 %v4205_v46 }
 0x3cf   : > { %v3060_v24 = vpop.f32.mrf.mxu3 }
 0x3d0   : > { %v3061_v6 = vadd.f32 %v3060_v24, %v3048_v57 }
 0x3d1   : > { %v3049_v45 = vpop.f32.mrf.mxu2 }
 0x3d2   : > { %v3064_v60 = vadd.f32 %v3061_v6, %v2779_v62 }
 0x3d3   : > { %v3619_v17 = vpop.f32.mrf.mxu0  ;;  %v3630_v49 = vpop.f32.mrf.mxu1 }
 0x3d7   : > { %v3062_v3 = vpop.f32.mrf.mxu3 }
 0x3d9   : > { %v3345_v58 = vpop.f32.mrf.mxu2 }
 0x3db   : > { %v3632_v10 = vpop.f32.mrf.mxu1  ;;  %v3915_v40 = vpop.f32.mrf.mxu0 }
 0x3df   : > { %v3306_v0 = vpop.f32.mrf.mxu3 }
 0x3e0   : > { %v3320_v2 = vadd.f32 %v9216_v41, %v3306_v0 }
 0x3e1   : > { %v3347_v36 = vpop.f32.mrf.mxu2 }
 0x3e2   : > { %v3333_v20 = vadd.f32 %v3332_v11, %v3320_v2 }
 0x3e3   : > { %v3917_v21 = vpop.f32.mrf.mxu0  ;;  %v3876_v18 = vpop.f32.mrf.mxu1 }
 0x3e4   : > { %v3346_v56 = vadd.f32 %v3345_v58, %v3333_v20 }
 0x3e6   : > { %v3349_v34 = vadd.f32 %v3346_v56, %v3064_v60 }
 0x3e7   : > { %v3308_v13 = vpop.f32.mrf.mxu3 }
 0x3e9   : > { %v3591_v43 = vpop.f32.mrf.mxu2 }
 0x3eb   : > { %v3878_v1 = vpop.f32.mrf.mxu1 }
 0x3ee   : > { %v4161_v25 = vpop.f32.mrf.mxu0 }
 0x3f1   : > { %v3593_v19 = vpop.f32.mrf.mxu2 }
 0x3f6   : > { %v4163_v9 = vpop.f32.mrf.mxu0 }
 0x3ff   : > { %v3604_v5 = vpop.f32.mrf.mxu3 }
 0x400   : > { %v3605_v54 = vadd.f32 %v3604_v5, %v3591_v43 }
 0x402   : > { %v3618_v30 = vadd.f32 %v3617_v59, %v3605_v54 }
 0x403   : > { %v4174_v44 = vpop.f32.mrf.mxu1 }
 0x404   : > { %v3631_v37 = vadd.f32 %v3630_v49, %v3618_v30  ;;  %v4175_v23 = vadd.f32 %v4174_v44, %v4161_v25 }
 0x406   : > { %v3634_v8 = vadd.f32 %v3631_v37, %v3349_v34 }
 0x407   : > { %v3606_v41 = vpop.f32.mrf.mxu3 }
 0x409   : > { %v3889_v53 = vpop.f32.mrf.mxu2 }
 0x40a   : > { %v3890_v61 = vadd.f32 %v3889_v53, %v3876_v18 }
 0x40b   : > { %v4176_v51 = vpop.f32.mrf.mxu1 }
 0x40d   : > { %v4459_v12 = vpop.f32.mrf.mxu0 }
 0x411   : > { %v3891_v33 = vpop.f32.mrf.mxu2 }
 0x415   : > { %v4461_v32 = vpop.f32.mrf.mxu0 }
 0x41f   : > { %v3902_v50 = vpop.f32.mrf.mxu3 }
 0x420   : > { %v3903_v63 = vadd.f32 %v3902_v50, %v3890_v61 }
 0x422   : > { %v3916_v7 = vadd.f32 %v3915_v40, %v3903_v63 }
 0x423   : > { %v4472_v15 = vpop.f32.mrf.mxu1 }
 0x424   : > { %v3919_v35 = vadd.f32 %v3916_v7, %v3634_v8 }
 0x427   : > { %v3904_v31 = vpop.f32.mrf.mxu3 }
 0x429   : > { %v4187_v16 = vpop.f32.mrf.mxu2 }
 0x42a   : > { %v4188_v55 = vadd.f32 %v4187_v16, %v4175_v23 }
 0x42b   : > { %v4474_v42 = vpop.f32.mrf.mxu1 }
 0x42f   : > { %v4200_v38 = vpop.f32.mrf.mxu3 }
 0x430   : > { %v4201_v47 = vadd.f32 %v4200_v38, %v4188_v55 }
 0x431   : > { %v4189_v14 = vpop.f32.mrf.mxu2 }
 0x432   : > { %v4204_v26 = vadd.f32 %v4201_v47, %v3919_v35 }
 0x437   : > { %v4202_v27 = vpop.f32.mrf.mxu3 }
 0x439   : > { %v4485_v46 = vpop.f32.mrf.mxu2 }
 0x441   : > { %v4487_v29 = vpop.f32.mrf.mxu2 }
 0x44f   : > { %v4446_v22 = vpop.f32.mrf.mxu3 }
 0x450   : > { %v4460_v48 = vadd.f32 %v4459_v12, %v4446_v22 }
 0x452   : > { %v4473_v11 = vadd.f32 %v4472_v15, %v4460_v48 }
 0x454   : > { %v4486_v28 = vadd.f32 %v4485_v46, %v4473_v11 }
 0x456   : > { %v4489_v52 = vadd.f32 %v4486_v28, %v4204_v26 }
 0x457   : > { %v4448_v57 = vpop.f32.mrf.mxu3 }
 0x458   : > { %4490 = vmax.xlane.f32.xlu0 %v4489_v52 }
 0x4cb   : > { %v4491_v4 = vpop.xlane.xlu0 %4490 }
 0x4cc   : > { %v4492_v59 = vsub.f32 %v4489_v52, %v4491_v4 }
 0x4ce   : > { %v4493_v39 = vmul.f32 1.442695, %v4492_v59 }
 0x4d0   : > { %6847 = vpow2.f32 %v4493_v39 }
 0x4d6   : > { %v6848_v24 = vpop.eup %6847 }
 0x4d7   : > { %4495 = vadd.xlane.f32.xlu0 %v6848_v24 }
 0x54a   : > { %v4496_v62 = vpop.xlane.xlu0 %4495 }
 0x54b   : > { %6849 = vrcp.f32 %v4496_v62  ;;  %v4508_v17 = vand.u32 2147483648, %v4496_v62  ;;  %v4506_v3 = vand.u32 2147483647, %v4496_v62  ;;  %vm4502_vm3 = vweird.f32 %v4496_v62 }
 0x54d   : > { %v4509_v10 = vor.u32 1.1754944e-38, %v4508_v17  ;;  %vm4507_vm5 = vcmp.eq.f32.partialorder %v4506_v3, 8.507059e+37 }
 0x551   : > { %v6850_v6 = vpop.eup %6849 }
 0x552   : > { %v4498_v45 = vmul.f32 %v6850_v6, %v4496_v62  ;;  %vm4503_vm2 = vweird.f32 %v6850_v6 }
 0x553   : > { %vm4504_vm4 = vmor %vm4502_vm3, %vm4503_vm2 }
 0x554   : > { %v4499_v60 = vsub.f32 1.0, %v4498_v45 }
 0x556   : > { %v4500_v49 = vmul.f32 %v6850_v6, %v4499_v60 }
 0x558   : > { %v4501_v58 = vadd.f32 %v6850_v6, %v4500_v49 }
 0x55a   : > { %v4505_v40 = vsel %vm4504_vm4, %v6850_v6, %v4501_v58 }
 0x55b   : > { %v4510_v0 = vsel %vm4507_vm5, %v4509_v10, %v4505_v40 }
 0x55c   : > { %v4511_v2 = vmul.f32 %v6848_v24, %v4510_v0 }
 0x55e   : > { %4512 = vst [vmem:[%s299_s12] sm:$0xff] %v4511_v2 }
 0x55f   : > { %6878 = shalt.err (!%p6875_p3)
}
 0x560   : > { %6807 = dma.vmem_to_hbm [thread:$0]  (%p6998_p5), %s4527_s13, 128, %s4529_s17, %s4514_s9  }
 0x561 PF: > { %p6813_p4 = scmp.ge.s32.totalorder %s6913_s30, 2  ;;  %s4540_s21 = sand.u32 1, %s6901_s27  }
 0x562   : > { %s4541_s26 = scalar_lea.sflag [#allocation3], %s4540_s21 }
 0x563   : > { %p6810_p7 = pnand %p6813_p4, %p7002_p6 }
 0x565   : > { %p6811_p8 = pneg %p6810_p7 }
 0x567   : > { %6896 = dma.done.wait (%p6811_p8), %s4541_s26, 128  }
 0x568   : > { %6898 = vsyncadd (%p6811_p8), %s4541_s26, 4294967168  ;;  %p18_p9 = scmp.ge.s32.totalorder %s6985_s11, 4   ;;  %s9383_s27 = smov %s6905_s28 }
 0x569   : > { %s9384_s28 = smov %s6909_s29  ;;  %s9385_s29 = smov %s6996_s14 }
 0x56a   : > { %s9386_s30 = smov %s6985_s11  ;;  %20 = sbr.rel (!%p18_p9) target bundleno = 3 (0x3), region = 93 }
 0x56f   :  { %4547 = vsyncpa [#allocation3], 1 }
 0x570   :  { %4549 = vsyncpa [#allocation3 + $0x1], 1 }

</bundles_post_ra>
